<compile_context>
chip_gen: v5e
topology: v5e:2x2
jax: 0.10.0
libtpu: 0.0.40
codegen_flags: <defaults>
</compile_context>

<pallas_src>
import functools

import jax
import jax.numpy as jnp
from jax.experimental import pallas as pl
from jax.experimental.pallas import tpu as pltpu


def _round_up(n, m):
    return -(-n // m) * m


# ------------------------------ fused kernel -------------------------------- #

def _decoder_fused_kernel(x_ref,
                          w1_ref, b1_ref,
                          w2_ref, b2_ref,
                          w3_ref, b3_ref,
                          w4_ref, b4_ref,
                          o_ref):
    """All four Linear(+ReLU) layers in one kernel; activations stay in VMEM."""

    def layer(h, w_ref, b_ref, relu):
        acc = jnp.dot(h.astype(w_ref.dtype), w_ref[...],
                      preferred_element_type=jnp.float32)
        acc = acc + b_ref[...]          # (1, N) bias broadcast over rows
        if relu:
            acc = jnp.maximum(acc, 0.0)
        return acc

    h = layer(x_ref[...], w1_ref, b1_ref, relu=True)
    h = layer(h, w2_ref, b2_ref, relu=True)
    h = layer(h, w3_ref, b3_ref, relu=True)
    h = layer(h, w4_ref, b4_ref, relu=False)
    o_ref[...] = h.astype(o_ref.dtype)


@functools.partial(jax.jit, static_argnames=("out_dim",))
def decoder_forward(padded_params, x, *, out_dim):
    """x: (M, low_feature_dim) f32 -> (M, out_dim) f32, via one fused kernel."""
    (w1, b1), (w2, b2), (w3, b3), (w4, b4) = padded_params

    M, K = x.shape
    # Batch tile: single step for small batches, 256-row tiles otherwise so
    # the tile (and its TMx2048 f32 intermediate) stays comfortably in VMEM
    # and large batches shard across megacore TCs on v7x.
    TM = min(256, _round_up(max(M, 8), 8))
    Mp = _round_up(M, TM)
    if Mp != M:                              # pad batch only if needed (static)
        x = jnp.pad(x, ((0, Mp - M), (0, 0)))
    n_out_p = w4.shape[1]                    # lane-dense padded output width

    const2d = lambda i: (0, 0)               # weights/biases: resident block
    in_specs = [
        pl.BlockSpec((TM, K), lambda i: (i, 0)),        # x tile
        pl.BlockSpec(w1.shape, const2d), pl.BlockSpec(b1.shape, const2d),
        pl.BlockSpec(w2.shape, const2d), pl.BlockSpec(b2.shape, const2d),
        pl.BlockSpec(w3.shape, const2d), pl.BlockSpec(b3.shape, const2d),
        pl.BlockSpec(w4.shape, const2d), pl.BlockSpec(b4.shape, const2d),
    ]

    out = pl.pallas_call(
        _decoder_fused_kernel,
        out_shape=jax.ShapeDtypeStruct((Mp, n_out_p), jnp.float32),
        grid_spec=pltpu.PrefetchScalarGridSpec(
            num_scalar_prefetch=0,
            grid=(Mp // TM,),
            in_specs=in_specs,
            out_specs=pl.BlockSpec((TM, n_out_p), lambda i: (i, 0)),
        ),
        compiler_params=pltpu.CompilerParams(
            dimension_semantics=("parallel",),
        ),
    )(x, w1, b1, w2, b2, w3, b3, w4, b4)

    return out[:M, :out_dim]


# ------------------------- parameter init / layout -------------------------- #

def init_linear_params(key, in_features, out_features):
    """Mimics torch.nn.Linear default init: U(-1/sqrt(fan_in), 1/sqrt(fan_in))."""
    kw, kb = jax.random.split(key)
    bound = 1.0 / jnp.sqrt(jnp.float32(in_features))
    w = jax.random.uniform(kw, (in_features, out_features), jnp.float32,
                           -bound, bound)
    b = jax.random.uniform(kb, (out_features,), jnp.float32, -bound, bound)
    return w, b


def init_decoder_params(key, input_dim, low_feature_dim):
    dims = [low_feature_dim, 2000, 500, 500, input_dim]
    keys = jax.random.split(key, len(dims) - 1)
    return [init_linear_params(keys[i], dims[i], dims[i + 1])
            for i in range(len(dims) - 1)]


def prepare_decoder_params(params, low_feature_dim, weight_dtype=jnp.bfloat16):
    """One-time layout prep: pad feature dims to lane-dense (mult-of-128) sizes
    and cast weights to bf16.  Layer i's K is padded to layer (i-1)'s padded N;
    the extra rows/cols are zero so the padded network is numerically exact.
    Biases stay f32 (added to the f32 accumulator), stored as (1, N) rows."""
    prev_padded = low_feature_dim          # x is fed with its natural K
    padded = []
    for w, b in params:
        k, n = w.shape
        kp, np_ = prev_padded, _round_up(n, 128)
        wp = jnp.zeros((kp, np_), weight_dtype).at[:k, :n].set(
            w.astype(weight_dtype))
        bp = jnp.zeros((1, np_), jnp.float32).at[:, :n].set(
            b.astype(jnp.float32)[None, :])
        padded.append((wp, bp))
        prev_padded = np_
    return padded


# ------------------------------- reference ---------------------------------- #

def decoder_reference(padded_params, x, out_dim):
    """Same math as the kernel (bf16 inputs to each dot, f32 accumulation)."""
    h = x
    n_layers = len(padded_params)
    for li, (w, b) in enumerate(padded_params):
        h = jnp.dot(h.astype(w.dtype), w,
                    preferred_element_type=jnp.float32) + b[0]
        if li < n_layers - 1:
            h = jnp.maximum(h, 0.0)
    return h[:, :out_dim]


# ---------------------------------- main ------------------------------------ #

if __name__ == "__main__":
    key = jax.random.PRNGKey(0)
    k_params, k_x1, k_x2 = jax.random.split(key, 3)

    batch = 8
    input_dim = 64          # reconstructed feature dim
    low_feature_dim = 32    # latent dim fed into the decoder

    raw_params = init_decoder_params(k_params, input_dim, low_feature_dim)
    params = prepare_decoder_params(raw_params, low_feature_dim)

    # Small batch: single grid step.
    x = jax.random.normal(k_x1, (batch, low_feature_dim), jnp.float32)
    y = jax.block_until_ready(decoder_forward(params, x, out_dim=input_dim))
    y_ref = decoder_reference(params, x, input_dim)
    assert y.shape == (batch, input_dim)
    assert jnp.allclose(y, y_ref, atol=5e-3, rtol=5e-3), float(
        jnp.max(jnp.abs(y - y_ref)))

    # Larger batch: exercises multi-tile grid + row padding path.
    xb = jax.random.normal(k_x2, (300, low_feature_dim), jnp.float32)
    yb = jax.block_until_ready(decoder_forward(params, xb, out_dim=input_dim))
    yb_ref = decoder_reference(params, xb, input_dim)
    assert yb.shape == (300, input_dim)
    assert jnp.allclose(yb, yb_ref, atol=5e-3, rtol=5e-3), float(
        jnp.max(jnp.abs(yb - yb_ref)))

    print("KERNEL_OK")
</pallas_src>

<mosaic_0001>
module attributes {stable_mosaic.version = 11 : i64} {
  func.func @_decoder_fused_kernel(%arg0: i32, %arg1: memref<8x32xf32, #tpu.memory_space<vmem>>, %arg2: memref<32x2048xbf16, #tpu.memory_space<vmem>>, %arg3: memref<1x2048xf32, #tpu.memory_space<vmem>>, %arg4: memref<2048x512xbf16, #tpu.memory_space<vmem>>, %arg5: memref<1x512xf32, #tpu.memory_space<vmem>>, %arg6: memref<512x512xbf16, #tpu.memory_space<vmem>>, %arg7: memref<1x512xf32, #tpu.memory_space<vmem>>, %arg8: memref<512x128xbf16, #tpu.memory_space<vmem>>, %arg9: memref<1x128xf32, #tpu.memory_space<vmem>>, %arg10: memref<8x128xf32, #tpu.memory_space<vmem>>) attributes {dimension_semantics = [#tpu.dimension_semantics<parallel>], iteration_bounds = array<i64: 1>, scalar_prefetch = 0 : i64, scratch_operands = 0 : i64, tpu.core_type = #tpu.core_type<tc>, window_params = [{transform_indices = @transform_0, window_bounds = array<i64: 8, 32>}, {pipeline_mode = #tpu.pipeline_mode<synchronous>, transform_indices = @transform_1, window_bounds = array<i64: 32, 2048>}, {pipeline_mode = #tpu.pipeline_mode<synchronous>, transform_indices = @transform_2, window_bounds = array<i64: 1, 2048>}, {pipeline_mode = #tpu.pipeline_mode<synchronous>, transform_indices = @transform_3, window_bounds = array<i64: 2048, 512>}, {pipeline_mode = #tpu.pipeline_mode<synchronous>, transform_indices = @transform_4, window_bounds = array<i64: 1, 512>}, {pipeline_mode = #tpu.pipeline_mode<synchronous>, transform_indices = @transform_5, window_bounds = array<i64: 512, 512>}, {pipeline_mode = #tpu.pipeline_mode<synchronous>, transform_indices = @transform_6, window_bounds = array<i64: 1, 512>}, {pipeline_mode = #tpu.pipeline_mode<synchronous>, transform_indices = @transform_7, window_bounds = array<i64: 512, 128>}, {pipeline_mode = #tpu.pipeline_mode<synchronous>, transform_indices = @transform_8, window_bounds = array<i64: 1, 128>}, {transform_indices = @transform_9, window_bounds = array<i64: 8, 128>}]} {
    %c0 = arith.constant 0 : index
    %c0_0 = arith.constant 0 : index
    %0 = vector.load %arg1[%c0, %c0_0] : memref<8x32xf32, #tpu.memory_space<vmem>>, vector<8x32xf32>
    %1 = arith.truncf %0 : vector<8x32xf32> to vector<8x32xbf16>
    %c0_1 = arith.constant 0 : index
    %c0_2 = arith.constant 0 : index
    %2 = vector.load %arg2[%c0_1, %c0_2] : memref<32x2048xbf16, #tpu.memory_space<vmem>>, vector<32x2048xbf16>
    %cst = arith.constant dense<0.000000e+00> : vector<8x2048xf32>
    %3 = tpu.matmul %1, %2, %cst {dimension_numbers = #tpu.dot_dimension_numbers<[1], [0], [0], [1], [0, 0, 1, 1], [], []>} : vector<8x32xbf16>, vector<32x2048xbf16>, vector<8x2048xf32> -> vector<8x2048xf32>
    %c0_3 = arith.constant 0 : index
    %c0_4 = arith.constant 0 : index
    %4 = vector.load %arg3[%c0_3, %c0_4] : memref<1x2048xf32, #tpu.memory_space<vmem>>, vector<1x2048xf32>
    %5 = vector.broadcast %4 : vector<1x2048xf32> to vector<8x2048xf32>
    %6 = arith.addf %3, %5 : vector<8x2048xf32>
    %cst_5 = arith.constant 0.000000e+00 : f32
    %7 = vector.broadcast %cst_5 : f32 to vector<8x2048xf32>
    %8 = arith.maximumf %6, %7 : vector<8x2048xf32>
    %9 = arith.truncf %8 : vector<8x2048xf32> to vector<8x2048xbf16>
    %c0_6 = arith.constant 0 : index
    %c0_7 = arith.constant 0 : index
    %10 = vector.load %arg4[%c0_6, %c0_7] : memref<2048x512xbf16, #tpu.memory_space<vmem>>, vector<2048x512xbf16>
    %cst_8 = arith.constant dense<0.000000e+00> : vector<8x512xf32>
    %11 = tpu.matmul %9, %10, %cst_8 {dimension_numbers = #tpu.dot_dimension_numbers<[1], [0], [0], [1], [0, 0, 1, 1], [], []>} : vector<8x2048xbf16>, vector<2048x512xbf16>, vector<8x512xf32> -> vector<8x512xf32>
    %c0_9 = arith.constant 0 : index
    %c0_10 = arith.constant 0 : index
    %12 = vector.load %arg5[%c0_9, %c0_10] : memref<1x512xf32, #tpu.memory_space<vmem>>, vector<1x512xf32>
    %13 = vector.broadcast %12 : vector<1x512xf32> to vector<8x512xf32>
    %14 = arith.addf %11, %13 : vector<8x512xf32>
    %cst_11 = arith.constant 0.000000e+00 : f32
    %15 = vector.broadcast %cst_11 : f32 to vector<8x512xf32>
    %16 = arith.maximumf %14, %15 : vector<8x512xf32>
    %17 = arith.truncf %16 : vector<8x512xf32> to vector<8x512xbf16>
    %c0_12 = arith.constant 0 : index
    %c0_13 = arith.constant 0 : index
    %18 = vector.load %arg6[%c0_12, %c0_13] : memref<512x512xbf16, #tpu.memory_space<vmem>>, vector<512x512xbf16>
    %cst_14 = arith.constant dense<0.000000e+00> : vector<8x512xf32>
    %19 = tpu.matmul %17, %18, %cst_14 {dimension_numbers = #tpu.dot_dimension_numbers<[1], [0], [0], [1], [0, 0, 1, 1], [], []>} : vector<8x512xbf16>, vector<512x512xbf16>, vector<8x512xf32> -> vector<8x512xf32>
    %c0_15 = arith.constant 0 : index
    %c0_16 = arith.constant 0 : index
    %20 = vector.load %arg7[%c0_15, %c0_16] : memref<1x512xf32, #tpu.memory_space<vmem>>, vector<1x512xf32>
    %21 = vector.broadcast %20 : vector<1x512xf32> to vector<8x512xf32>
    %22 = arith.addf %19, %21 : vector<8x512xf32>
    %cst_17 = arith.constant 0.000000e+00 : f32
    %23 = vector.broadcast %cst_17 : f32 to vector<8x512xf32>
    %24 = arith.maximumf %22, %23 : vector<8x512xf32>
    %25 = arith.truncf %24 : vector<8x512xf32> to vector<8x512xbf16>
    %c0_18 = arith.constant 0 : index
    %c0_19 = arith.constant 0 : index
    %26 = vector.load %arg8[%c0_18, %c0_19] : memref<512x128xbf16, #tpu.memory_space<vmem>>, vector<512x128xbf16>
    %cst_20 = arith.constant dense<0.000000e+00> : vector<8x128xf32>
    %27 = tpu.matmul %25, %26, %cst_20 {dimension_numbers = #tpu.dot_dimension_numbers<[1], [0], [0], [1], [0, 0, 1, 1], [], []>} : vector<8x512xbf16>, vector<512x128xbf16>, vector<8x128xf32> -> vector<8x128xf32>
    %c0_21 = arith.constant 0 : index
    %c0_22 = arith.constant 0 : index
    %28 = vector.load %arg9[%c0_21, %c0_22] : memref<1x128xf32, #tpu.memory_space<vmem>>, vector<1x128xf32>
    %29 = vector.broadcast %28 : vector<1x128xf32> to vector<8x128xf32>
    %30 = arith.addf %27, %29 : vector<8x128xf32>
    %c0_23 = arith.constant 0 : index
    %c0_24 = arith.constant 0 : index
    %31 = vector.load %arg10[%c0_23, %c0_24] : memref<8x128xf32, #tpu.memory_space<vmem>>, vector<8x128xf32>
    tpu.vector_store %arg10[%c0_23, %c0_24], %30 {strides = array<i32>} : memref<8x128xf32, #tpu.memory_space<vmem>>, vector<8x128xf32>,
    return
  }
  func.func @transform_0(%arg0: i32) -> (i32, i32) {
    %c0_i32 = arith.constant 0 : i32
    %c0_i32_0 = arith.constant 0 : i32
    return %arg0, %c0_i32 : i32, i32
  }
  func.func @transform_1(%arg0: i32) -> (i32, i32) {
    %c0_i32 = arith.constant 0 : i32
    %c0_i32_0 = arith.constant 0 : i32
    %c0_i32_1 = arith.constant 0 : i32
    return %c0_i32, %c0_i32_0 : i32, i32
  }
  func.func @transform_2(%arg0: i32) -> (i32, i32) {
    %c0_i32 = arith.constant 0 : i32
    %c0_i32_0 = arith.constant 0 : i32
    %c0_i32_1 = arith.constant 0 : i32
    return %c0_i32, %c0_i32_0 : i32, i32
  }
  func.func @transform_3(%arg0: i32) -> (i32, i32) {
    %c0_i32 = arith.constant 0 : i32
    %c0_i32_0 = arith.constant 0 : i32
    %c0_i32_1 = arith.constant 0 : i32
    return %c0_i32, %c0_i32_0 : i32, i32
  }
  func.func @transform_4(%arg0: i32) -> (i32, i32) {
    %c0_i32 = arith.constant 0 : i32
    %c0_i32_0 = arith.constant 0 : i32
    %c0_i32_1 = arith.constant 0 : i32
    return %c0_i32, %c0_i32_0 : i32, i32
  }
  func.func @transform_5(%arg0: i32) -> (i32, i32) {
    %c0_i32 = arith.constant 0 : i32
    %c0_i32_0 = arith.constant 0 : i32
    %c0_i32_1 = arith.constant 0 : i32
    return %c0_i32, %c0_i32_0 : i32, i32
  }
  func.func @transform_6(%arg0: i32) -> (i32, i32) {
    %c0_i32 = arith.constant 0 : i32
    %c0_i32_0 = arith.constant 0 : i32
    %c0_i32_1 = arith.constant 0 : i32
    return %c0_i32, %c0_i32_0 : i32, i32
  }
  func.func @transform_7(%arg0: i32) -> (i32, i32) {
    %c0_i32 = arith.constant 0 : i32
    %c0_i32_0 = arith.constant 0 : i32
    %c0_i32_1 = arith.constant 0 : i32
    return %c0_i32, %c0_i32_0 : i32, i32
  }
  func.func @transform_8(%arg0: i32) -> (i32, i32) {
    %c0_i32 = arith.constant 0 : i32
    %c0_i32_0 = arith.constant 0 : i32
    %c0_i32_1 = arith.constant 0 : i32
    return %c0_i32, %c0_i32_0 : i32, i32
  }
  func.func @transform_9(%arg0: i32) -> (i32, i32) {
    %c0_i32 = arith.constant 0 : i32
    %c0_i32_0 = arith.constant 0 : i32
    return %arg0, %c0_i32 : i32, i32
  }
}

</mosaic_0001>

<bundles_post_ra>
// kernel: decoder_forward.1
= control target key start
LH: loop header
LB: loop body
LE: loop exit
PB: predicated region body
PF: predicated region fallthrough
CT: control target
= control target key end

     0   :  { %14 = vsyncpa [#allocation3], 0  ;;  %s10048_s0 = inlined_call_operand.hbm [shape: f32[8,32], index: 0, kind: input, shape index: {}]   ;;  %s10049_s1 = inlined_call_operand.hbm [shape: bf16[32,2048], index: 1, kind: input, shape index: {}]   ;;  %s10050_s2 = inlined_call_operand.hbm [shape: f32[1,2048], index: 2, kind: input, shape index: {}]   ;;  %s10051_s3 = inlined_call_operand.hbm [shape: bf16[2048,512], index: 3, kind: input, shape index: {}]   ;;  %s10052_s4 = inlined_call_operand.hbm [shape: f32[1,512], index: 4, kind: input, shape index: {}]   ;;  %s10053_s5 = inlined_call_operand.hbm [shape: bf16[512,512], index: 5, kind: input, shape index: {}]   ;;  %s10054_s6 = inlined_call_operand.hbm [shape: f32[1,512], index: 6, kind: input, shape index: {}]   ;;  %s10055_s7 = inlined_call_operand.hbm [shape: bf16[512,128], index: 7, kind: input, shape index: {}]   ;;  %s10056_s8 = inlined_call_operand.hbm [shape: f32[1,128], index: 8, kind: input, shape index: {}]   ;;  %s10057_s9 = inlined_call_operand.hbm [shape: f32[8,128], index: 9, kind: output, shape index: {}]  }
   0x1   :  { %15 = vsyncpa [#allocation6], 0 }
   0x2   :  { %16 = vsyncpa [#allocation9], 0 }
   0x3   :  { %17 = vsyncpa [#allocation12], 0 }
   0x4   :  { %18 = vsyncpa [#allocation15], 0  ;;  %s35_s11 = sshll.u32 %s10049_s1, 4  ;;  %s36_s11 = int_to_ptr.hbm [resolvable:$true] %s35_s11 }
   0x5   :  { %19 = vsyncpa [#allocation4], 0  ;;  %s9694_s12 = smov [#allocation5]   ;;  %s59_s16 = sshll.u32 %s10051_s3, 4  ;;  %s60_s16 = int_to_ptr.hbm [resolvable:$true] %s59_s16 }
   0x6   :  { %s37_s13 = sshll.u32 %s9694_s12, 4  ;;  %s9695_s17 = smov 1024   ;;  %s38_s13 = int_to_ptr.vmem [resolvable:$true] %s37_s13 }
   0x7   :  { %s9696_s18 = smov 64   ;;  %s9697_s19 = smov [#allocation8]  }
   0x8   :  { %43 = dma.hbm_to_vmem [thread:$0]  %s36_s11, 4096, %s38_s13, [#allocation6], %s9695_s17, %s9695_s17, %s9696_s18  }
   0x9   :  { %s61_s20 = sshll.u32 %s9697_s19, 4  ;;  %s9698_s21 = smov 256   ;;  %s62_s20 = int_to_ptr.vmem [resolvable:$true] %s61_s20 }
   0xa   :  { %s9699_s22 = smov 16   ;;  %s83_s24 = sshll.u32 %s10053_s5, 4  ;;  %s84_s24 = int_to_ptr.hbm [resolvable:$true] %s83_s24 }
   0xb   :  { %67 = dma.hbm_to_vmem [thread:$0]  %s60_s16, 65536, %s62_s20, [#allocation9], %s9698_s21, %s9698_s21, %s9699_s22  }
   0xc   :  { %s9700_s25 = smov [#allocation11]   ;;  %s107_s28 = sshll.u32 %s10055_s7, 4  ;;  %s108_s28 = int_to_ptr.hbm [resolvable:$true] %s107_s28 }
   0xd   :  { %s85_s26 = sshll.u32 %s9700_s25, 4  ;;  %s9701_s29 = smov [#allocation14]   ;;  %s86_s26 = int_to_ptr.vmem [resolvable:$true] %s85_s26 }
   0xe   :  { %91 = dma.hbm_to_vmem [thread:$0]  %s84_s24, 16384, %s86_s26, [#allocation12], %s9698_s21, %s9698_s21, %s9699_s22  }
   0xf   :  { %s109_s30 = sshll.u32 %s9701_s29, 4  ;;  %s25_s12 = sshll.u32 %s10048_s0, 4  ;;  %s110_s30 = int_to_ptr.vmem [resolvable:$true] %s109_s30  ;;  %s26_s12 = int_to_ptr.hbm [resolvable:$true] %s25_s12 }
  0x10   :  { %s9702_s13 = smov 4   ;;  %s9703_s5 = smov [#allocation2]  }
  0x11   :  { %115 = dma.hbm_to_vmem [thread:$0]  %s108_s28, 4096, %s110_s30, [#allocation15], %s9696_s18, %s9696_s18, %s9702_s13  }
  0x12   :  { %s27_s14 = sshll.u32 %s9703_s5, 4  ;;  %s49_s17 = sshll.u32 %s10050_s2, 4  ;;  %s28_s14 = int_to_ptr.vmem [resolvable:$true] %s27_s14  ;;  %s50_s17 = int_to_ptr.hbm [resolvable:$true] %s49_s17 }
  0x13   :  { %30 = dma.hbm_to_vmem [thread:$0]  %s26_s12, 128, %s28_s14, [#allocation3]  }
  0x14   :  { %s73_s20 = sshll.u32 %s10052_s4, 4  ;;  %s9704_s21 = smov [#allocation7]   ;;  %s74_s20 = int_to_ptr.hbm [resolvable:$true] %s73_s20 }
  0x15   :  { %s51_s22 = sshll.u32 %s9704_s21, 4  ;;  %s9705_s0 = smov [#allocation10]   ;;  %s52_s22 = int_to_ptr.vmem [resolvable:$true] %s51_s22 }
  0x16   :  { %54 = dma.hbm_to_vmem [thread:$0]  %s50_s17, 256, %s52_s22, [#allocation6]  }
  0x17   :  { %s75_s18 = sshll.u32 %s9705_s0, 4  ;;  %s97_s24 = sshll.u32 %s10054_s6, 4  ;;  %s76_s18 = int_to_ptr.vmem [resolvable:$true] %s75_s18  ;;  %s98_s24 = int_to_ptr.hbm [resolvable:$true] %s97_s24 }
  0x18   :  { %78 = dma.hbm_to_vmem [thread:$0]  %s74_s20, 64, %s76_s18, [#allocation9]  }
  0x19   :  { %s121_s26 = sshll.u32 %s10056_s8, 4  ;;  %s9706_s27 = smov [#allocation13]   ;;  %s122_s26 = int_to_ptr.hbm [resolvable:$true] %s121_s26 }
  0x1a   :  { %s99_s4 = sshll.u32 %s9706_s27, 4  ;;  %s9707_s3 = smov [#allocation16]   ;;  %s100_s4 = int_to_ptr.vmem [resolvable:$true] %s99_s4 }
  0x1b   :  { %102 = dma.hbm_to_vmem [thread:$0]  %s98_s24, 64, %s100_s4, [#allocation12]  }
  0x1c   :  { %s123_s28 = sshll.u32 %s9707_s3, 4  ;;  %s124_s28 = int_to_ptr.vmem [resolvable:$true] %s123_s28 }
  0x1d   :  { %126 = dma.hbm_to_vmem [thread:$0]  %s122_s26, 16, %s124_s28, [#allocation15]  }
  0x1e   :  { %9682 = dma.done.wait [#allocation3], 128  }
  0x1f   :  { %9683 = vsyncadd [#allocation3], 4294967168 }
  0x20   :  { %9684 = dma.done.wait [#allocation6], 4352  }
  0x21   :  { %9685 = vsyncadd [#allocation6], 4294962944 }
  0x22   :  { %9686 = dma.done.wait [#allocation9], 65600  }
  0x23   :  { %9687 = vsyncadd [#allocation9], 4294901696 }
  0x24   :  { %9688 = dma.done.wait [#allocation12], 16448  }
  0x25   :  { %9689 = vsyncadd [#allocation12], 4294950848 }
  0x26   :  { %9690 = dma.done.wait [#allocation15], 4112  }
  0x27   :  { %9691 = vsyncadd [#allocation15], 4294963184  ;;  %v5954_v0 = vld [vmem:[#allocation5 + $0x80] sm:$0xf]  ;;  %v8736_v2 = vld [vmem:[#allocation5 + $0x84] sm:$0xf] }
  0x28   :  { %v8744_v1 = vld [vmem:[#allocation5 + $0xbc] sm:$0xf0]  ;;  %v5956_v4 = vld [vmem:[#allocation5 + $0xc0] sm:$0xf0]  ;;  %v5962_v5 = vld [vmem:[#allocation5 + $0x88] sm:$0xf] }
  0x29   :  { %v5955_v3 = vor.u32 %v8744_v1, %v5954_v0  ;;  %v8745_v6 = vld [vmem:[#allocation5 + $0xc4] sm:$0xf0]  ;;  %v5959_v7 = vor.u32 %v8736_v2, %v5956_v4  ;;  %v8737_v9 = vld [vmem:[#allocation5 + $0x8c] sm:$0xf]  ;;  %v5890_v11 = vld [vmem:[#allocation5] sm:$0xf] }
  0x2a   :  { %v5963_v8 = vor.u32 %v8745_v6, %v5962_v5  ;;  %v5964_v10 = vld [vmem:[#allocation5 + $0xc8] sm:$0xf0]  ;;  %v8728_v13 = vld [vmem:[#allocation5 + $0x3c] sm:$0xf0]  ;;  %v8720_v14 = vld [vmem:[#allocation5 + $0x4] sm:$0xf] }
  0x2b   :  { %404 = vmatpush.bf16.msra.mxu0 %v5955_v3  ;;  %v5967_v12 = vor.u32 %v8737_v9, %v5964_v10  ;;  %v5892_v15 = vld [vmem:[#allocation5 + $0x40] sm:$0xf0]  ;;  %417 = vmatpush.bf16.msra.mxu1 %v5959_v7  ;;  %v5891_v16 = vor.u32 %v8728_v13, %v5890_v11  ;;  %v5898_v18 = vld [vmem:[#allocation5 + $0x8] sm:$0xf]  ;;  %v8721_v20 = vld [vmem:[#allocation5 + $0xc] sm:$0xf] }
  0x2c   :  { %430 = vmatpush.bf16.msra.mxu2 %v5963_v8  ;;  %v5895_v17 = vor.u32 %v8720_v14, %v5892_v15  ;;  %v8729_v19 = vld [vmem:[#allocation5 + $0x44] sm:$0xf0]  ;;  %v5900_v22 = vld [vmem:[#allocation5 + $0x48] sm:$0xf0]  ;;  %v164_v23 = vld [vmem:[#allocation2] sm:$0xff]  ;;  %vm394_vm0 = vcmask 261120  }
  0x2d   :  { %443 = vmatpush.bf16.msra.mxu3 %v5967_v12  ;;  %v5899_v21 = vor.u32 %v8729_v19, %v5898_v18  ;;  %v5970_v24 = vld [vmem:[#allocation5 + $0x90] sm:$0xf]  ;;  %v5903_v25 = vor.u32 %v8721_v20, %v5900_v22  ;;  %v9786_v26 = vpack.c.bf16 %v164_v23, %v164_v23  ;;  %v5978_v28 = vld [vmem:[#allocation5 + $0x98] sm:$0xf]  ;;  %v8738_v32 = vld [vmem:[#allocation5 + $0x94] sm:$0xf] }
  0x2e   :  { %v8746_v27 = vld [vmem:[#allocation5 + $0xcc] sm:$0xf0]  ;;  %v8747_v29 = vld [vmem:[#allocation5 + $0xd4] sm:$0xf0]  ;;  %v5972_v33 = vld [vmem:[#allocation5 + $0xd0] sm:$0xf0] }
  0x2f   :  { %405 = vmatpush.bf16.msra.mxu0 %v5891_v16  ;;  %v5971_v30 = vor.u32 %v8746_v27, %v5970_v24  ;;  %v5979_v31 = vor.u32 %v8747_v29, %v5978_v28  ;;  %v8739_v34 = vld [vmem:[#allocation5 + $0x9c] sm:$0xf]  ;;  %418 = vmatpush.bf16.msra.mxu1 %v5895_v17  ;;  %v5975_v35 = vor.u32 %v8738_v32, %v5972_v33  ;;  %v5906_v37 = vld [vmem:[#allocation5 + $0x10] sm:$0xf]  ;;  %v5914_v41 = vld [vmem:[#allocation5 + $0x18] sm:$0xf] }
  0x30   :  { %431 = vmatpush.bf16.msra.mxu2 %v5899_v21  ;;  %v5980_v36 = vld [vmem:[#allocation5 + $0xd8] sm:$0xf0]  ;;  %v8730_v38 = vld [vmem:[#allocation5 + $0x4c] sm:$0xf0]  ;;  %v8731_v42 = vld [vmem:[#allocation5 + $0x54] sm:$0xf0] }
  0x31   :  { %444 = vmatpush.bf16.msra.mxu3 %v5903_v25  ;;  %v5983_v39 = vor.u32 %v8739_v34, %v5980_v36  ;;  %v5907_v40 = vor.u32 %v8730_v38, %v5906_v37  ;;  %v8722_v43 = vld [vmem:[#allocation5 + $0x14] sm:$0xf]  ;;  %v5915_v44 = vor.u32 %v8731_v42, %v5914_v41  ;;  %v8723_v46 = vld [vmem:[#allocation5 + $0x1c] sm:$0xf]  ;;  %v5986_v48 = vld [vmem:[#allocation5 + $0xa0] sm:$0xf] }
  0x32   :  { %6016 = vmatmul.msk.bf16.vlgmr.msra.gmra.mxu0 %vm394_vm0, %v9786_v26  ;;  %v5908_v45 = vld [vmem:[#allocation5 + $0x50] sm:$0xf0]  ;;  %v5916_v47 = vld [vmem:[#allocation5 + $0x58] sm:$0xf0]  ;;  %6017 = vmatmul.msk.bf16.vlgmr.msra.gmra.mxu1 %vm394_vm0, %v9786_v26  ;;  %v8748_v49 = vld [vmem:[#allocation5 + $0xdc] sm:$0xf0] }
  0x33   :  { %456 = vmatpush.bf16.msrb.mxu0 %v5971_v30  ;;  %6018 = vmatmul.msk.bf16.vlgmr.msra.gmra.mxu2 %vm394_vm0, %v9786_v26  ;;  %v5994_v50 = vld [vmem:[#allocation5 + $0xa8] sm:$0xf]  ;;  %v5911_v51 = vor.u32 %v8722_v43, %v5908_v45  ;;  %v5987_v52 = vor.u32 %v8748_v49, %v5986_v48  ;;  %v8740_v54 = vld [vmem:[#allocation5 + $0xa4] sm:$0xf]  ;;  %v5919_v56 = vor.u32 %v8723_v46, %v5916_v47  ;;  %v8741_v59 = vld [vmem:[#allocation5 + $0xac] sm:$0xf] }
  0x34   :  { %482 = vmatpush.bf16.msrb.mxu2 %v5979_v31  ;;  %6019 = vmatmul.msk.bf16.vlgmr.msra.gmra.mxu3 %vm394_vm0, %v9786_v26  ;;  %v8749_v53 = vld [vmem:[#allocation5 + $0xe4] sm:$0xf0]  ;;  %v5988_v55 = vld [vmem:[#allocation5 + $0xe0] sm:$0xf0]  ;;  %v5996_v60 = vld [vmem:[#allocation5 + $0xe8] sm:$0xf0] }
  0x35   :  { %469 = vmatpush.bf16.msrb.mxu1 %v5975_v35  ;;  %495 = vmatpush.bf16.msrb.mxu3 %v5983_v39  ;;  %v5995_v57 = vor.u32 %v8749_v53, %v5994_v50  ;;  %v5991_v58 = vor.u32 %v8740_v54, %v5988_v55  ;;  %v5922_v61 = vld [vmem:[#allocation5 + $0x20] sm:$0xf]  ;;  %v5999_v62 = vor.u32 %v8741_v59, %v5996_v60  ;;  %v5930_v0 = vld [vmem:[#allocation5 + $0x28] sm:$0xf]  ;;  %v8724_v4 = vld [vmem:[#allocation5 + $0x24] sm:$0xf] }
  0x36   :  { %v8732_v63 = vld [vmem:[#allocation5 + $0x5c] sm:$0xf0]  ;;  %v8733_v1 = vld [vmem:[#allocation5 + $0x64] sm:$0xf0]  ;;  %v5924_v5 = vld [vmem:[#allocation5 + $0x60] sm:$0xf0] }
  0x37   :  { %457 = vmatpush.bf16.msrb.mxu0 %v5907_v40  ;;  %v5923_v2 = vor.u32 %v8732_v63, %v5922_v61  ;;  %v5931_v3 = vor.u32 %v8733_v1, %v5930_v0  ;;  %v8725_v6 = vld [vmem:[#allocation5 + $0x2c] sm:$0xf]  ;;  %v5927_v8 = vor.u32 %v8724_v4, %v5924_v5  ;;  %v6002_v10 = vld [vmem:[#allocation5 + $0xb0] sm:$0xf]  ;;  %v6010_v12 = vld [vmem:[#allocation5 + $0xb8] sm:$0xf] }
  0x38   :  { %483 = vmatpush.bf16.msrb.mxu2 %v5915_v44  ;;  %v5932_v7 = vld [vmem:[#allocation5 + $0x68] sm:$0xf0]  ;;  %v8750_v11 = vld [vmem:[#allocation5 + $0xec] sm:$0xf0]  ;;  %v8751_v13 = vld [vmem:[#allocation5 + $0xf4] sm:$0xf0] }
  0x39   :  { %470 = vmatpush.bf16.msrb.mxu1 %v5911_v51  ;;  %496 = vmatpush.bf16.msrb.mxu3 %v5919_v56  ;;  %v5935_v9 = vor.u32 %v8725_v6, %v5932_v7  ;;  %v8742_v14 = vld [vmem:[#allocation5 + $0xb4] sm:$0xf]  ;;  %v8743_v16 = vld [vmem:[#allocation5 + $0xbc] sm:$0xf]  ;;  %v6003_v18 = vor.u32 %v8750_v11, %v6002_v10  ;;  %v6011_v19 = vor.u32 %v8751_v13, %v6010_v12  ;;  %v5938_v21 = vld [vmem:[#allocation5 + $0x30] sm:$0xf] }
  0x3a   :  { %v6004_v15 = vld [vmem:[#allocation5 + $0xf0] sm:$0xf0]  ;;  %v6012_v17 = vld [vmem:[#allocation5 + $0xf8] sm:$0xf0]  ;;  %v8734_v22 = vld [vmem:[#allocation5 + $0x6c] sm:$0xf0] }
  0x3b   :  { %508 = vmatpush.bf16.msra.mxu0 %v5987_v52  ;;  %v6007_v20 = vor.u32 %v8742_v14, %v6004_v15  ;;  %v5946_v23 = vld [vmem:[#allocation5 + $0x38] sm:$0xf]  ;;  %v6015_v24 = vor.u32 %v8743_v16, %v6012_v17  ;;  %v8726_v27 = vld [vmem:[#allocation5 + $0x34] sm:$0xf]  ;;  %v8727_v29 = vld [vmem:[#allocation5 + $0x3c] sm:$0xf]  ;;  %v5939_v31 = vor.u32 %v8734_v22, %v5938_v21 }
  0x3c   :  { %534 = vmatpush.bf16.msra.mxu2 %v5995_v57  ;;  %v8735_v25 = vld [vmem:[#allocation5 + $0x74] sm:$0xf0]  ;;  %v5940_v28 = vld [vmem:[#allocation5 + $0x70] sm:$0xf0]  ;;  %v5948_v30 = vld [vmem:[#allocation5 + $0x78] sm:$0xf0] }
  0x3d   :  { %521 = vmatpush.bf16.msra.mxu1 %v5991_v58  ;;  %547 = vmatpush.bf16.msra.mxu3 %v5999_v62  ;;  %v5947_v32 = vor.u32 %v8735_v25, %v5946_v23  ;;  %v5943_v33 = vor.u32 %v8726_v27, %v5940_v28  ;;  %v5951_v34 = vor.u32 %v8727_v29, %v5948_v30  ;;  %v6146_v35 = vld [vmem:[#allocation8 + $0xe0] sm:$0xf]  ;;  %v8782_v36 = vld [vmem:[#allocation8 + $0xec] sm:$0xf0]  ;;  %s9708_s6 = smov [#allocation17]   ;;  %s5874_s10 = sshll.u32 %s10057_s9, 4  ;;  %s5875_s10 = int_to_ptr.hbm [resolvable:$true] %s5874_s10 }
  0x3e   :  { %v6274_v37 = vld [vmem:[#allocation8 + $0x1e0] sm:$0xf]  ;;  %v8814_v38 = vld [vmem:[#allocation8 + $0x1ec] sm:$0xf0]  ;;  %v6147_v43 = vor.u32 %v8782_v36, %v6146_v35  ;;  %s5872_s8 = sshll.u32 %s9708_s6, 4  ;;  %s5873_s8 = int_to_ptr.vmem [resolvable:$true] %s5872_s8 }
  0x3f   :  { %509 = vmatpush.bf16.msra.mxu0 %v5923_v2  ;;  %v6402_v39 = vld [vmem:[#allocation8 + $0x2e0] sm:$0xf]  ;;  %v8846_v40 = vld [vmem:[#allocation8 + $0x2ec] sm:$0xf0]  ;;  %v6275_v44 = vor.u32 %v8814_v38, %v6274_v37 }
  0x40   :  { %535 = vmatpush.bf16.msra.mxu2 %v5931_v3  ;;  %v6530_v41 = vld [vmem:[#allocation8 + $0x3e0] sm:$0xf]  ;;  %v8878_v42 = vld [vmem:[#allocation8 + $0x3ec] sm:$0xf0]  ;;  %v6403_v48 = vor.u32 %v8846_v40, %v6402_v39 }
  0x41   :  { %522 = vmatpush.bf16.msra.mxu1 %v5927_v8  ;;  %548 = vmatpush.bf16.msra.mxu3 %v5935_v9  ;;  %v6130_v45 = vld [vmem:[#allocation8 + $0xc0] sm:$0xf]  ;;  %v8778_v46 = vld [vmem:[#allocation8 + $0xcc] sm:$0xf0]  ;;  %v6531_v50 = vor.u32 %v8878_v42, %v6530_v41 }
  0x42   :  { %6020 = vmatmul.msk.bf16.vlgmr.msrb.gmra.mxu0 %vm394_vm0, %v9786_v26  ;;  %6021 = vmatmul.msk.bf16.vlgmr.msrb.gmra.mxu1 %vm394_vm0, %v9786_v26  ;;  %v6258_v47 = vld [vmem:[#allocation8 + $0x1c0] sm:$0xf]  ;;  %v8810_v49 = vld [vmem:[#allocation8 + $0x1cc] sm:$0xf0]  ;;  %v6131_v55 = vor.u32 %v8778_v46, %v6130_v45 }
  0x43   :  { %6022 = vmatmul.msk.bf16.vlgmr.msrb.gmra.mxu2 %vm394_vm0, %v9786_v26  ;;  %560 = vmatpush.bf16.msrb.mxu0 %v6003_v18  ;;  %v6386_v51 = vld [vmem:[#allocation8 + $0x2c0] sm:$0xf]  ;;  %v8842_v52 = vld [vmem:[#allocation8 + $0x2cc] sm:$0xf0]  ;;  %v6259_v56 = vor.u32 %v8810_v49, %v6258_v47 }
  0x44   :  { %6023 = vmatmul.msk.bf16.vlgmr.msrb.gmra.mxu3 %vm394_vm0, %v9786_v26  ;;  %586 = vmatpush.bf16.msrb.mxu2 %v6011_v19  ;;  %v6514_v53 = vld [vmem:[#allocation8 + $0x3c0] sm:$0xf]  ;;  %v8874_v54 = vld [vmem:[#allocation8 + $0x3cc] sm:$0xf0]  ;;  %v6387_v60 = vor.u32 %v8842_v52, %v6386_v51 }
  0x45   :  { %573 = vmatpush.bf16.msrb.mxu1 %v6007_v20  ;;  %599 = vmatpush.bf16.msrb.mxu3 %v6015_v24  ;;  %v6114_v57 = vld [vmem:[#allocation8 + $0xa0] sm:$0xf]  ;;  %v8774_v58 = vld [vmem:[#allocation8 + $0xac] sm:$0xf0]  ;;  %v6515_v62 = vor.u32 %v8874_v54, %v6514_v53 }
  0x46   :  { %v6242_v59 = vld [vmem:[#allocation8 + $0x1a0] sm:$0xf]  ;;  %v8806_v61 = vld [vmem:[#allocation8 + $0x1ac] sm:$0xf0]  ;;  %v6115_v3 = vor.u32 %v8774_v58, %v6114_v57 }
  0x47   :  { %561 = vmatpush.bf16.msrb.mxu0 %v5939_v31  ;;  %v6370_v63 = vld [vmem:[#allocation8 + $0x2a0] sm:$0xf]  ;;  %v8838_v0 = vld [vmem:[#allocation8 + $0x2ac] sm:$0xf0]  ;;  %v6243_v4 = vor.u32 %v8806_v61, %v6242_v59 }
  0x48   :  { %587 = vmatpush.bf16.msrb.mxu2 %v5947_v32  ;;  %v6498_v1 = vld [vmem:[#allocation8 + $0x3a0] sm:$0xf]  ;;  %v8870_v2 = vld [vmem:[#allocation8 + $0x3ac] sm:$0xf0]  ;;  %v6371_v8 = vor.u32 %v8838_v0, %v6370_v63 }
  0x49   :  { %574 = vmatpush.bf16.msrb.mxu1 %v5943_v33  ;;  %600 = vmatpush.bf16.msrb.mxu3 %v5951_v34  ;;  %v6098_v5 = vld [vmem:[#allocation8 + $0x80] sm:$0xf]  ;;  %v8770_v6 = vld [vmem:[#allocation8 + $0x8c] sm:$0xf0]  ;;  %v6499_v10 = vor.u32 %v8870_v2, %v6498_v1 }
  0x4a   :  { %v6226_v7 = vld [vmem:[#allocation8 + $0x180] sm:$0xf]  ;;  %v8802_v9 = vld [vmem:[#allocation8 + $0x18c] sm:$0xf0]  ;;  %v6099_v15 = vor.u32 %v8770_v6, %v6098_v5 }
  0x4b   :  { %v6354_v11 = vld [vmem:[#allocation8 + $0x280] sm:$0xf]  ;;  %v8834_v12 = vld [vmem:[#allocation8 + $0x28c] sm:$0xf0]  ;;  %v6227_v16 = vor.u32 %v8802_v9, %v6226_v7 }
  0x4c   :  { %v6482_v13 = vld [vmem:[#allocation8 + $0x380] sm:$0xf]  ;;  %v8866_v14 = vld [vmem:[#allocation8 + $0x38c] sm:$0xf0]  ;;  %v6355_v20 = vor.u32 %v8834_v12, %v6354_v11 }
  0x4d   :  { %v6082_v17 = vld [vmem:[#allocation8 + $0x60] sm:$0xf]  ;;  %v8766_v18 = vld [vmem:[#allocation8 + $0x6c] sm:$0xf0]  ;;  %v6483_v22 = vor.u32 %v8866_v14, %v6482_v13 }
  0x4e   :  { %v6210_v19 = vld [vmem:[#allocation8 + $0x160] sm:$0xf]  ;;  %v8798_v21 = vld [vmem:[#allocation8 + $0x16c] sm:$0xf0]  ;;  %v6083_v28 = vor.u32 %v8766_v18, %v6082_v17 }
  0x4f   :  { %v6338_v23 = vld [vmem:[#allocation8 + $0x260] sm:$0xf]  ;;  %v8830_v24 = vld [vmem:[#allocation8 + $0x26c] sm:$0xf0]  ;;  %v6211_v29 = vor.u32 %v8798_v21, %v6210_v19 }
  0x50   :  { %v6466_v25 = vld [vmem:[#allocation8 + $0x360] sm:$0xf]  ;;  %v8862_v27 = vld [vmem:[#allocation8 + $0x36c] sm:$0xf0]  ;;  %v6339_v33 = vor.u32 %v8830_v24, %v6338_v23 }
  0x51   :  { %v6066_v30 = vld [vmem:[#allocation8 + $0x40] sm:$0xf]  ;;  %v8762_v31 = vld [vmem:[#allocation8 + $0x4c] sm:$0xf0]  ;;  %v6467_v35 = vor.u32 %v8862_v27, %v6466_v25 }
  0x52   :  { %6024 = vmatmul.msk.bf16.vlgmr.msra.gmra.mxu0 %vm394_vm0, %v9786_v26  ;;  %6025 = vmatmul.msk.bf16.vlgmr.msra.gmra.mxu1 %vm394_vm0, %v9786_v26  ;;  %v6194_v32 = vld [vmem:[#allocation8 + $0x140] sm:$0xf]  ;;  %v8794_v34 = vld [vmem:[#allocation8 + $0x14c] sm:$0xf0]  ;;  %v6067_v40 = vor.u32 %v8762_v31, %v6066_v30 }
  0x53   :  { %6026 = vmatmul.msk.bf16.vlgmr.msra.gmra.mxu2 %vm394_vm0, %v9786_v26  ;;  %3720 = vmatpush.bf16.msra.mxu0 %v6147_v43  ;;  %v6322_v36 = vld [vmem:[#allocation8 + $0x240] sm:$0xf]  ;;  %v8826_v37 = vld [vmem:[#allocation8 + $0x24c] sm:$0xf0]  ;;  %v6195_v41 = vor.u32 %v8794_v34, %v6194_v32 }
  0x54   :  { %6027 = vmatmul.msk.bf16.vlgmr.msra.gmra.mxu3 %vm394_vm0, %v9786_v26  ;;  %3733 = vmatpush.bf16.msra.mxu1 %v6275_v44  ;;  %v6450_v38 = vld [vmem:[#allocation8 + $0x340] sm:$0xf]  ;;  %v8858_v39 = vld [vmem:[#allocation8 + $0x34c] sm:$0xf0]  ;;  %v6323_v45 = vor.u32 %v8826_v37, %v6322_v36 }
  0x55   :  { %3746 = vmatpush.bf16.msra.mxu2 %v6403_v48  ;;  %3759 = vmatpush.bf16.msra.mxu3 %v6531_v50  ;;  %v6050_v42 = vld [vmem:[#allocation8 + $0x20] sm:$0xf]  ;;  %v8758_v43 = vld [vmem:[#allocation8 + $0x2c] sm:$0xf0]  ;;  %v6451_v47 = vor.u32 %v8858_v39, %v6450_v38 }
  0x56   :  { %v6178_v44 = vld [vmem:[#allocation8 + $0x120] sm:$0xf]  ;;  %v8790_v46 = vld [vmem:[#allocation8 + $0x12c] sm:$0xf0]  ;;  %v6051_v52 = vor.u32 %v8758_v43, %v6050_v42 }
  0x57   :  { %3721 = vmatpush.bf16.msra.mxu0 %v6131_v55  ;;  %v6306_v48 = vld [vmem:[#allocation8 + $0x220] sm:$0xf]  ;;  %v8822_v49 = vld [vmem:[#allocation8 + $0x22c] sm:$0xf0]  ;;  %v6179_v54 = vor.u32 %v8790_v46, %v6178_v44 }
  0x58   :  { %3734 = vmatpush.bf16.msra.mxu1 %v6259_v56  ;;  %v6434_v50 = vld [vmem:[#allocation8 + $0x320] sm:$0xf]  ;;  %v8854_v51 = vld [vmem:[#allocation8 + $0x32c] sm:$0xf0]  ;;  %v6307_v58 = vor.u32 %v8822_v49, %v6306_v48 }
  0x59   :  { %3747 = vmatpush.bf16.msra.mxu2 %v6387_v60  ;;  %3760 = vmatpush.bf16.msra.mxu3 %v6515_v62  ;;  %v6034_v53 = vld [vmem:[#allocation8] sm:$0xf]  ;;  %v8786_v56 = vld [vmem:[#allocation8 + $0x10c] sm:$0xf0]  ;;  %v6435_v62 = vor.u32 %v8854_v51, %v6434_v50 }
  0x5a   :  { %v6162_v55 = vld [vmem:[#allocation8 + $0x100] sm:$0xf]  ;;  %v8910_v59 = vld [vmem:[#allocation8 + $0x4ec] sm:$0xf0] }
  0x5b   :  { %3722 = vmatpush.bf16.msra.mxu0 %v6115_v3  ;;  %v6658_v57 = vld [vmem:[#allocation8 + $0x4e0] sm:$0xf]  ;;  %v8942_v61 = vld [vmem:[#allocation8 + $0x5ec] sm:$0xf0]  ;;  %v6163_v6 = vor.u32 %v8786_v56, %v6162_v55 }
  0x5c   :  { %3735 = vmatpush.bf16.msra.mxu1 %v6243_v4  ;;  %v6786_v60 = vld [vmem:[#allocation8 + $0x5e0] sm:$0xf]  ;;  %v8818_v0 = vld [vmem:[#allocation8 + $0x20c] sm:$0xf0]  ;;  %v6659_v7 = vor.u32 %v8910_v59, %v6658_v57 }
  0x5d   :  { %3748 = vmatpush.bf16.msra.mxu2 %v6371_v8  ;;  %3761 = vmatpush.bf16.msra.mxu3 %v6499_v10  ;;  %v6290_v63 = vld [vmem:[#allocation8 + $0x200] sm:$0xf]  ;;  %v8850_v3 = vld [vmem:[#allocation8 + $0x30c] sm:$0xf0]  ;;  %v6787_v10 = vor.u32 %v8942_v61, %v6786_v60 }
  0x5e   :  { %v6418_v1 = vld [vmem:[#allocation8 + $0x300] sm:$0xf]  ;;  %v8974_v5 = vld [vmem:[#allocation8 + $0x6ec] sm:$0xf0]  ;;  %v6291_v13 = vor.u32 %v8818_v0, %v6290_v63 }
  0x5f   :  { %3723 = vmatpush.bf16.msra.mxu0 %v6099_v15  ;;  %v6914_v4 = vld [vmem:[#allocation8 + $0x6e0] sm:$0xf]  ;;  %v9006_v9 = vld [vmem:[#allocation8 + $0x7ec] sm:$0xf0] }
  0x60   :  { %3736 = vmatpush.bf16.msra.mxu1 %v6227_v16  ;;  %v7042_v8 = vld [vmem:[#allocation8 + $0x7e0] sm:$0xf]  ;;  %v8906_v12 = vld [vmem:[#allocation8 + $0x4cc] sm:$0xf0]  ;;  %v6419_v16 = vor.u32 %v8850_v3, %v6418_v1  ;;  %v6915_v17 = vor.u32 %v8974_v5, %v6914_v4 }
  0x61   :  { %3749 = vmatpush.bf16.msra.mxu2 %v6355_v20  ;;  %3762 = vmatpush.bf16.msra.mxu3 %v6483_v22  ;;  %v6642_v11 = vld [vmem:[#allocation8 + $0x4c0] sm:$0xf]  ;;  %v8938_v15 = vld [vmem:[#allocation8 + $0x5cc] sm:$0xf0]  ;;  %v7043_v18 = vor.u32 %v9006_v9, %v7042_v8 }
  0x62   :  { %6028 = vmatmul.msk.bf16.vlgmr.msrb.gmra.mxu0 %vm394_vm0, %v9786_v26  ;;  %6029 = vmatmul.msk.bf16.vlgmr.msrb.gmra.mxu1 %vm394_vm0, %v9786_v26  ;;  %v6770_v14 = vld [vmem:[#allocation8 + $0x5c0] sm:$0xf]  ;;  %v8970_v20 = vld [vmem:[#allocation8 + $0x6cc] sm:$0xf0]  ;;  %v6643_v21 = vor.u32 %v8906_v12, %v6642_v11 }
  0x63   :  { %6030 = vmatmul.msk.bf16.vlgmr.msrb.gmra.mxu2 %vm394_vm0, %v9786_v26  ;;  %3724 = vmatpush.bf16.msra.mxu0 %v6083_v28  ;;  %v6898_v19 = vld [vmem:[#allocation8 + $0x6c0] sm:$0xf]  ;;  %v9002_v23 = vld [vmem:[#allocation8 + $0x7cc] sm:$0xf0]  ;;  %v6771_v24 = vor.u32 %v8938_v15, %v6770_v14 }
  0x64   :  { %6031 = vmatmul.msk.bf16.vlgmr.msrb.gmra.mxu3 %vm394_vm0, %v9786_v26  ;;  %3737 = vmatpush.bf16.msra.mxu1 %v6211_v29  ;;  %v8754_v26 = vld [vmem:[#allocation8 + $0xc] sm:$0xf0]  ;;  %v7026_v22 = vld [vmem:[#allocation8 + $0x7c0] sm:$0xf]  ;;  %v6899_v30 = vor.u32 %v8970_v20, %v6898_v19 }
  0x65   :  { %3750 = vmatpush.bf16.msra.mxu2 %v6339_v33  ;;  %3763 = vmatpush.bf16.msra.mxu3 %v6467_v35  ;;  %v6035_v2 = vor.u32 %v8754_v26, %v6034_v53  ;;  %v6626_v25 = vld [vmem:[#allocation8 + $0x4a0] sm:$0xf]  ;;  %v8902_v27 = vld [vmem:[#allocation8 + $0x4ac] sm:$0xf0]  ;;  %v7027_v31 = vor.u32 %v9002_v23, %v7026_v22 }
  0x66   :  { %v6754_v28 = vld [vmem:[#allocation8 + $0x5a0] sm:$0xf]  ;;  %v8934_v29 = vld [vmem:[#allocation8 + $0x5ac] sm:$0xf0]  ;;  %v6627_v34 = vor.u32 %v8902_v27, %v6626_v25 }
  0x67   :  { %3725 = vmatpush.bf16.msra.mxu0 %v6067_v40  ;;  %v6882_v32 = vld [vmem:[#allocation8 + $0x6a0] sm:$0xf]  ;;  %v8966_v33 = vld [vmem:[#allocation8 + $0x6ac] sm:$0xf0]  ;;  %v6755_v37 = vor.u32 %v8934_v29, %v6754_v28 }
  0x68   :  { %3738 = vmatpush.bf16.msra.mxu1 %v6195_v41  ;;  %v7010_v35 = vld [vmem:[#allocation8 + $0x7a0] sm:$0xf]  ;;  %v8998_v36 = vld [vmem:[#allocation8 + $0x7ac] sm:$0xf0]  ;;  %v6883_v42 = vor.u32 %v8966_v33, %v6882_v32 }
  0x69   :  { %3751 = vmatpush.bf16.msra.mxu2 %v6323_v45  ;;  %3764 = vmatpush.bf16.msra.mxu3 %v6451_v47  ;;  %v6610_v38 = vld [vmem:[#allocation8 + $0x480] sm:$0xf]  ;;  %v8898_v39 = vld [vmem:[#allocation8 + $0x48c] sm:$0xf0]  ;;  %v7011_v43 = vor.u32 %v8998_v36, %v7010_v35 }
  0x6a   :  { %v6738_v40 = vld [vmem:[#allocation8 + $0x580] sm:$0xf]  ;;  %v8930_v41 = vld [vmem:[#allocation8 + $0x58c] sm:$0xf0]  ;;  %v6611_v46 = vor.u32 %v8898_v39, %v6610_v38 }
  0x6b   :  { %3726 = vmatpush.bf16.msra.mxu0 %v6051_v52  ;;  %v6866_v44 = vld [vmem:[#allocation8 + $0x680] sm:$0xf]  ;;  %v8962_v45 = vld [vmem:[#allocation8 + $0x68c] sm:$0xf0]  ;;  %v6739_v49 = vor.u32 %v8930_v41, %v6738_v40 }
  0x6c   :  { %3739 = vmatpush.bf16.msra.mxu1 %v6179_v54  ;;  %v6994_v47 = vld [vmem:[#allocation8 + $0x780] sm:$0xf]  ;;  %v8994_v48 = vld [vmem:[#allocation8 + $0x78c] sm:$0xf0]  ;;  %v6867_v26 = vor.u32 %v8962_v45, %v6866_v44 }
  0x6d   :  { %3752 = vmatpush.bf16.msra.mxu2 %v6307_v58  ;;  %3765 = vmatpush.bf16.msra.mxu3 %v6435_v62  ;;  %v6594_v50 = vld [vmem:[#allocation8 + $0x460] sm:$0xf]  ;;  %v8894_v51 = vld [vmem:[#allocation8 + $0x46c] sm:$0xf0]  ;;  %v6995_v54 = vor.u32 %v8994_v48, %v6994_v47 }
  0x6e   :  { %v6722_v52 = vld [vmem:[#allocation8 + $0x560] sm:$0xf]  ;;  %v8926_v53 = vld [vmem:[#allocation8 + $0x56c] sm:$0xf0]  ;;  %v6595_v55 = vor.u32 %v8894_v51, %v6594_v50 }
  0x6f   :  { %3727 = vmatpush.bf16.msra.mxu0 %v6035_v2  ;;  %v6723_v56 = vor.u32 %v8926_v53, %v6722_v52  ;;  %v6578_v57 = vld [vmem:[#allocation8 + $0x440] sm:$0xf]  ;;  %v8890_v58 = vld [vmem:[#allocation8 + $0x44c] sm:$0xf0] }
  0x70   :  { %3740 = vmatpush.bf16.msra.mxu1 %v6163_v6  ;;  %v6706_v59 = vld [vmem:[#allocation8 + $0x540] sm:$0xf]  ;;  %v8922_v60 = vld [vmem:[#allocation8 + $0x54c] sm:$0xf0]  ;;  %v6579_v61 = vor.u32 %v8890_v58, %v6578_v57 }
  0x71   :  { %3753 = vmatpush.bf16.msra.mxu2 %v6291_v13  ;;  %3766 = vmatpush.bf16.msra.mxu3 %v6419_v16  ;;  %v6707_v62 = vor.u32 %v8922_v60, %v6706_v59  ;;  %v6850_v63 = vld [vmem:[#allocation8 + $0x660] sm:$0xf]  ;;  %v8958_v0 = vld [vmem:[#allocation8 + $0x66c] sm:$0xf0] }
  0x72   :  { %v6978_v1 = vld [vmem:[#allocation8 + $0x760] sm:$0xf]  ;;  %v6851_v2 = vor.u32 %v8958_v0, %v6850_v63  ;;  %v8990_v3 = vld [vmem:[#allocation8 + $0x76c] sm:$0xf0] }
  0x73   :  { %3772 = vmatpush.bf16.msrb.mxu0 %v6659_v7  ;;  %v6979_v4 = vor.u32 %v8990_v3, %v6978_v1  ;;  %v6562_v5 = vld [vmem:[#allocation8 + $0x420] sm:$0xf]  ;;  %v8886_v6 = vld [vmem:[#allocation8 + $0x42c] sm:$0xf0] }
  0x74   :  { %3785 = vmatpush.bf16.msrb.mxu1 %v6787_v10  ;;  %v6563_v7 = vor.u32 %v8886_v6, %v6562_v5  ;;  %v6690_v8 = vld [vmem:[#allocation8 + $0x520] sm:$0xf]  ;;  %v8918_v9 = vld [vmem:[#allocation8 + $0x52c] sm:$0xf0] }
  0x75   :  { %3798 = vmatpush.bf16.msrb.mxu2 %v6915_v17  ;;  %3811 = vmatpush.bf16.msrb.mxu3 %v7043_v18  ;;  %v6691_v10 = vor.u32 %v8918_v9, %v6690_v8  ;;  %v6834_v11 = vld [vmem:[#allocation8 + $0x640] sm:$0xf]  ;;  %v8954_v12 = vld [vmem:[#allocation8 + $0x64c] sm:$0xf0] }
  0x76   :  { %v6962_v13 = vld [vmem:[#allocation8 + $0x740] sm:$0xf]  ;;  %v6835_v14 = vor.u32 %v8954_v12, %v6834_v11  ;;  %v8986_v15 = vld [vmem:[#allocation8 + $0x74c] sm:$0xf0] }
  0x77   :  { %3773 = vmatpush.bf16.msrb.mxu0 %v6643_v21  ;;  %v6963_v16 = vor.u32 %v8986_v15, %v6962_v13  ;;  %v6546_v17 = vld [vmem:[#allocation8 + $0x400] sm:$0xf]  ;;  %v8882_v18 = vld [vmem:[#allocation8 + $0x40c] sm:$0xf0] }
  0x78   :  { %3786 = vmatpush.bf16.msrb.mxu1 %v6771_v24  ;;  %v6674_v19 = vld [vmem:[#allocation8 + $0x500] sm:$0xf]  ;;  %v6547_v20 = vor.u32 %v8882_v18, %v6546_v17  ;;  %v8914_v21 = vld [vmem:[#allocation8 + $0x50c] sm:$0xf0] }
  0x79   :  { %3799 = vmatpush.bf16.msrb.mxu2 %v6899_v30  ;;  %3812 = vmatpush.bf16.msrb.mxu3 %v7027_v31  ;;  %v6675_v22 = vor.u32 %v8914_v21, %v6674_v19  ;;  %v6818_v23 = vld [vmem:[#allocation8 + $0x620] sm:$0xf]  ;;  %v8950_v24 = vld [vmem:[#allocation8 + $0x62c] sm:$0xf0] }
  0x7a   :  { %v6819_v25 = vor.u32 %v8950_v24, %v6818_v23  ;;  %v6946_v27 = vld [vmem:[#allocation8 + $0x720] sm:$0xf]  ;;  %v8982_v28 = vld [vmem:[#allocation8 + $0x72c] sm:$0xf0] }
  0x7b   :  { %3774 = vmatpush.bf16.msrb.mxu0 %v6627_v34  ;;  %v6947_v29 = vor.u32 %v8982_v28, %v6946_v27  ;;  %v6802_v30 = vld [vmem:[#allocation8 + $0x600] sm:$0xf]  ;;  %v8946_v31 = vld [vmem:[#allocation8 + $0x60c] sm:$0xf0] }
  0x7c   :  { %3787 = vmatpush.bf16.msrb.mxu1 %v6755_v37  ;;  %v6803_v32 = vor.u32 %v8946_v31, %v6802_v30  ;;  %v6930_v33 = vld [vmem:[#allocation8 + $0x700] sm:$0xf]  ;;  %v8978_v34 = vld [vmem:[#allocation8 + $0x70c] sm:$0xf0] }
  0x7d   :  { %3800 = vmatpush.bf16.msrb.mxu2 %v6883_v42  ;;  %3813 = vmatpush.bf16.msrb.mxu3 %v7011_v43  ;;  %v6931_v35 = vor.u32 %v8978_v34, %v6930_v33  ;;  %v9820_v36 = vld [vmem:[#allocation7] sm:$0xff]  ;;  %v7170_v42 = vld [vmem:[#allocation8 + $0x8e0] sm:$0xf] }
  0x7e   :  { %v202_v37 = vperm.slane %v9820_v36, 0  ;;  %v203_v38 = vperm.slane %v9820_v36, 1  ;;  %v9038_v43 = vld [vmem:[#allocation8 + $0x8ec] sm:$0xf0]  ;;  %v7298_v45 = vld [vmem:[#allocation8 + $0x9e0] sm:$0xf] }
  0x7f   :  { %3775 = vmatpush.bf16.msrb.mxu0 %v6611_v46  ;;  %v9070_v46 = vld [vmem:[#allocation8 + $0x9ec] sm:$0xf0]  ;;  %v7171_v50 = vor.u32 %v9038_v43, %v7170_v42  ;;  %v205_v52 = vperm.slane %v9820_v36, 3  ;;  %v7426_v63 = vld [vmem:[#allocation8 + $0xae0] sm:$0xf]  ;;  %v206_v13 = vperm.slane %v9820_v36, 4 }
  0x80   :  { %3788 = vmatpush.bf16.msrb.mxu1 %v6739_v49  ;;  %v204_v49 = vperm.slane %v9820_v36, 2  ;;  %v7299_v53 = vor.u32 %v9070_v46, %v7298_v45  ;;  %v9066_v57 = vld [vmem:[#allocation8 + $0x9cc] sm:$0xf0]  ;;  %v7554_v1 = vld [vmem:[#allocation8 + $0xbe0] sm:$0xf] }
  0x81   :  { %3801 = vmatpush.bf16.msrb.mxu2 %v6867_v26  ;;  %3814 = vmatpush.bf16.msrb.mxu3 %v6995_v54  ;;  %v7154_v26 = vld [vmem:[#allocation8 + $0x8c0] sm:$0xf]  ;;  %v9034_v54 = vld [vmem:[#allocation8 + $0x8cc] sm:$0xf0] }
  0x82   :  { %v9102_v0 = vld [vmem:[#allocation8 + $0xaec] sm:$0xf0]  ;;  %v7138_v6 = vld [vmem:[#allocation8 + $0x8a0] sm:$0xf] }
  0x83   :  { %3776 = vmatpush.bf16.msrb.mxu0 %v6595_v55  ;;  %v9134_v5 = vld [vmem:[#allocation8 + $0xbec] sm:$0xf0]  ;;  %v7266_v9 = vld [vmem:[#allocation8 + $0x9a0] sm:$0xf]  ;;  %v7427_v12 = vor.u32 %v9102_v0, %v7426_v63 }
  0x84   :  { %3789 = vmatpush.bf16.msrb.mxu1 %v6723_v56  ;;  %v7282_v56 = vld [vmem:[#allocation8 + $0x9c0] sm:$0xf]  ;;  %v7555_v15 = vor.u32 %v9134_v5, %v7554_v1  ;;  %v9098_v18 = vld [vmem:[#allocation8 + $0xacc] sm:$0xf0] }
  0x85   :  { %3802 = vmatpush.bf16.msrb.mxu2 %v6851_v2  ;;  %3815 = vmatpush.bf16.msrb.mxu3 %v6979_v4  ;;  %v7283_v4 = vor.u32 %v9066_v57, %v7282_v56  ;;  %v7410_v17 = vld [vmem:[#allocation8 + $0xac0] sm:$0xf]  ;;  %v9026_v24 = vld [vmem:[#allocation8 + $0x88c] sm:$0xf0]  ;;  %v209_v56 = vperm.slane %v9820_v36, 7 }
  0x86   :  { %v7538_v19 = vld [vmem:[#allocation8 + $0xbc0] sm:$0xf]  ;;  %v9058_v28 = vld [vmem:[#allocation8 + $0x98c] sm:$0xf0]  ;;  %v7411_v30 = vor.u32 %v9098_v18, %v7410_v17 }
  0x87   :  { %3777 = vmatpush.bf16.msrb.mxu0 %v6579_v61  ;;  %v7122_v23 = vld [vmem:[#allocation8 + $0x880] sm:$0xf]  ;;  %v9126_v42 = vld [vmem:[#allocation8 + $0xbac] sm:$0xf0] }
  0x88   :  { %3790 = vmatpush.bf16.msrb.mxu1 %v6707_v62  ;;  %v7155_v62 = vor.u32 %v9034_v54, %v7154_v26  ;;  %v7250_v27 = vld [vmem:[#allocation8 + $0x980] sm:$0xf]  ;;  %v7123_v34 = vor.u32 %v9026_v24, %v7122_v23  ;;  %v9090_v57 = vld [vmem:[#allocation8 + $0xa8c] sm:$0xf0]  ;;  %v9848_v23 = vld [vmem:[#allocation7 + $0x8] sm:$0xff] }
  0x89   :  { %3803 = vmatpush.bf16.msrb.mxu2 %v6835_v14  ;;  %3816 = vmatpush.bf16.msrb.mxu3 %v6963_v16  ;;  %v7106_v43 = vld [vmem:[#allocation8 + $0x860] sm:$0xf]  ;;  %v9018_v63 = vld [vmem:[#allocation8 + $0x84c] sm:$0xf0] }
  0x8a   :  { %v7234_v46 = vld [vmem:[#allocation8 + $0x960] sm:$0xf]  ;;  %v9014_v18 = vld [vmem:[#allocation8 + $0x82c] sm:$0xf0] }
  0x8b   :  { %3778 = vmatpush.bf16.msrb.mxu0 %v6563_v7  ;;  %v9030_v7 = vld [vmem:[#allocation8 + $0x8ac] sm:$0xf0]  ;;  %v7218_v1 = vld [vmem:[#allocation8 + $0x940] sm:$0xf] }
  0x8c   :  { %3791 = vmatpush.bf16.msrb.mxu1 %v6691_v10  ;;  %v9062_v10 = vld [vmem:[#allocation8 + $0x9ac] sm:$0xf0]  ;;  %v7139_v16 = vor.u32 %v9030_v7, %v7138_v6  ;;  %v7074_v17 = vld [vmem:[#allocation8 + $0x820] sm:$0xf] }
  0x8d   :  { %3804 = vmatpush.bf16.msrb.mxu2 %v6819_v25  ;;  %3817 = vmatpush.bf16.msrb.mxu3 %v6947_v29  ;;  %v7267_v21 = vor.u32 %v9062_v10, %v7266_v9  ;;  %v207_v25 = vperm.slane %v9820_v36, 5  ;;  %v7362_v9 = vld [vmem:[#allocation8 + $0xa60] sm:$0xf]  ;;  %v9086_v10 = vld [vmem:[#allocation8 + $0xa6c] sm:$0xf0] }
  0x8f   :  { %3779 = vmatpush.bf16.msrb.mxu0 %v6547_v20 }
  0x90   :  { %3792 = vmatpush.bf16.msrb.mxu1 %v6675_v22  ;;  %v9130_v22 = vld [vmem:[#allocation8 + $0xbcc] sm:$0xf0] }
  0x91   :  { %3805 = vmatpush.bf16.msrb.mxu2 %v6803_v32  ;;  %3818 = vmatpush.bf16.msrb.mxu3 %v6931_v35  ;;  %v7539_v33 = vor.u32 %v9130_v22, %v7538_v19  ;;  %v7394_v35 = vld [vmem:[#allocation8 + $0xaa0] sm:$0xf]  ;;  %v9046_v22 = vld [vmem:[#allocation8 + $0x92c] sm:$0xf0] }
  0xaf   :  { %v407_v39 = vpop.f32.mrf.mxu0  ;;  %v420_v41 = vpop.f32.mrf.mxu1 }
  0xb0   :  { %v408_v40 = vadd.f32 %v407_v39, %v202_v37  ;;  %v421_v44 = vadd.f32 %v420_v41, %v203_v38  ;;  %v9094_v37 = vld [vmem:[#allocation8 + $0xaac] sm:$0xf0]  ;;  %v7522_v38 = vld [vmem:[#allocation8 + $0xba0] sm:$0xf]  ;;  %v7251_v41 = vor.u32 %v9058_v28, %v7250_v27 }
  0xb1   :  { %v7523_v26 = vor.u32 %v9126_v42, %v7522_v38  ;;  %v7346_v27 = vld [vmem:[#allocation8 + $0xa40] sm:$0xf]  ;;  %v9082_v28 = vld [vmem:[#allocation8 + $0xa4c] sm:$0xf0]  ;;  %v210_v38 = vperm.slane %v9848_v23, 0 }
  0xb2   :  { %v606_v47 = vmax.f32 %v408_v40, 0.0  ;;  %v607_v48 = vmax.f32 %v421_v44, 0.0  ;;  %v9022_v44 = vld [vmem:[#allocation8 + $0x86c] sm:$0xf0] }
  0xb3   :  { %v7107_v54 = vor.u32 %v9022_v44, %v7106_v43  ;;  %v9042_v42 = vld [vmem:[#allocation8 + $0x90c] sm:$0xf0]  ;;  %v7682_v43 = vld [vmem:[#allocation8 + $0xce0] sm:$0xf] }
  0xb4   :  { %v9825_v51 = vpack.c.bf16 %v606_v47, %v606_v47  ;;  %v9828_v55 = vpack.c.bf16 %v607_v48, %v607_v48  ;;  %v9054_v47 = vld [vmem:[#allocation8 + $0x96c] sm:$0xf0] }
  0xb5   :  { %v9166_v44 = vld [vmem:[#allocation8 + $0xcec] sm:$0xf0] }
  0xb6   :  { %v433_v58 = vpop.f32.mrf.mxu2  ;;  %3728 = vmatmul.bf16.vlgmr.msra.gmra.mxu0 %v9825_v51  ;;  %3741 = vmatmul.bf16.vlgmr.msra.gmra.mxu1 %v9828_v55 }
  0xb7   :  { %v434_v59 = vadd.f32 %v433_v58, %v204_v49  ;;  %v446_v60 = vpop.f32.mrf.mxu3  ;;  %3824 = vmatpush.bf16.msra.mxu0 %v7171_v50  ;;  %v409_v61 = vpop.f32.mrf.mxu0  ;;  %3837 = vmatpush.bf16.msra.mxu1 %v7299_v53  ;;  %v7395_v49 = vor.u32 %v9094_v37, %v7394_v35  ;;  %v208_v50 = vperm.slane %v9820_v36, 6  ;;  %v7506_v58 = vld [vmem:[#allocation8 + $0xb80] sm:$0xf] }
  0xb8   :  { %v447_v2 = vadd.f32 %v446_v60, %v205_v52  ;;  %v422_v3 = vpop.f32.mrf.mxu1  ;;  %v7378_v52 = vld [vmem:[#allocation8 + $0xa80] sm:$0xf]  ;;  %v7235_v60 = vor.u32 %v9054_v47, %v7234_v46  ;;  %v9122_v61 = vld [vmem:[#allocation8 + $0xb8c] sm:$0xf0]  ;;  %v7347_v46 = vor.u32 %v9082_v28, %v7346_v27 }
  0xb9   :  { %v608_v8 = vmax.f32 %v434_v59, 0.0  ;;  %v7507_v7 = vor.u32 %v9122_v61, %v7506_v58  ;;  %v7810_v47 = vld [vmem:[#allocation8 + $0xde0] sm:$0xf]  ;;  %v9158_v27 = vld [vmem:[#allocation8 + $0xcac] sm:$0xf0] }
  0xba   :  { %v609_v11 = vmax.f32 %v447_v2, 0.0  ;;  %v9050_v2 = vld [vmem:[#allocation8 + $0x94c] sm:$0xf0]  ;;  %v7458_v61 = vld [vmem:[#allocation8 + $0xb20] sm:$0xf] }
  0xbb   :  { %v9833_v14 = vpack.c.bf16 %v608_v8, %v608_v8  ;;  %3825 = vmatpush.bf16.msra.mxu0 %v7155_v62  ;;  %3838 = vmatpush.bf16.msra.mxu1 %v7283_v4  ;;  %v7090_v62 = vld [vmem:[#allocation8 + $0x840] sm:$0xf]  ;;  %v7379_v4 = vor.u32 %v9090_v57, %v7378_v52 }
  0xbc   :  { %v9835_v20 = vpack.c.bf16 %v609_v11, %v609_v11  ;;  %v7091_v8 = vor.u32 %v9018_v63, %v7090_v62  ;;  %v7490_v11 = vld [vmem:[#allocation8 + $0xb60] sm:$0xf]  ;;  %v9110_v62 = vld [vmem:[#allocation8 + $0xb2c] sm:$0xf0] }
  0xbd   :  { %3754 = vmatmul.bf16.vlgmr.msra.gmra.mxu2 %v9833_v14  ;;  %v7666_v63 = vld [vmem:[#allocation8 + $0xcc0] sm:$0xf] }
  0xbe   :  { %3767 = vmatmul.bf16.vlgmr.msra.gmra.mxu3 %v9835_v20  ;;  %3850 = vmatpush.bf16.msra.mxu2 %v7427_v12  ;;  %v435_v29 = vpop.f32.mrf.mxu2 }
  0xbf   :  { %3863 = vmatpush.bf16.msra.mxu3 %v7555_v15  ;;  %v448_v31 = vpop.f32.mrf.mxu3  ;;  %3826 = vmatpush.bf16.msra.mxu0 %v7139_v16  ;;  %v459_v32 = vpop.f32.mrf.mxu0  ;;  %v7219_v15 = vor.u32 %v9050_v2, %v7218_v1  ;;  %v9118_v16 = vld [vmem:[#allocation8 + $0xb6c] sm:$0xf0] }
  0xc0   :  { %3839 = vmatpush.bf16.msra.mxu1 %v7267_v21  ;;  %v460_v39 = vadd.f32 %v459_v32, %v206_v13  ;;  %v472_v40 = vpop.f32.mrf.mxu1  ;;  %v7202_v21 = vld [vmem:[#allocation8 + $0x920] sm:$0xf]  ;;  %v7075_v31 = vor.u32 %v9014_v18, %v7074_v17 }
  0xc1   :  { %v473_v45 = vadd.f32 %v472_v40, %v207_v25  ;;  %v7363_v25 = vor.u32 %v9086_v10, %v7362_v9  ;;  %v7474_v32 = vld [vmem:[#allocation8 + $0xb40] sm:$0xf]  ;;  %v7203_v37 = vor.u32 %v9046_v22, %v7202_v21  ;;  %v9010_v40 = vld [vmem:[#allocation8 + $0x80c] sm:$0xf0] }
  0xc2   :  { %v610_v48 = vmax.f32 %v460_v39, 0.0  ;;  %3851 = vmatpush.bf16.msra.mxu2 %v7411_v30  ;;  %v7491_v30 = vor.u32 %v9118_v16, %v7490_v11  ;;  %v211_v39 = vperm.slane %v9848_v23, 1  ;;  %v9074_v9 = vld [vmem:[#allocation8 + $0xa0c] sm:$0xf0]  ;;  %v7459_v11 = vor.u32 %v9110_v62, %v7458_v61  ;;  %v7938_v18 = vld [vmem:[#allocation8 + $0xee0] sm:$0xf] }
  0xc3   :  { %3864 = vmatpush.bf16.msra.mxu3 %v7539_v33  ;;  %v611_v53 = vmax.f32 %v473_v45, 0.0  ;;  %3827 = vmatpush.bf16.msra.mxu0 %v7123_v34  ;;  %v9114_v33 = vld [vmem:[#allocation8 + $0xb4c] sm:$0xf0]  ;;  %v7058_v34 = vld [vmem:[#allocation8 + $0x800] sm:$0xf] }
  0xc4   :  { %v9842_v59 = vpack.c.bf16 %v610_v48, %v610_v48  ;;  %3840 = vmatpush.bf16.msra.mxu1 %v7251_v41  ;;  %v7186_v41 = vld [vmem:[#allocation8 + $0x900] sm:$0xf]  ;;  %v9198_v48 = vld [vmem:[#allocation8 + $0xdec] sm:$0xf0]  ;;  %v7475_v52 = vor.u32 %v9114_v33, %v7474_v32 }
  0xc5   :  { %v9844_v0 = vpack.c.bf16 %v611_v53, %v611_v53  ;;  %v7059_v53 = vor.u32 %v9010_v40, %v7058_v34  ;;  %v7187_v58 = vor.u32 %v9042_v42, %v7186_v41  ;;  %v7811_v2 = vor.u32 %v9198_v48, %v7810_v47  ;;  %v8066_v21 = vld [vmem:[#allocation8 + $0xfe0] sm:$0xf]  ;;  %v9190_v33 = vld [vmem:[#allocation8 + $0xdac] sm:$0xf0] }
  0xc6   :  { %3852 = vmatpush.bf16.msra.mxu2 %v7395_v49  ;;  %v485_v3 = vpop.f32.mrf.mxu2  ;;  %3780 = vmatmul.bf16.vlgmr.msrb.gmra.mxu0 %v9842_v59  ;;  %v7778_v32 = vld [vmem:[#allocation8 + $0xda0] sm:$0xf]  ;;  %v9258_v47 = vld [vmem:[#allocation8 + $0xfcc] sm:$0xf0] }
  0xc7   :  { %3865 = vmatpush.bf16.msra.mxu3 %v7523_v26  ;;  %v486_v36 = vadd.f32 %v485_v3, %v208_v50  ;;  %3828 = vmatpush.bf16.msra.mxu0 %v7107_v54  ;;  %v461_v5 = vpop.f32.mrf.mxu0  ;;  %v498_v6 = vpop.f32.mrf.mxu3  ;;  %v7330_v26 = vld [vmem:[#allocation8 + $0xa20] sm:$0xf]  ;;  %v9078_v54 = vld [vmem:[#allocation8 + $0xa2c] sm:$0xf0] }
  0xc8   :  { %3841 = vmatpush.bf16.msra.mxu1 %v7235_v60  ;;  %v499_v12 = vadd.f32 %v498_v6, %v209_v56  ;;  %v474_v13 = vpop.f32.mrf.mxu1  ;;  %v7683_v60 = vor.u32 %v9166_v44, %v7682_v43  ;;  %v9162_v3 = vld [vmem:[#allocation8 + $0xccc] sm:$0xf0]  ;;  %v7331_v6 = vor.u32 %v9078_v54, %v7330_v26  ;;  %v7922_v40 = vld [vmem:[#allocation8 + $0xec0] sm:$0xf] }
  0xc9   :  { %v612_v19 = vmax.f32 %v486_v36, 0.0  ;;  %3793 = vmatmul.bf16.vlgmr.msrb.gmra.mxu1 %v9844_v0  ;;  %v9194_v36 = vld [vmem:[#allocation8 + $0xdcc] sm:$0xf0]  ;;  %v7442_v13 = vld [vmem:[#allocation8 + $0xb00] sm:$0xf]  ;;  %v7667_v17 = vor.u32 %v9162_v3, %v7666_v63 }
  0xca   :  { %v613_v24 = vmax.f32 %v499_v12, 0.0  ;;  %3853 = vmatpush.bf16.msra.mxu2 %v7379_v4  ;;  %v7794_v4 = vld [vmem:[#allocation8 + $0xdc0] sm:$0xf]  ;;  %v213_v12 = vperm.slane %v9848_v23, 3 }
  0xcb   :  { %v9850_v29 = vpack.c.bf16 %v612_v19, %v612_v19  ;;  %3866 = vmatpush.bf16.msra.mxu3 %v7507_v7  ;;  %3829 = vmatpush.bf16.msra.mxu0 %v7091_v8  ;;  %v212_v7 = vperm.slane %v9848_v23, 2  ;;  %v7314_v8 = vld [vmem:[#allocation8 + $0xa00] sm:$0xf]  ;;  %v9230_v19 = vld [vmem:[#allocation8 + $0xeec] sm:$0xf0]  ;;  %v7795_v22 = vor.u32 %v9194_v36, %v7794_v4 }
  0xcc   :  { %v9852_v35 = vpack.c.bf16 %v613_v24, %v613_v24  ;;  %3842 = vmatpush.bf16.msra.mxu1 %v7219_v15  ;;  %v9106_v15 = vld [vmem:[#allocation8 + $0xb0c] sm:$0xf0]  ;;  %v7762_v54 = vld [vmem:[#allocation8 + $0xd80] sm:$0xf] }
  0xcd   :  { %3806 = vmatmul.bf16.vlgmr.msrb.gmra.mxu2 %v9850_v29  ;;  %v9262_v24 = vld [vmem:[#allocation8 + $0xfec] sm:$0xf0]  ;;  %v7906_v63 = vld [vmem:[#allocation8 + $0xea0] sm:$0xf] }
  0xce   :  { %3854 = vmatpush.bf16.msra.mxu2 %v7363_v25  ;;  %v487_v45 = vpop.f32.mrf.mxu2  ;;  %3819 = vmatmul.bf16.vlgmr.msrb.gmra.mxu3 %v9852_v35  ;;  %v7650_v25 = vld [vmem:[#allocation8 + $0xca0] sm:$0xf]  ;;  %v8067_v43 = vor.u32 %v9262_v24, %v8066_v21  ;;  %v9254_v4 = vld [vmem:[#allocation8 + $0xfac] sm:$0xf0] }
  0xcf   :  { %3867 = vmatpush.bf16.msra.mxu3 %v7491_v30  ;;  %3830 = vmatpush.bf16.msra.mxu0 %v7075_v31  ;;  %v500_v49 = vpop.f32.mrf.mxu3  ;;  %v511_v50 = vpop.f32.mrf.mxu0  ;;  %v7315_v31 = vor.u32 %v9074_v9, %v7314_v8  ;;  %v7651_v44 = vor.u32 %v9158_v27, %v7650_v25  ;;  %v9226_v45 = vld [vmem:[#allocation8 + $0xecc] sm:$0xf0]  ;;  %v7618_v36 = vld [vmem:[#allocation8 + $0xc60] sm:$0xf] }
  0xd0   :  { %3843 = vmatpush.bf16.msra.mxu1 %v7203_v37  ;;  %v512_v56 = vadd.f32 %v511_v50, %v210_v38  ;;  %v524_v57 = vpop.f32.mrf.mxu1  ;;  %v7443_v38 = vor.u32 %v9106_v15, %v7442_v13  ;;  %v7779_v50 = vor.u32 %v9190_v33, %v7778_v32  ;;  %v7890_v15 = vld [vmem:[#allocation8 + $0xe80] sm:$0xf]  ;;  %v9146_v25 = vld [vmem:[#allocation8 + $0xc4c] sm:$0xf0]  ;;  %v214_v33 = vperm.slane %v9848_v23, 4 }
  0xd1   :  { %v525_v1 = vadd.f32 %v524_v57, %v211_v39  ;;  %v7939_v39 = vor.u32 %v9230_v19, %v7938_v18  ;;  %v8018_v18 = vld [vmem:[#allocation8 + $0xf80] sm:$0xf] }
  0xd2   :  { %v614_v5 = vmax.f32 %v512_v56, 0.0  ;;  %3855 = vmatpush.bf16.msra.mxu2 %v7347_v46  ;;  %v8050_v46 = vld [vmem:[#allocation8 + $0xfc0] sm:$0xf]  ;;  %v9186_v56 = vld [vmem:[#allocation8 + $0xd8c] sm:$0xf0] }
  0xd3   :  { %3868 = vmatpush.bf16.msra.mxu3 %v7475_v52  ;;  %v615_v10 = vmax.f32 %v525_v1, 0.0  ;;  %3831 = vmatpush.bf16.msra.mxu0 %v7059_v53  ;;  %v7634_v52 = vld [vmem:[#allocation8 + $0xc80] sm:$0xf]  ;;  %v9154_v53 = vld [vmem:[#allocation8 + $0xc8c] sm:$0xf0]  ;;  %v8051_v61 = vor.u32 %v9258_v47, %v8050_v46  ;;  %v7763_v3 = vor.u32 %v9186_v56, %v7762_v54 }
  0xd4   :  { %v9860_v16 = vpack.c.bf16 %v614_v5, %v614_v5  ;;  %3844 = vmatpush.bf16.msra.mxu1 %v7187_v58  ;;  %v7923_v58 = vor.u32 %v9226_v45, %v7922_v40  ;;  %v7635_v62 = vor.u32 %v9154_v53, %v7634_v52  ;;  %v9222_v1 = vld [vmem:[#allocation8 + $0xeac] sm:$0xf0]  ;;  %v7602_v24 = vld [vmem:[#allocation8 + $0xc40] sm:$0xf]  ;;  %v215_v40 = vperm.slane %v9848_v23, 5 }
  0xd5   :  { %v9862_v28 = vpack.c.bf16 %v615_v10, %v615_v10  ;;  %v9150_v5 = vld [vmem:[#allocation8 + $0xc6c] sm:$0xf0]  ;;  %v7907_v9 = vor.u32 %v9222_v1, %v7906_v63  ;;  %v7730_v27 = vld [vmem:[#allocation8 + $0xd40] sm:$0xf] }
  0xd6   :  { %3856 = vmatpush.bf16.msra.mxu2 %v7331_v6  ;;  %v537_v30 = vpop.f32.mrf.mxu2  ;;  %3832 = vmatmul.bf16.vlgmr.msra.gmra.mxu0 %v9860_v16  ;;  %v7746_v6 = vld [vmem:[#allocation8 + $0xd60] sm:$0xf]  ;;  %v7619_v13 = vor.u32 %v9150_v5, %v7618_v36  ;;  %v9174_v46 = vld [vmem:[#allocation8 + $0xd2c] sm:$0xf0]  ;;  %v8780_v5 = vld [vmem:[#allocation8 + $0xe4] sm:$0xf] }
  0xd7   :  { %3876 = vmatpush.bf16.msrb.mxu0 %v7683_v60  ;;  %3869 = vmatpush.bf16.msra.mxu3 %v7459_v11  ;;  %v538_v34 = vadd.f32 %v537_v30, %v212_v7  ;;  %v550_v37 = vpop.f32.mrf.mxu3  ;;  %v513_v41 = vpop.f32.mrf.mxu0  ;;  %v9182_v7 = vld [vmem:[#allocation8 + $0xd6c] sm:$0xf0]  ;;  %v7874_v32 = vld [vmem:[#allocation8 + $0xe60] sm:$0xf] }
  0xd8   :  { %3889 = vmatpush.bf16.msrb.mxu1 %v7811_v2  ;;  %v551_v42 = vadd.f32 %v550_v37, %v213_v12  ;;  %v526_v48 = vpop.f32.mrf.mxu1  ;;  %v8034_v2 = vld [vmem:[#allocation8 + $0xfa0] sm:$0xf]  ;;  %v7747_v21 = vor.u32 %v9182_v7, %v7746_v6  ;;  %v9178_v30 = vld [vmem:[#allocation8 + $0xd4c] sm:$0xf0]  ;;  %v7603_v37 = vor.u32 %v9146_v25, %v7602_v24  ;;  %v6148_v6 = vld [vmem:[#allocation8 + $0xf0] sm:$0xf0] }
  0xd9   :  { %v616_v49 = vmax.f32 %v538_v34, 0.0  ;;  %3845 = vmatmul.bf16.vlgmr.msra.gmra.mxu1 %v9862_v28  ;;  %v8035_v12 = vor.u32 %v9254_v4, %v8034_v2  ;;  %v7731_v41 = vor.u32 %v9178_v30, %v7730_v27  ;;  %v7714_v45 = vld [vmem:[#allocation8 + $0xd20] sm:$0xf]  ;;  %v9210_v52 = vld [vmem:[#allocation8 + $0xe4c] sm:$0xf0]  ;;  %v216_v7 = vperm.slane %v9848_v23, 6 }
  0xda   :  { %v617_v26 = vmax.f32 %v551_v42, 0.0  ;;  %3857 = vmatpush.bf16.msra.mxu2 %v7315_v31  ;;  %v9246_v42 = vld [vmem:[#allocation8 + $0xf6c] sm:$0xf0]  ;;  %v7570_v63 = vld [vmem:[#allocation8 + $0xc00] sm:$0xf]  ;;  %v7715_v2 = vor.u32 %v9174_v46, %v7714_v45 }
  0xdb   :  { %3877 = vmatpush.bf16.msrb.mxu0 %v7667_v17  ;;  %v9866_v57 = vpack.c.bf16 %v616_v49, %v616_v49  ;;  %3870 = vmatpush.bf16.msra.mxu3 %v7443_v38  ;;  %v9218_v17 = vld [vmem:[#allocation8 + $0xe8c] sm:$0xf0]  ;;  %v7698_v4 = vld [vmem:[#allocation8 + $0xd00] sm:$0xf] }
  0xdc   :  { %3890 = vmatpush.bf16.msrb.mxu1 %v7795_v22  ;;  %v9868_v60 = vpack.c.bf16 %v617_v26, %v617_v26  ;;  %v9250_v22 = vld [vmem:[#allocation8 + $0xf8c] sm:$0xf0]  ;;  %v7891_v31 = vor.u32 %v9218_v17, %v7890_v15  ;;  %v7970_v24 = vld [vmem:[#allocation8 + $0xf20] sm:$0xf] }
  0xdd   :  { %3858 = vmatmul.bf16.vlgmr.msra.gmra.mxu2 %v9866_v57  ;;  %v8019_v34 = vor.u32 %v9250_v22, %v8018_v18  ;;  %v9214_v38 = vld [vmem:[#allocation8 + $0xe6c] sm:$0xf0]  ;;  %v7842_v18 = vld [vmem:[#allocation8 + $0xe20] sm:$0xf]  ;;  %v6151_v22 = vor.u32 %v8780_v5, %v6148_v6  ;;  %v6388_v5 = vld [vmem:[#allocation8 + $0x2d0] sm:$0xf0] }
  0xde   :  { %3902 = vmatpush.bf16.msrb.mxu2 %v7939_v39  ;;  %3871 = vmatmul.bf16.vlgmr.msra.gmra.mxu3 %v9868_v60  ;;  %v539_v8 = vpop.f32.mrf.mxu2  ;;  %v8002_v39 = vld [vmem:[#allocation8 + $0xf60] sm:$0xf]  ;;  %v7875_v48 = vor.u32 %v9214_v38, %v7874_v32  ;;  %v9170_v36 = vld [vmem:[#allocation8 + $0xd0c] sm:$0xf0]  ;;  %v6132_v32 = vld [vmem:[#allocation8 + $0xd0] sm:$0xf0] }
  0xdf   :  { %3915 = vmatpush.bf16.msrb.mxu3 %v8067_v43  ;;  %3878 = vmatpush.bf16.msrb.mxu0 %v7651_v44  ;;  %v552_v10 = vpop.f32.mrf.mxu3  ;;  %v563_v11 = vpop.f32.mrf.mxu0  ;;  %v7586_v43 = vld [vmem:[#allocation8 + $0xc20] sm:$0xf]  ;;  %v9142_v44 = vld [vmem:[#allocation8 + $0xc2c] sm:$0xf0]  ;;  %v8003_v54 = vor.u32 %v9246_v42, %v8002_v39  ;;  %v6260_v39 = vld [vmem:[#allocation8 + $0x1d0] sm:$0xf0] }
  0xe0   :  { %3891 = vmatpush.bf16.msrb.mxu1 %v7779_v50  ;;  %v576_v19 = vpop.f32.mrf.mxu1  ;;  %v564_v49 = vadd.f32 %v563_v11, %v214_v33  ;;  %v7858_v50 = vld [vmem:[#allocation8 + $0xe40] sm:$0xf]  ;;  %v7587_v56 = vor.u32 %v9142_v44, %v7586_v43  ;;  %v8812_v10 = vld [vmem:[#allocation8 + $0x1e4] sm:$0xf]  ;;  %v6276_v11 = vld [vmem:[#allocation8 + $0x1f0] sm:$0xf0] }
  0xe1   :  { %v9238_v25 = vld [vmem:[#allocation8 + $0xf2c] sm:$0xf0]  ;;  %v6279_v27 = vor.u32 %v8812_v10, %v6276_v11  ;;  %v8808_v33 = vld [vmem:[#allocation8 + $0x1c4] sm:$0xf]  ;;  %v7954_v45 = vld [vmem:[#allocation8 + $0xf00] sm:$0xf] }
  0xe2   :  { %3903 = vmatpush.bf16.msrb.mxu2 %v7923_v58  ;;  %v577_v58 = vadd.f32 %v576_v19, %v215_v40  ;;  %v618_v8 = vmax.f32 %v564_v49, 0.0  ;;  %v9206_v19 = vld [vmem:[#allocation8 + $0xe2c] sm:$0xf0]  ;;  %v7826_v40 = vld [vmem:[#allocation8 + $0xe00] sm:$0xf]  ;;  %v7971_v44 = vor.u32 %v9238_v25, %v7970_v24 }
  0xe3   :  { %3916 = vmatpush.bf16.msrb.mxu3 %v8051_v61  ;;  %3879 = vmatpush.bf16.msrb.mxu0 %v7635_v62  ;;  %v7986_v61 = vld [vmem:[#allocation8 + $0xf40] sm:$0xf]  ;;  %v9242_v62 = vld [vmem:[#allocation8 + $0xf4c] sm:$0xf0]  ;;  %v6404_v49 = vld [vmem:[#allocation8 + $0x2f0] sm:$0xf0] }
  0xe4   :  { %3892 = vmatpush.bf16.msrb.mxu1 %v7763_v3  ;;  %v9138_v3 = vld [vmem:[#allocation8 + $0xc0c] sm:$0xf0]  ;;  %v7987_v15 = vor.u32 %v9242_v62, %v7986_v61  ;;  %v8804_v62 = vld [vmem:[#allocation8 + $0x1a4] sm:$0xf]  ;;  %v6100_v11 = vld [vmem:[#allocation8 + $0x90] sm:$0xf0] }
  0xe5   :  { %v7571_v17 = vor.u32 %v9138_v3, %v7570_v63  ;;  %v9234_v46 = vld [vmem:[#allocation8 + $0xf0c] sm:$0xf0]  ;;  %v6244_v63 = vld [vmem:[#allocation8 + $0x1b0] sm:$0xf0]  ;;  %v8872_v6 = vld [vmem:[#allocation8 + $0x3c4] sm:$0xf] }
  0xe6   :  { %3904 = vmatpush.bf16.msrb.mxu2 %v7907_v9  ;;  %v589_v47 = vpop.f32.mrf.mxu2  ;;  %v7859_v9 = vor.u32 %v9210_v52, %v7858_v50  ;;  %v8876_v50 = vld [vmem:[#allocation8 + $0x3e4] sm:$0xf]  ;;  %v6532_v52 = vld [vmem:[#allocation8 + $0x3f0] sm:$0xf0] }
  0xe7   :  { %3917 = vmatpush.bf16.msrb.mxu3 %v8035_v12  ;;  %3880 = vmatpush.bf16.msrb.mxu0 %v7619_v13  ;;  %v602_v53 = vpop.f32.mrf.mxu3  ;;  %v565_v26 = vpop.f32.mrf.mxu0  ;;  %v217_v12 = vperm.slane %v9848_v23, 7  ;;  %v619_v13 = vmax.f32 %v577_v58, 0.0  ;;  %v590_v30 = vadd.f32 %v589_v47, %v216_v7  ;;  %v7843_v23 = vor.u32 %v9206_v19, %v7842_v18  ;;  %v8844_v47 = vld [vmem:[#allocation8 + $0x2e4] sm:$0xf] }
  0xe8   :  { %3893 = vmatpush.bf16.msrb.mxu1 %v7747_v21  ;;  %v578_v1 = vpop.f32.mrf.mxu1  ;;  %v7699_v21 = vor.u32 %v9170_v36, %v7698_v4  ;;  %v6263_v26 = vor.u32 %v8808_v33, %v6260_v39  ;;  %v6535_v3 = vor.u32 %v8876_v50, %v6532_v52  ;;  %v8840_v36 = vld [vmem:[#allocation8 + $0x2c4] sm:$0xf]  ;;  %v6212_v33 = vld [vmem:[#allocation8 + $0x170] sm:$0xf0] }
  0xe9   :  { %v603_v38 = vadd.f32 %v602_v53, %v217_v12  ;;  %v9878_v43 = vpack.c.bf16 %v619_v13, %v619_v13  ;;  %v620_v53 = vmax.f32 %v590_v30, 0.0  ;;  %v7955_v1 = vor.u32 %v9234_v46, %v7954_v45  ;;  %v8768_v10 = vld [vmem:[#allocation8 + $0x84] sm:$0xf]  ;;  %v6068_v46 = vld [vmem:[#allocation8 + $0x50] sm:$0xf0] }
  0xea   :  { %3905 = vmatpush.bf16.msrb.mxu2 %v7891_v31  ;;  %v8776_v31 = vld [vmem:[#allocation8 + $0xc4] sm:$0xf]  ;;  %v6103_v19 = vor.u32 %v8768_v10, %v6100_v11  ;;  %v6036_v11 = vld [vmem:[#allocation8 + $0x10] sm:$0xf0] }
  0xeb   :  { %3918 = vmatpush.bf16.msrb.mxu3 %v8019_v34  ;;  %3881 = vmatpush.bf16.msrb.mxu0 %v7603_v37  ;;  %v9876_v37 = vpack.c.bf16 %v618_v8, %v618_v8  ;;  %v621_v58 = vmax.f32 %v603_v38, 0.0  ;;  %v9882_v7 = vpack.c.bf16 %v620_v53, %v620_v53  ;;  %v6247_v8 = vor.u32 %v8804_v62, %v6244_v63  ;;  %v8800_v13 = vld [vmem:[#allocation8 + $0x184] sm:$0xf]  ;;  %v6052_v62 = vld [vmem:[#allocation8 + $0x30] sm:$0xf0] }
  0xec   :  { %3894 = vmatpush.bf16.msrb.mxu1 %v7731_v41  ;;  %v9202_v41 = vld [vmem:[#allocation8 + $0xe0c] sm:$0xf0]  ;;  %v8868_v24 = vld [vmem:[#allocation8 + $0x3a4] sm:$0xf] }
  0xed   :  { %v7827_v61 = vor.u32 %v9202_v41, %v7826_v40  ;;  %v9884_v12 = vpack.c.bf16 %v621_v58, %v621_v58  ;;  %v8764_v30 = vld [vmem:[#allocation8 + $0x64] sm:$0xf]  ;;  %v6356_v40 = vld [vmem:[#allocation8 + $0x290] sm:$0xf0] }
  0xee   :  { %3906 = vmatpush.bf16.msrb.mxu2 %v7875_v48  ;;  %v591_v34 = vpop.f32.mrf.mxu2  ;;  %v6135_v48 = vor.u32 %v8776_v31, %v6132_v32  ;;  %v6084_v31 = vld [vmem:[#allocation8 + $0x70] sm:$0xf0]  ;;  %v8796_v32 = vld [vmem:[#allocation8 + $0x164] sm:$0xf] }
  0xef   :  { %3919 = vmatpush.bf16.msrb.mxu3 %v8003_v54  ;;  %3882 = vmatpush.bf16.msrb.mxu0 %v7587_v56  ;;  %v604_v42 = vpop.f32.mrf.mxu3  ;;  %v8772_v54 = vld [vmem:[#allocation8 + $0xa4] sm:$0xf]  ;;  %v6116_v56 = vld [vmem:[#allocation8 + $0xb0] sm:$0xf0]  ;;  %v6087_v38 = vor.u32 %v8764_v30, %v6084_v31 }
  0xf0   :  { %3895 = vmatpush.bf16.msrb.mxu1 %v7715_v2  ;;  %v6407_v2 = vor.u32 %v8844_v47, %v6404_v49  ;;  %v6119_v4 = vor.u32 %v8772_v54, %v6116_v56  ;;  %v8832_v39 = vld [vmem:[#allocation8 + $0x284] sm:$0xf]  ;;  %v6215_v42 = vor.u32 %v8796_v32, %v6212_v33  ;;  %v6468_v58 = vld [vmem:[#allocation8 + $0x370] sm:$0xf0] }
  0xf1   :  { %v8864_v41 = vld [vmem:[#allocation8 + $0x384] sm:$0xf]  ;;  %v6359_v49 = vor.u32 %v8832_v39, %v6356_v40  ;;  %v6308_v30 = vld [vmem:[#allocation8 + $0x230] sm:$0xf0] }
  0xf2   :  { %3907 = vmatpush.bf16.msrb.mxu2 %v7859_v9  ;;  %v6516_v9 = vld [vmem:[#allocation8 + $0x3d0] sm:$0xf0]  ;;  %v8760_v45 = vld [vmem:[#allocation8 + $0x44] sm:$0xf] }
  0xf3   :  { %3920 = vmatpush.bf16.msrb.mxu3 %v7987_v15  ;;  %3883 = vmatpush.bf16.msrb.mxu0 %v7571_v17  ;;  %v6228_v15 = vld [vmem:[#allocation8 + $0x190] sm:$0xf0]  ;;  %v6391_v17 = vor.u32 %v8840_v36, %v6388_v5  ;;  %v6519_v18 = vor.u32 %v8872_v6, %v6516_v9  ;;  %v8792_v47 = vld [vmem:[#allocation8 + $0x144] sm:$0xf]  ;;  %v6071_v52 = vor.u32 %v8760_v45, %v6068_v46 }
  0xf4   :  { %3896 = vmatpush.bf16.msrb.mxu1 %v7699_v21  ;;  %v8836_v21 = vld [vmem:[#allocation8 + $0x2a4] sm:$0xf]  ;;  %v6231_v25 = vor.u32 %v8800_v13, %v6228_v15  ;;  %v6324_v5 = vld [vmem:[#allocation8 + $0x250] sm:$0xf0] }
  0xf5   :  { %v8828_v53 = vld [vmem:[#allocation8 + $0x264] sm:$0xf]  ;;  %v6164_v15 = vld [vmem:[#allocation8 + $0x110] sm:$0xf0] }
  0xf6   :  { %3908 = vmatpush.bf16.msrb.mxu2 %v7843_v23  ;;  %3884 = vmatmul.bf16.vlgmr.msrb.gmra.mxu0 %v9876_v37  ;;  %v8860_v54 = vld [vmem:[#allocation8 + $0x364] sm:$0xf]  ;;  %v6644_v39 = vld [vmem:[#allocation8 + $0x4d0] sm:$0xf0] }
  0xf7   :  { %3928 = vmatpush.bf16.msra.mxu0 %v6151_v22  ;;  %3921 = vmatpush.bf16.msrb.mxu3 %v7971_v44  ;;  %v6372_v22 = vld [vmem:[#allocation8 + $0x2b0] sm:$0xf0]  ;;  %v8788_v63 = vld [vmem:[#allocation8 + $0x124] sm:$0xf] }
  0xf8   :  { %3941 = vmatpush.bf16.msra.mxu1 %v6279_v27  ;;  %v6500_v27 = vld [vmem:[#allocation8 + $0x3b0] sm:$0xf0]  ;;  %v6375_v34 = vor.u32 %v8836_v21, %v6372_v22  ;;  %v8856_v6 = vld [vmem:[#allocation8 + $0x344] sm:$0xf] }
  0xf9   :  { %3897 = vmatmul.bf16.vlgmr.msrb.gmra.mxu1 %v9878_v43  ;;  %v6503_v23 = vor.u32 %v8868_v24, %v6500_v27  ;;  %v6484_v44 = vld [vmem:[#allocation8 + $0x390] sm:$0xf0]  ;;  %v8752_v10 = vld [vmem:[#allocation8 + $0x4] sm:$0xf] }
  0xfa   :  { %3909 = vmatpush.bf16.msrb.mxu2 %v7827_v61  ;;  %v6487_v50 = vor.u32 %v8864_v41, %v6484_v44  ;;  %v8756_v61 = vld [vmem:[#allocation8 + $0x24] sm:$0xf]  ;;  %v6788_v22 = vld [vmem:[#allocation8 + $0x5f0] sm:$0xf0] }
  0xfb   :  { %3929 = vmatpush.bf16.msra.mxu0 %v6135_v48  ;;  %3922 = vmatpush.bf16.msrb.mxu3 %v7955_v1  ;;  %v6196_v48 = vld [vmem:[#allocation8 + $0x150] sm:$0xf0]  ;;  %v6055_v36 = vor.u32 %v8756_v61, %v6052_v62  ;;  %v8784_v13 = vld [vmem:[#allocation8 + $0x104] sm:$0xf] }
  0xfc   :  { %3942 = vmatpush.bf16.msra.mxu1 %v6263_v26  ;;  %v6340_v26 = vld [vmem:[#allocation8 + $0x270] sm:$0xf0]  ;;  %v6199_v56 = vor.u32 %v8792_v47, %v6196_v48  ;;  %v8940_v21 = vld [vmem:[#allocation8 + $0x5e4] sm:$0xf]  ;;  %v6167_v31 = vor.u32 %v8784_v13, %v6164_v15 }
  0xfd   :  { %3910 = vmatmul.bf16.vlgmr.msrb.gmra.mxu2 %v9882_v7  ;;  %v6180_v1 = vld [vmem:[#allocation8 + $0x130] sm:$0xf0]  ;;  %v8820_v27 = vld [vmem:[#allocation8 + $0x224] sm:$0xf] }
  0xfe   :  { %3954 = vmatpush.bf16.msra.mxu2 %v6407_v2  ;;  %3923 = vmatmul.bf16.vlgmr.msrb.gmra.mxu3 %v9884_v12  ;;  %v6343_v2 = vor.u32 %v8828_v53, %v6340_v26  ;;  %v6183_v9 = vor.u32 %v8788_v63, %v6180_v1  ;;  %v8852_v33 = vld [vmem:[#allocation8 + $0x324] sm:$0xf]  ;;  %v6311_v40 = vor.u32 %v8820_v27, %v6308_v30  ;;  %v6292_v46 = vld [vmem:[#allocation8 + $0x210] sm:$0xf0] }
  0xff   :  { %3967 = vmatpush.bf16.msra.mxu3 %v6535_v3  ;;  %3930 = vmatpush.bf16.msra.mxu0 %v6119_v4  ;;  %v8824_v3 = vld [vmem:[#allocation8 + $0x244] sm:$0xf]  ;;  %v6471_v4 = vor.u32 %v8860_v54, %v6468_v58  ;;  %v6420_v48 = vld [vmem:[#allocation8 + $0x310] sm:$0xf0] }
 0x100   :  { %3943 = vmatpush.bf16.msra.mxu1 %v6247_v8  ;;  %v6452_v8 = vld [vmem:[#allocation8 + $0x350] sm:$0xf0]  ;;  %v8936_v41 = vld [vmem:[#allocation8 + $0x5c4] sm:$0xf] }
 0x101   :  { %v6455_v24 = vor.u32 %v8856_v6, %v6452_v8  ;;  %v8816_v44 = vld [vmem:[#allocation8 + $0x204] sm:$0xf]  ;;  %v7044_v54 = vld [vmem:[#allocation8 + $0x7f0] sm:$0xf0] }
 0x102   :  { %3955 = vmatpush.bf16.msra.mxu2 %v6391_v17  ;;  %v8908_v17 = vld [vmem:[#allocation8 + $0x4e4] sm:$0xf]  ;;  %v6628_v58 = vld [vmem:[#allocation8 + $0x4b0] sm:$0xf0]  ;;  %v6295_v61 = vor.u32 %v8816_v44, %v6292_v46 }
 0x103   :  { %3968 = vmatpush.bf16.msra.mxu3 %v6519_v18  ;;  %3931 = vmatpush.bf16.msra.mxu0 %v6103_v19  ;;  %v6660_v18 = vld [vmem:[#allocation8 + $0x4f0] sm:$0xf0]  ;;  %v6327_v19 = vor.u32 %v8824_v3, %v6324_v5  ;;  %v8848_v47 = vld [vmem:[#allocation8 + $0x304] sm:$0xf] }
 0x104   :  { %3944 = vmatpush.bf16.msra.mxu1 %v6231_v25  ;;  %v6039_v25 = vor.u32 %v8752_v10, %v6036_v11  ;;  %v6663_v32 = vor.u32 %v8908_v17, %v6660_v18  ;;  %v9004_v53 = vld [vmem:[#allocation8 + $0x7e4] sm:$0xf]  ;;  %v6756_v63 = vld [vmem:[#allocation8 + $0x5b0] sm:$0xf0]  ;;  %v6423_v1 = vor.u32 %v8848_v47, %v6420_v48 }
 0x105   :  { %v8932_v62 = vld [vmem:[#allocation8 + $0x5a4] sm:$0xf]  ;;  %v7047_v3 = vor.u32 %v9004_v53, %v7044_v54  ;;  %v6900_v5 = vld [vmem:[#allocation8 + $0x6d0] sm:$0xf0] }
 0x106   :  { %3956 = vmatpush.bf16.msra.mxu2 %v6375_v34  ;;  %v6436_v34 = vld [vmem:[#allocation8 + $0x330] sm:$0xf0]  ;;  %v9000_v6 = vld [vmem:[#allocation8 + $0x7c4] sm:$0xf]  ;;  %v6759_v8 = vor.u32 %v8932_v62, %v6756_v63 }
 0x107   :  { %3969 = vmatpush.bf16.msra.mxu3 %v6503_v23  ;;  %3932 = vmatpush.bf16.msra.mxu0 %v6087_v38  ;;  %v6791_v23 = vor.u32 %v8940_v21, %v6788_v22  ;;  %v8904_v38 = vld [vmem:[#allocation8 + $0x4c4] sm:$0xf]  ;;  %v6439_v45 = vor.u32 %v8852_v33, %v6436_v34  ;;  %v6612_v11 = vld [vmem:[#allocation8 + $0x490] sm:$0xf0] }
 0x108   :  { %3945 = vmatpush.bf16.msra.mxu1 %v6215_v42  ;;  %v6772_v42 = vld [vmem:[#allocation8 + $0x5d0] sm:$0xf0]  ;;  %v8896_v10 = vld [vmem:[#allocation8 + $0x484] sm:$0xf] }
 0x109   :  { %v6775_v26 = vor.u32 %v8936_v41, %v6772_v42  ;;  %v8928_v13 = vld [vmem:[#allocation8 + $0x584] sm:$0xf]  ;;  %v6740_v15 = vld [vmem:[#allocation8 + $0x590] sm:$0xf0] }
 0x10a   :  { %3957 = vmatpush.bf16.msra.mxu2 %v6359_v49  ;;  %v6647_v49 = vor.u32 %v8904_v38, %v6644_v39  ;;  %v8964_v21 = vld [vmem:[#allocation8 + $0x6a4] sm:$0xf]  ;;  %v6884_v22 = vld [vmem:[#allocation8 + $0x6b0] sm:$0xf0] }
 0x10b   :  { %3970 = vmatpush.bf16.msra.mxu3 %v6487_v50  ;;  %3933 = vmatpush.bf16.msra.mxu0 %v6071_v52  ;;  %v8972_v50 = vld [vmem:[#allocation8 + $0x6e4] sm:$0xf]  ;;  %v6916_v52 = vld [vmem:[#allocation8 + $0x6f0] sm:$0xf0]  ;;  %v6887_v34 = vor.u32 %v8964_v21, %v6884_v22 }
 0x10c   :  { %3946 = vmatpush.bf16.msra.mxu1 %v6199_v56  ;;  %v8900_v56 = vld [vmem:[#allocation8 + $0x4a4] sm:$0xf]  ;;  %v7012_v27 = vld [vmem:[#allocation8 + $0x7b0] sm:$0xf0] }
 0x10d   :  { %v8892_v30 = vld [vmem:[#allocation8 + $0x464] sm:$0xf]  ;;  %v6724_v33 = vld [vmem:[#allocation8 + $0x570] sm:$0xf0] }
 0x10e   :  { %3958 = vmatpush.bf16.msra.mxu2 %v6343_v2  ;;  %v6919_v2 = vor.u32 %v8972_v50, %v6916_v52  ;;  %v8960_v39 = vld [vmem:[#allocation8 + $0x684] sm:$0xf]  ;;  %v6996_v44 = vld [vmem:[#allocation8 + $0x790] sm:$0xf0] }
 0x10f   :  { %3971 = vmatpush.bf16.msra.mxu3 %v6471_v4  ;;  %3934 = vmatpush.bf16.msra.mxu0 %v6055_v36  ;;  %v6631_v4 = vor.u32 %v8900_v56, %v6628_v58  ;;  %v8968_v36 = vld [vmem:[#allocation8 + $0x6c4] sm:$0xf]  ;;  %v6580_v46 = vld [vmem:[#allocation8 + $0x450] sm:$0xf0] }
 0x110   :  { %3947 = vmatpush.bf16.msra.mxu1 %v6183_v9  ;;  %v7028_v9 = vld [vmem:[#allocation8 + $0x7d0] sm:$0xf0]  ;;  %v6903_v17 = vor.u32 %v8968_v36, %v6900_v5  ;;  %v8992_v41 = vld [vmem:[#allocation8 + $0x784] sm:$0xf] }
 0x111   :  { %v7031_v18 = vor.u32 %v9000_v6, %v7028_v9  ;;  %v8920_v47 = vld [vmem:[#allocation8 + $0x544] sm:$0xf]  ;;  %v6708_v48 = vld [vmem:[#allocation8 + $0x550] sm:$0xf0]  ;;  %v6999_v50 = vor.u32 %v8992_v41, %v6996_v44 }
 0x112   :  { %3959 = vmatpush.bf16.msra.mxu2 %v6327_v19  ;;  %v6615_v19 = vor.u32 %v8896_v10, %v6612_v11  ;;  %v8956_v53 = vld [vmem:[#allocation8 + $0x664] sm:$0xf]  ;;  %v6711_v56 = vor.u32 %v8920_v47, %v6708_v48  ;;  %v6980_v58 = vld [vmem:[#allocation8 + $0x770] sm:$0xf0] }
 0x113   :  { %3972 = vmatpush.bf16.msra.mxu3 %v6455_v24  ;;  %3935 = vmatpush.bf16.msra.mxu0 %v6039_v25  ;;  %v8996_v24 = vld [vmem:[#allocation8 + $0x7a4] sm:$0xf]  ;;  %v6743_v25 = vor.u32 %v8928_v13, %v6740_v15  ;;  %v6564_v62 = vld [vmem:[#allocation8 + $0x430] sm:$0xf0] }
 0x114   :  { %3948 = vmatpush.bf16.msra.mxu1 %v6167_v31  ;;  %v6596_v31 = vld [vmem:[#allocation8 + $0x470] sm:$0xf0]  ;;  %v8988_v54 = vld [vmem:[#allocation8 + $0x764] sm:$0xf] }
 0x115   :  { %v6599_v38 = vor.u32 %v8892_v30, %v6596_v31  ;;  %v8916_v63 = vld [vmem:[#allocation8 + $0x524] sm:$0xf]  ;;  %v6836_v5 = vld [vmem:[#allocation8 + $0x650] sm:$0xf0] }
 0x116   :  { %3960 = vmatpush.bf16.msra.mxu2 %v6311_v40  ;;  %3936 = vmatmul.bf16.vlgmr.msra.gmra.mxu0 %v9825_v51  ;;  %v6868_v40 = vld [vmem:[#allocation8 + $0x690] sm:$0xf0]  ;;  %v8984_v6 = vld [vmem:[#allocation8 + $0x744] sm:$0xf] }
 0x117   :  { %3980 = vmatpush.bf16.msrb.mxu0 %v6663_v32  ;;  %3973 = vmatpush.bf16.msra.mxu3 %v6439_v45  ;;  %v8924_v32 = vld [vmem:[#allocation8 + $0x564] sm:$0xf]  ;;  %v6548_v11 = vld [vmem:[#allocation8 + $0x410] sm:$0xf0] }
 0x118   :  { %3993 = vmatpush.bf16.msrb.mxu1 %v6791_v23  ;;  %v7015_v23 = vor.u32 %v8996_v24, %v7012_v27  ;;  %v6727_v42 = vor.u32 %v8924_v32, %v6724_v33  ;;  %v8888_v45 = vld [vmem:[#allocation8 + $0x444] sm:$0xf]  ;;  %v6676_v15 = vld [vmem:[#allocation8 + $0x510] sm:$0xf0] }
 0x119   :  { %3949 = vmatmul.bf16.vlgmr.msra.gmra.mxu1 %v9828_v55  ;;  %v6583_v52 = vor.u32 %v8888_v45, %v6580_v46  ;;  %v8880_v10 = vld [vmem:[#allocation8 + $0x404] sm:$0xf]  ;;  %v7300_v22 = vld [vmem:[#allocation8 + $0x9f0] sm:$0xf0] }
 0x11a   :  { %3961 = vmatpush.bf16.msra.mxu2 %v6295_v61  ;;  %v8884_v61 = vld [vmem:[#allocation8 + $0x424] sm:$0xf]  ;;  %v6820_v30 = vld [vmem:[#allocation8 + $0x630] sm:$0xf0] }
 0x11b   :  { %3981 = vmatpush.bf16.msrb.mxu0 %v6647_v49  ;;  %3974 = vmatpush.bf16.msra.mxu3 %v6423_v1  ;;  %v6871_v49 = vor.u32 %v8960_v39, %v6868_v40  ;;  %v6692_v1 = vld [vmem:[#allocation8 + $0x530] sm:$0xf0]  ;;  %v6567_v36 = vor.u32 %v8884_v61, %v6564_v62  ;;  %v8912_v13 = vld [vmem:[#allocation8 + $0x504] sm:$0xf] }
 0x11c   :  { %3994 = vmatpush.bf16.msrb.mxu1 %v6775_v26  ;;  %v6852_v26 = vld [vmem:[#allocation8 + $0x670] sm:$0xf0]  ;;  %v6695_v9 = vor.u32 %v8916_v63, %v6692_v1  ;;  %v9068_v21 = vld [vmem:[#allocation8 + $0x9e4] sm:$0xf]  ;;  %v6679_v31 = vor.u32 %v8912_v13, %v6676_v15  ;;  %v9893_v1 = vld [vmem:[#allocation10] sm:$0xf] }
 0x11d   :  { %3962 = vmatmul.bf16.vlgmr.msra.gmra.mxu2 %v9833_v14  ;;  %v8948_v27 = vld [vmem:[#allocation8 + $0x624] sm:$0xf]  ;;  %v7156_v39 = vld [vmem:[#allocation8 + $0x8d0] sm:$0xf0] }
 0x11e   :  { %4006 = vmatpush.bf16.msrb.mxu2 %v6919_v2  ;;  %3975 = vmatmul.bf16.vlgmr.msra.gmra.mxu3 %v9835_v20  ;;  %v6855_v2 = vor.u32 %v8956_v53, %v6852_v26  ;;  %v8980_v33 = vld [vmem:[#allocation8 + $0x724] sm:$0xf]  ;;  %v6823_v40 = vor.u32 %v8948_v27, %v6820_v30  ;;  %v6804_v46 = vld [vmem:[#allocation8 + $0x610] sm:$0xf0] }
 0x11f   :  { %4019 = vmatpush.bf16.msrb.mxu3 %v7047_v3  ;;  %3982 = vmatpush.bf16.msrb.mxu0 %v6631_v4  ;;  %v8952_v3 = vld [vmem:[#allocation8 + $0x644] sm:$0xf]  ;;  %v6983_v4 = vor.u32 %v8988_v54, %v6980_v58  ;;  %v6932_v48 = vld [vmem:[#allocation8 + $0x710] sm:$0xf0] }
 0x120   :  { %3995 = vmatpush.bf16.msrb.mxu1 %v6759_v8  ;;  %v6964_v8 = vld [vmem:[#allocation8 + $0x750] sm:$0xf0]  ;;  %v9064_v41 = vld [vmem:[#allocation8 + $0x9c4] sm:$0xf] }
 0x121   :  { %v6967_v24 = vor.u32 %v8984_v6, %v6964_v8  ;;  %v8944_v44 = vld [vmem:[#allocation8 + $0x604] sm:$0xf]  ;;  %v7556_v54 = vld [vmem:[#allocation8 + $0xbf0] sm:$0xf0] }
 0x122   :  { %4007 = vmatpush.bf16.msrb.mxu2 %v6903_v17  ;;  %v9036_v17 = vld [vmem:[#allocation8 + $0x8e4] sm:$0xf]  ;;  %v7140_v58 = vld [vmem:[#allocation8 + $0x8b0] sm:$0xf0]  ;;  %v6807_v61 = vor.u32 %v8944_v44, %v6804_v46 }
 0x123   :  { %4020 = vmatpush.bf16.msrb.mxu3 %v7031_v18  ;;  %3983 = vmatpush.bf16.msrb.mxu0 %v6615_v19  ;;  %v7172_v18 = vld [vmem:[#allocation8 + $0x8f0] sm:$0xf0]  ;;  %v6839_v19 = vor.u32 %v8952_v3, %v6836_v5  ;;  %v8976_v47 = vld [vmem:[#allocation8 + $0x704] sm:$0xf] }
 0x124   :  { %3996 = vmatpush.bf16.msrb.mxu1 %v6743_v25  ;;  %v6551_v25 = vor.u32 %v8880_v10, %v6548_v11  ;;  %v7175_v32 = vor.u32 %v9036_v17, %v7172_v18  ;;  %v9132_v53 = vld [vmem:[#allocation8 + $0xbe4] sm:$0xf]  ;;  %v7268_v63 = vld [vmem:[#allocation8 + $0x9b0] sm:$0xf0]  ;;  %v1152_v11 = vperm.slane %v9893_v1, 0 }
 0x125   :  { %v9060_v62 = vld [vmem:[#allocation8 + $0x9a4] sm:$0xf]  ;;  %v7412_v6 = vld [vmem:[#allocation8 + $0xad0] sm:$0xf0] }
 0x126   :  { %4008 = vmatpush.bf16.msrb.mxu2 %v6887_v34  ;;  %v6948_v34 = vld [vmem:[#allocation8 + $0x730] sm:$0xf0]  ;;  %v9128_v8 = vld [vmem:[#allocation8 + $0xbc4] sm:$0xf]  ;;  %v7271_v10 = vor.u32 %v9060_v62, %v7268_v63 }
 0x127   :  { %4021 = vmatpush.bf16.msrb.mxu3 %v7015_v23  ;;  %3984 = vmatpush.bf16.msrb.mxu0 %v6599_v38  ;;  %v7303_v23 = vor.u32 %v9068_v21, %v7300_v22  ;;  %v9032_v38 = vld [vmem:[#allocation8 + $0x8c4] sm:$0xf]  ;;  %v6951_v45 = vor.u32 %v8980_v33, %v6948_v34  ;;  %v7124_v15 = vld [vmem:[#allocation8 + $0x890] sm:$0xf0] }
 0x128   :  { %3997 = vmatpush.bf16.msrb.mxu1 %v6727_v42  ;;  %v7284_v42 = vld [vmem:[#allocation8 + $0x9d0] sm:$0xf0]  ;;  %v9024_v13 = vld [vmem:[#allocation8 + $0x884] sm:$0xf] }
 0x129   :  { %v7287_v26 = vor.u32 %v9064_v41, %v7284_v42  ;;  %v9056_v17 = vld [vmem:[#allocation8 + $0x984] sm:$0xf]  ;;  %v7252_v18 = vld [vmem:[#allocation8 + $0x990] sm:$0xf0] }
 0x12a   :  { %4009 = vmatpush.bf16.msrb.mxu2 %v6871_v49  ;;  %v7159_v49 = vor.u32 %v9032_v38, %v7156_v39  ;;  %v7396_v27 = vld [vmem:[#allocation8 + $0xab0] sm:$0xf0]  ;;  %v9124_v30 = vld [vmem:[#allocation8 + $0xba4] sm:$0xf]  ;;  %v7255_v33 = vor.u32 %v9056_v17, %v7252_v18 }
 0x12b   :  { %4022 = vmatpush.bf16.msrb.mxu3 %v6999_v50  ;;  %3985 = vmatpush.bf16.msrb.mxu0 %v6583_v52  ;;  %v9100_v50 = vld [vmem:[#allocation8 + $0xae4] sm:$0xf]  ;;  %v7428_v52 = vld [vmem:[#allocation8 + $0xaf0] sm:$0xf0] }
 0x12c   :  { %3998 = vmatpush.bf16.msrb.mxu1 %v6711_v56  ;;  %v9028_v56 = vld [vmem:[#allocation8 + $0x8a4] sm:$0xf]  ;;  %v7431_v3 = vor.u32 %v9100_v50, %v7428_v52  ;;  %v7524_v34 = vld [vmem:[#allocation8 + $0xbb0] sm:$0xf0] }
 0x12d   :  { %v7143_v5 = vor.u32 %v9028_v56, %v7140_v58  ;;  %v7108_v38 = vld [vmem:[#allocation8 + $0x870] sm:$0xf0]  ;;  %v9052_v39 = vld [vmem:[#allocation8 + $0x964] sm:$0xf]  ;;  %v7527_v44 = vor.u32 %v9124_v30, %v7524_v34 }
 0x12e   :  { %4010 = vmatpush.bf16.msrb.mxu2 %v6855_v2  ;;  %v6935_v2 = vor.u32 %v8976_v47, %v6932_v48  ;;  %v9088_v46 = vld [vmem:[#allocation8 + $0xa84] sm:$0xf]  ;;  %v7380_v47 = vld [vmem:[#allocation8 + $0xa90] sm:$0xf0] }
 0x12f   :  { %4023 = vmatpush.bf16.msrb.mxu3 %v6983_v4  ;;  %3986 = vmatpush.bf16.msrb.mxu0 %v6567_v36  ;;  %v9096_v4 = vld [vmem:[#allocation8 + $0xac4] sm:$0xf]  ;;  %v7559_v36 = vor.u32 %v9132_v53, %v7556_v54  ;;  %v7508_v50 = vld [vmem:[#allocation8 + $0xb90] sm:$0xf0]  ;;  %v7383_v56 = vor.u32 %v9088_v46, %v7380_v47 }
 0x130   :  { %3999 = vmatpush.bf16.msrb.mxu1 %v6695_v9  ;;  %v7540_v9 = vld [vmem:[#allocation8 + $0xbd0] sm:$0xf0]  ;;  %v9120_v48 = vld [vmem:[#allocation8 + $0xb84] sm:$0xf] }
 0x131   :  { %v7543_v22 = vor.u32 %v9128_v8, %v7540_v9  ;;  %v9016_v52 = vld [vmem:[#allocation8 + $0x844] sm:$0xf]  ;;  %v7092_v53 = vld [vmem:[#allocation8 + $0x850] sm:$0xf0] }
 0x132   :  { %4011 = vmatpush.bf16.msrb.mxu2 %v6839_v19  ;;  %v7415_v19 = vor.u32 %v9096_v4, %v7412_v6  ;;  %v7220_v54 = vld [vmem:[#allocation8 + $0x950] sm:$0xf0]  ;;  %v7095_v62 = vor.u32 %v9016_v52, %v7092_v53  ;;  %v9084_v63 = vld [vmem:[#allocation8 + $0xa64] sm:$0xf] }
 0x133   :  { %4024 = vmatpush.bf16.msrb.mxu3 %v6967_v24  ;;  %3987 = vmatpush.bf16.msrb.mxu0 %v6551_v25  ;;  %v3729_v21 = vpop.f32.mrf.mxu0  ;;  %v7127_v24 = vor.u32 %v9024_v13, %v7124_v15  ;;  %v9092_v25 = vld [vmem:[#allocation8 + $0xaa4] sm:$0xf]  ;;  %v7076_v8 = vld [vmem:[#allocation8 + $0x830] sm:$0xf0] }
 0x134   :  { %4000 = vmatpush.bf16.msrb.mxu1 %v6679_v31  ;;  %v3730_v31 = vadd.f32 %v3729_v21, %v1152_v11  ;;  %v7399_v42 = vor.u32 %v9092_v25, %v7396_v27  ;;  %v9012_v6 = vld [vmem:[#allocation8 + $0x824] sm:$0xf]  ;;  %v7348_v18 = vld [vmem:[#allocation8 + $0xa50] sm:$0xf0] }
 0x135   :  { %v9044_v9 = vld [vmem:[#allocation8 + $0x924] sm:$0xf]  ;;  %v7079_v17 = vor.u32 %v9012_v6, %v7076_v8  ;;  %v7476_v21 = vld [vmem:[#allocation8 + $0xb50] sm:$0xf0] }
 0x136   :  { %4012 = vmatpush.bf16.msrb.mxu2 %v6823_v40  ;;  %3988 = vmatmul.bf16.vlgmr.msrb.gmra.mxu0 %v9842_v59  ;;  %v7236_v40 = vld [vmem:[#allocation8 + $0x970] sm:$0xf0]  ;;  %v9080_v13 = vld [vmem:[#allocation8 + $0xa44] sm:$0xf] }
 0x137   :  { %4032 = vmatpush.bf16.msra.mxu0 %v7175_v32  ;;  %4025 = vmatpush.bf16.msrb.mxu3 %v6951_v45  ;;  %v3742_v32 = vpop.f32.mrf.mxu1  ;;  %v9008_v25 = vld [vmem:[#allocation8 + $0x804] sm:$0xf]  ;;  %v7060_v27 = vld [vmem:[#allocation8 + $0x810] sm:$0xf0] }
 0x138   :  { %4045 = vmatpush.bf16.msra.mxu1 %v7303_v23  ;;  %v9020_v23 = vld [vmem:[#allocation8 + $0x864] sm:$0xf]  ;;  %v3743_v41 = vadd.f32 %v3742_v32, %v3730_v31  ;;  %v7063_v46 = vor.u32 %v9008_v25, %v7060_v27  ;;  %v7460_v52 = vld [vmem:[#allocation8 + $0xb30] sm:$0xf0] }
 0x139   :  { %4001 = vmatmul.bf16.vlgmr.msrb.gmra.mxu1 %v9844_v0  ;;  %v7111_v45 = vor.u32 %v9020_v23, %v7108_v38  ;;  %v9040_v30 = vld [vmem:[#allocation8 + $0x904] sm:$0xf]  ;;  %v7684_v23 = vld [vmem:[#allocation8 + $0xcf0] sm:$0xf0]  ;;  %v7351_v38 = vor.u32 %v9080_v13, %v7348_v18 }
 0x13a   :  { %4013 = vmatpush.bf16.msrb.mxu2 %v6807_v61  ;;  %v7511_v61 = vor.u32 %v9120_v48, %v7508_v50  ;;  %v9164_v34 = vld [vmem:[#allocation8 + $0xce4] sm:$0xf]  ;;  %v7332_v48 = vld [vmem:[#allocation8 + $0xa30] sm:$0xf0] }
 0x13b   :  { %4033 = vmatpush.bf16.msra.mxu0 %v7159_v49  ;;  %4026 = vmatpush.bf16.msrb.mxu3 %v6935_v2  ;;  %v7239_v49 = vor.u32 %v9052_v39, %v7236_v40  ;;  %v3731_v58 = vpop.f32.mrf.mxu0  ;;  %v7364_v2 = vld [vmem:[#allocation8 + $0xa70] sm:$0xf0]  ;;  %v9196_v39 = vld [vmem:[#allocation8 + $0xde4] sm:$0xf]  ;;  %v7687_v50 = vor.u32 %v9164_v34, %v7684_v23 }
 0x13c   :  { %4046 = vmatpush.bf16.msra.mxu1 %v7287_v26  ;;  %v9048_v26 = vld [vmem:[#allocation8 + $0x944] sm:$0xf]  ;;  %v7367_v11 = vor.u32 %v9084_v63, %v7364_v2  ;;  %v7812_v40 = vld [vmem:[#allocation8 + $0xdf0] sm:$0xf0] }
 0x13d   :  { %4014 = vmatmul.bf16.vlgmr.msrb.gmra.mxu2 %v9850_v29  ;;  %v9076_v47 = vld [vmem:[#allocation8 + $0xa24] sm:$0xf]  ;;  %v7796_v63 = vld [vmem:[#allocation8 + $0xdd0] sm:$0xf0] }
 0x13e   :  { %4058 = vmatpush.bf16.msra.mxu2 %v7431_v3  ;;  %4027 = vmatmul.bf16.vlgmr.msrb.gmra.mxu3 %v9852_v35  ;;  %v9116_v3 = vld [vmem:[#allocation8 + $0xb64] sm:$0xf]  ;;  %v7444_v6 = vld [vmem:[#allocation8 + $0xb10] sm:$0xf0] }
 0x13f   :  { %4071 = vmatpush.bf16.msra.mxu3 %v7559_v36  ;;  %4034 = vmatpush.bf16.msra.mxu0 %v7143_v5  ;;  %v3744_v4 = vpop.f32.mrf.mxu1  ;;  %v7223_v36 = vor.u32 %v9048_v26, %v7220_v54  ;;  %v7492_v5 = vld [vmem:[#allocation8 + $0xb70] sm:$0xf0]  ;;  %v7815_v26 = vor.u32 %v9196_v39, %v7812_v40  ;;  %v9160_v54 = vld [vmem:[#allocation8 + $0xcc4] sm:$0xf] }
 0x140   :  { %4047 = vmatpush.bf16.msra.mxu1 %v7271_v10  ;;  %v7204_v10 = vld [vmem:[#allocation8 + $0x930] sm:$0xf0]  ;;  %v7495_v15 = vor.u32 %v9116_v3, %v7492_v5  ;;  %v9072_v2 = vld [vmem:[#allocation8 + $0xa04] sm:$0xf] }
 0x141   :  { %v3768_v32 = vpop.f32.mrf.mxu3  ;;  %v9104_v5 = vld [vmem:[#allocation8 + $0xb04] sm:$0xf]  ;;  %v8068_v18 = vld [vmem:[#allocation8 + $0xff0] sm:$0xf0] }
 0x142   :  { %4059 = vmatpush.bf16.msra.mxu2 %v7415_v19  ;;  %v9112_v19 = vld [vmem:[#allocation8 + $0xb44] sm:$0xf]  ;;  %v7780_v25 = vld [vmem:[#allocation8 + $0xdb0] sm:$0xf0] }
 0x143   :  { %4072 = vmatpush.bf16.msra.mxu3 %v7543_v22  ;;  %4035 = vmatpush.bf16.msra.mxu0 %v7127_v24  ;;  %v3755_v22 = vpop.f32.mrf.mxu2  ;;  %v7207_v24 = vor.u32 %v9044_v9, %v7204_v10  ;;  %v9228_v10 = vld [vmem:[#allocation8 + $0xee4] sm:$0xf]  ;;  %v7924_v23 = vld [vmem:[#allocation8 + $0xed0] sm:$0xf0] }
 0x144   :  { %4048 = vmatpush.bf16.msra.mxu1 %v7255_v33  ;;  %v3756_v31 = vadd.f32 %v3755_v22, %v3743_v41  ;;  %v7188_v33 = vld [vmem:[#allocation8 + $0x910] sm:$0xf0]  ;;  %v9108_v41 = vld [vmem:[#allocation8 + $0xb24] sm:$0xf] }
 0x145   :  { %v7463_v4 = vor.u32 %v9108_v41, %v7460_v52  ;;  %v9260_v13 = vld [vmem:[#allocation8 + $0xfe4] sm:$0xf]  ;;  %v8052_v40 = vld [vmem:[#allocation8 + $0xfd0] sm:$0xf0] }
 0x146   :  { %4060 = vmatpush.bf16.msra.mxu2 %v7399_v42  ;;  %v3769_v42 = vadd.f32 %v3768_v32, %v3756_v31  ;;  %v8071_v32 = vor.u32 %v9260_v13, %v8068_v18  ;;  %v9224_v34 = vld [vmem:[#allocation8 + $0xec4] sm:$0xf] }
 0x147   :  { %4073 = vmatpush.bf16.msra.mxu3 %v7527_v44  ;;  %4036 = vmatpush.bf16.msra.mxu0 %v7111_v45  ;;  %v3781_v44 = vpop.f32.mrf.mxu0  ;;  %v7479_v45 = vor.u32 %v9112_v19, %v7476_v21  ;;  %v3794_v58 = vpop.f32.mrf.mxu1  ;;  %v9156_v19 = vld [vmem:[#allocation8 + $0xca4] sm:$0xf]  ;;  %v7652_v21 = vld [vmem:[#allocation8 + $0xcb0] sm:$0xf0] }
 0x148   :  { %4049 = vmatpush.bf16.msra.mxu1 %v7239_v49  ;;  %v7191_v49 = vor.u32 %v9040_v30, %v7188_v33  ;;  %v3782_v53 = vadd.f32 %v3781_v44, %v3769_v42  ;;  %v7447_v30 = vor.u32 %v9104_v5, %v7444_v6  ;;  %v7655_v33 = vor.u32 %v9156_v19, %v7652_v21  ;;  %v9152_v42 = vld [vmem:[#allocation8 + $0xc84] sm:$0xf]  ;;  %v7636_v44 = vld [vmem:[#allocation8 + $0xc90] sm:$0xf0] }
 0x149   :  { %v7639_v41 = vor.u32 %v9152_v42, %v7636_v44  ;;  %v9220_v52 = vld [vmem:[#allocation8 + $0xea4] sm:$0xf]  ;;  %v7604_v19 = vld [vmem:[#allocation8 + $0xc50] sm:$0xf0] }
 0x14a   :  { %4061 = vmatpush.bf16.msra.mxu2 %v7383_v56  ;;  %v7668_v56 = vld [vmem:[#allocation8 + $0xcd0] sm:$0xf0]  ;;  %v3795_v3 = vadd.f32 %v3794_v58, %v3782_v53  ;;  %v9144_v18 = vld [vmem:[#allocation8 + $0xc44] sm:$0xf] }
 0x14b   :  { %4074 = vmatpush.bf16.msra.mxu3 %v7511_v61  ;;  %4037 = vmatpush.bf16.msra.mxu0 %v7095_v62  ;;  %v7335_v61 = vor.u32 %v9076_v47, %v7332_v48  ;;  %v9192_v62 = vld [vmem:[#allocation8 + $0xdc4] sm:$0xf]  ;;  %v3757_v8 = vpop.f32.mrf.mxu2  ;;  %v7671_v9 = vor.u32 %v9160_v54, %v7668_v56  ;;  %v7764_v47 = vld [vmem:[#allocation8 + $0xd90] sm:$0xf0]  ;;  %v7927_v48 = vor.u32 %v9224_v34, %v7924_v23 }
 0x14c   :  { %4050 = vmatpush.bf16.msra.mxu1 %v7223_v36  ;;  %v7316_v36 = vld [vmem:[#allocation8 + $0xa10] sm:$0xf0]  ;;  %v9176_v21 = vld [vmem:[#allocation8 + $0xd44] sm:$0xf] }
 0x14d   :  { %v7319_v22 = vor.u32 %v9072_v2, %v7316_v36  ;;  %v7908_v53 = vld [vmem:[#allocation8 + $0xeb0] sm:$0xf0]  ;;  %v9180_v2 = vld [vmem:[#allocation8 + $0xd64] sm:$0xf] }
 0x14e   :  { %4062 = vmatpush.bf16.msra.mxu2 %v7367_v11  ;;  %v7940_v11 = vld [vmem:[#allocation8 + $0xef0] sm:$0xf0]  ;;  %v7911_v6 = vor.u32 %v9220_v52, %v7908_v53  ;;  %v9244_v23 = vld [vmem:[#allocation8 + $0xf64] sm:$0xf] }
 0x14f   :  { %4075 = vmatpush.bf16.msra.mxu3 %v7495_v15  ;;  %4038 = vmatpush.bf16.msra.mxu0 %v7079_v17  ;;  %v3770_v15 = vpop.f32.mrf.mxu3  ;;  %v7799_v17 = vor.u32 %v9192_v62, %v7796_v63  ;;  %v3783_v27 = vpop.f32.mrf.mxu0  ;;  %v7943_v31 = vor.u32 %v9228_v10, %v7940_v11  ;;  %v9148_v62 = vld [vmem:[#allocation8 + $0xc64] sm:$0xf]  ;;  %v7620_v63 = vld [vmem:[#allocation8 + $0xc70] sm:$0xf0] }
 0x150   :  { %4051 = vmatpush.bf16.msra.mxu1 %v7207_v24  ;;  %v9188_v24 = vld [vmem:[#allocation8 + $0xda4] sm:$0xf]  ;;  %v7892_v10 = vld [vmem:[#allocation8 + $0xe90] sm:$0xf0] }
 0x151   :  { %v7783_v39 = vor.u32 %v9188_v24, %v7780_v25  ;;  %v9248_v11 = vld [vmem:[#allocation8 + $0xf84] sm:$0xf]  ;;  %v7876_v34 = vld [vmem:[#allocation8 + $0xe70] sm:$0xf0] }
 0x152   :  { %4063 = vmatpush.bf16.msra.mxu2 %v7351_v38  ;;  %v9256_v38 = vld [vmem:[#allocation8 + $0xfc4] sm:$0xf]  ;;  %v7588_v44 = vld [vmem:[#allocation8 + $0xc30] sm:$0xf0] }
 0x153   :  { %4076 = vmatpush.bf16.msra.mxu3 %v7479_v45  ;;  %4039 = vmatpush.bf16.msra.mxu0 %v7063_v46  ;;  %v3796_v45 = vpop.f32.mrf.mxu1  ;;  %v9184_v46 = vld [vmem:[#allocation8 + $0xd84] sm:$0xf]  ;;  %v7860_v52 = vld [vmem:[#allocation8 + $0xe50] sm:$0xf0] }
 0x154   :  { %4052 = vmatpush.bf16.msra.mxu1 %v7191_v49  ;;  %v3807_v49 = vpop.f32.mrf.mxu2  ;;  %v7767_v58 = vor.u32 %v9184_v46, %v7764_v47  ;;  %v9140_v42 = vld [vmem:[#allocation8 + $0xc24] sm:$0xf]  ;;  %v7716_v46 = vld [vmem:[#allocation8 + $0xd30] sm:$0xf0] }
 0x155   :  { %v3808_v54 = vadd.f32 %v3807_v49, %v3795_v3  ;;  %v7623_v3 = vor.u32 %v9148_v62, %v7620_v63  ;;  %v9172_v45 = vld [vmem:[#allocation8 + $0xd24] sm:$0xf]  ;;  %v7700_v62 = vld [vmem:[#allocation8 + $0xd10] sm:$0xf0]  ;;  %v6154_v63 = vld [vmem:[#allocation8 + $0xe8] sm:$0xf] }
 0x156   :  { %4064 = vmatpush.bf16.msra.mxu2 %v7335_v61  ;;  %4040 = vmatmul.bf16.vlgmr.msra.gmra.mxu0 %v9860_v16  ;;  %v8036_v61 = vld [vmem:[#allocation8 + $0xfb0] sm:$0xf0]  ;;  %v9240_v53 = vld [vmem:[#allocation8 + $0xf44] sm:$0xf] }
 0x157   :  { %4084 = vmatpush.bf16.msrb.mxu0 %v7687_v50  ;;  %4077 = vmatpush.bf16.msra.mxu3 %v7463_v4  ;;  %v8055_v50 = vor.u32 %v9256_v38, %v8052_v40  ;;  %v3820_v56 = vpop.f32.mrf.mxu3  ;;  %v7748_v4 = vld [vmem:[#allocation8 + $0xd70] sm:$0xf0]  ;;  %v3833_v5 = vpop.f32.mrf.mxu0 }
 0x158   :  { %4097 = vmatpush.bf16.msrb.mxu1 %v7815_v26  ;;  %v9252_v26 = vld [vmem:[#allocation8 + $0xfa4] sm:$0xf]  ;;  %v3821_v36 = vadd.f32 %v3820_v56, %v3808_v54  ;;  %v7751_v15 = vor.u32 %v9180_v2, %v7748_v4  ;;  %v8004_v40 = vld [vmem:[#allocation8 + $0xf70] sm:$0xf0]  ;;  %v7719_v54 = vor.u32 %v9172_v45, %v7716_v46  ;;  %v8783_v2 = vld [vmem:[#allocation8 + $0xf4] sm:$0xf0] }
 0x159   :  { %4053 = vmatmul.bf16.vlgmr.msra.gmra.mxu1 %v9862_v28  ;;  %v8039_v8 = vor.u32 %v9252_v26, %v8036_v61  ;;  %v7988_v26 = vld [vmem:[#allocation8 + $0xf50] sm:$0xf0]  ;;  %v9136_v56 = vld [vmem:[#allocation8 + $0xc04] sm:$0xf]  ;;  %v6538_v45 = vld [vmem:[#allocation8 + $0x3e8] sm:$0xf] }
 0x15a   :  { %4065 = vmatpush.bf16.msra.mxu2 %v7319_v22  ;;  %v3834_v13 = vadd.f32 %v3833_v5, %v3821_v36  ;;  %v7732_v22 = vld [vmem:[#allocation8 + $0xd50] sm:$0xf0]  ;;  %v9168_v61 = vld [vmem:[#allocation8 + $0xd04] sm:$0xf]  ;;  %v6282_v36 = vld [vmem:[#allocation8 + $0x1e8] sm:$0xf] }
 0x15b   :  { %4085 = vmatpush.bf16.msrb.mxu0 %v7671_v9  ;;  %4078 = vmatpush.bf16.msra.mxu3 %v7447_v30  ;;  %v9216_v9 = vld [vmem:[#allocation8 + $0xe84] sm:$0xf]  ;;  %v3846_v24 = vpop.f32.mrf.mxu1  ;;  %v8815_v5 = vld [vmem:[#allocation8 + $0x1f4] sm:$0xf0] }
 0x15c   :  { %4098 = vmatpush.bf16.msrb.mxu1 %v7799_v17  ;;  %v8020_v17 = vld [vmem:[#allocation8 + $0xf90] sm:$0xf0]  ;;  %v7895_v25 = vor.u32 %v9216_v9, %v7892_v10  ;;  %v3847_v27 = vadd.f32 %v3846_v24, %v3834_v13  ;;  %v3809_v30 = vpop.f32.mrf.mxu2  ;;  %v9204_v10 = vld [vmem:[#allocation8 + $0xe24] sm:$0xf]  ;;  %v6138_v24 = vld [vmem:[#allocation8 + $0xc8] sm:$0xf] }
 0x15d   :  { %4066 = vmatmul.bf16.vlgmr.msra.gmra.mxu2 %v9866_v57 }
 0x15e   :  { %4110 = vmatpush.bf16.msrb.mxu2 %v7943_v31  ;;  %4079 = vmatmul.bf16.vlgmr.msra.gmra.mxu3 %v9868_v60  ;;  %v8023_v31 = vor.u32 %v9248_v11, %v8020_v17  ;;  %v7844_v11 = vld [vmem:[#allocation8 + $0xe30] sm:$0xf0]  ;;  %v7703_v17 = vor.u32 %v9168_v61, %v7700_v62  ;;  %v6394_v61 = vld [vmem:[#allocation8 + $0x2c8] sm:$0xf]  ;;  %v8843_v62 = vld [vmem:[#allocation8 + $0x2d4] sm:$0xf0] }
 0x15f   :  { %4123 = vmatpush.bf16.msrb.mxu3 %v8071_v32  ;;  %4086 = vmatpush.bf16.msrb.mxu0 %v7655_v33  ;;  %v7607_v32 = vor.u32 %v9144_v18, %v7604_v19  ;;  %v9212_v33 = vld [vmem:[#allocation8 + $0xe64] sm:$0xf]  ;;  %v3822_v38 = vpop.f32.mrf.mxu3  ;;  %v3835_v49 = vpop.f32.mrf.mxu0  ;;  %v6155_v18 = vor.u32 %v8783_v2, %v6154_v63  ;;  %v6522_v63 = vld [vmem:[#allocation8 + $0x3c8] sm:$0xf] }
 0x160   :  { %4099 = vmatpush.bf16.msrb.mxu1 %v7783_v39  ;;  %v7735_v39 = vor.u32 %v9176_v21, %v7732_v22  ;;  %v7879_v47 = vor.u32 %v9212_v33, %v7876_v34  ;;  %v9236_v19 = vld [vmem:[#allocation8 + $0xf24] sm:$0xf]  ;;  %v7972_v21 = vld [vmem:[#allocation8 + $0xf30] sm:$0xf0]  ;;  %v6283_v22 = vor.u32 %v8815_v5, %v6282_v36  ;;  %v8811_v33 = vld [vmem:[#allocation8 + $0x1d4] sm:$0xf0] }
 0x161   :  { %v9200_v34 = vld [vmem:[#allocation8 + $0xe04] sm:$0xf]  ;;  %v8775_v49 = vld [vmem:[#allocation8 + $0xb4] sm:$0xf0]  ;;  %v6106_v5 = vld [vmem:[#allocation8 + $0x88] sm:$0xf] }
 0x162   :  { %4111 = vmatpush.bf16.msrb.mxu2 %v7927_v48  ;;  %v9208_v48 = vld [vmem:[#allocation8 + $0xe44] sm:$0xf]  ;;  %v8875_v36 = vld [vmem:[#allocation8 + $0x3d4] sm:$0xf0] }
 0x163   :  { %4124 = vmatpush.bf16.msrb.mxu3 %v8055_v50  ;;  %4087 = vmatpush.bf16.msrb.mxu0 %v7639_v41  ;;  %v8007_v50 = vor.u32 %v9244_v23, %v8004_v40  ;;  %v7591_v41 = vor.u32 %v9140_v42, %v7588_v44  ;;  %v7863_v4 = vor.u32 %v9208_v48, %v7860_v52  ;;  %v9232_v38 = vld [vmem:[#allocation8 + $0xf04] sm:$0xf]  ;;  %v6410_v42 = vld [vmem:[#allocation8 + $0x2e8] sm:$0xf]  ;;  %v8847_v44 = vld [vmem:[#allocation8 + $0x2f4] sm:$0xf0] }
 0x164   :  { %4100 = vmatpush.bf16.msrb.mxu1 %v7767_v58  ;;  %v7572_v58 = vld [vmem:[#allocation8 + $0xc10] sm:$0xf0]  ;;  %v7975_v23 = vor.u32 %v9236_v19, %v7972_v21  ;;  %v6122_v48 = vld [vmem:[#allocation8 + $0xa8] sm:$0xf]  ;;  %v8807_v52 = vld [vmem:[#allocation8 + $0x1b4] sm:$0xf0] }
 0x165   :  { %v7575_v9 = vor.u32 %v9136_v56, %v7572_v58  ;;  %v6123_v58 = vor.u32 %v8775_v49, %v6122_v48  ;;  %v8871_v19 = vld [vmem:[#allocation8 + $0x3b4] sm:$0xf0]  ;;  %v6090_v21 = vld [vmem:[#allocation8 + $0x68] sm:$0xf] }
 0x166   :  { %4112 = vmatpush.bf16.msrb.mxu2 %v7911_v6  ;;  %v3848_v6 = vpop.f32.mrf.mxu1  ;;  %v6202_v48 = vld [vmem:[#allocation8 + $0x148] sm:$0xf]  ;;  %v8795_v49 = vld [vmem:[#allocation8 + $0x154] sm:$0xf0] }
 0x167   :  { %4125 = vmatpush.bf16.msrb.mxu3 %v8039_v8  ;;  %4088 = vmatpush.bf16.msrb.mxu0 %v7623_v3  ;;  %v3859_v8 = vpop.f32.mrf.mxu2  ;;  %v7991_v3 = vor.u32 %v9240_v53, %v7988_v26  ;;  %v6411_v26 = vor.u32 %v8847_v44, %v6410_v42  ;;  %v8771_v6 = vld [vmem:[#allocation8 + $0x94] sm:$0xf0] }
 0x168   :  { %4101 = vmatpush.bf16.msrb.mxu1 %v7751_v15  ;;  %v3860_v13 = vadd.f32 %v3859_v8, %v3847_v27  ;;  %v3872_v15 = vpop.f32.mrf.mxu3  ;;  %v7828_v27 = vld [vmem:[#allocation8 + $0xe10] sm:$0xf0]  ;;  %v6234_v8 = vld [vmem:[#allocation8 + $0x188] sm:$0xf]  ;;  %v8867_v44 = vld [vmem:[#allocation8 + $0x394] sm:$0xf0] }
 0x16a   :  { %4113 = vmatpush.bf16.msrb.mxu2 %v7895_v25  ;;  %v8779_v25 = vld [vmem:[#allocation8 + $0xd4] sm:$0xf0]  ;;  %v9903_v30 = vadd.f32 %v3872_v15, %v3860_v13  ;;  %v6378_v13 = vld [vmem:[#allocation8 + $0x2a8] sm:$0xf] }
 0x16b   :  { %4126 = vmatpush.bf16.msrb.mxu3 %v8023_v31  ;;  %4089 = vmatpush.bf16.msrb.mxu0 %v7607_v32  ;;  %v7847_v31 = vor.u32 %v9204_v10, %v7844_v11  ;;  %v6266_v32 = vld [vmem:[#allocation8 + $0x1c8] sm:$0xf]  ;;  %v6139_v40 = vor.u32 %v8779_v25, %v6138_v24  ;;  %v6523_v10 = vor.u32 %v8875_v36, %v6522_v63  ;;  %v8839_v15 = vld [vmem:[#allocation8 + $0x2b4] sm:$0xf0] }
 0x16c   :  { %4102 = vmatpush.bf16.msrb.mxu1 %v7735_v39  ;;  %v7956_v39 = vld [vmem:[#allocation8 + $0xf10] sm:$0xf0]  ;;  %v6267_v46 = vor.u32 %v8811_v33, %v6266_v32  ;;  %v6107_v11 = vor.u32 %v8771_v6, %v6106_v5  ;;  %v6218_v24 = vld [vmem:[#allocation8 + $0x168] sm:$0xf]  ;;  %v8799_v25 = vld [vmem:[#allocation8 + $0x174] sm:$0xf0]  ;;  %v6379_v32 = vor.u32 %v8839_v15, %v6378_v13 }
 0x16d   :  { %v7959_v53 = vor.u32 %v9232_v38, %v7956_v39  ;;  %v6362_v38 = vld [vmem:[#allocation8 + $0x288] sm:$0xf]  ;;  %v8835_v39 = vld [vmem:[#allocation8 + $0x294] sm:$0xf0]  ;;  %v6219_v42 = vor.u32 %v8799_v25, %v6218_v24 }
 0x16e   :  { %4114 = vmatpush.bf16.msrb.mxu2 %v7879_v47  ;;  %v8879_v47 = vld [vmem:[#allocation8 + $0x3f4] sm:$0xf0]  ;;  %v6042_v13 = vld [vmem:[#allocation8 + $0x8] sm:$0xf] }
 0x16f   :  { %4127 = vmatpush.bf16.msrb.mxu3 %v8007_v50  ;;  %4090 = vmatpush.bf16.msrb.mxu0 %v7591_v41  ;;  %v7831_v50 = vor.u32 %v9200_v34, %v7828_v27  ;;  %v6250_v41 = vld [vmem:[#allocation8 + $0x1a8] sm:$0xf]  ;;  %v6539_v56 = vor.u32 %v8879_v47, %v6538_v45  ;;  %v8791_v63 = vld [vmem:[#allocation8 + $0x134] sm:$0xf0] }
 0x170   :  { %4103 = vmatpush.bf16.msrb.mxu1 %v7719_v54  ;;  %v3861_v54 = vpop.f32.mrf.mxu2  ;;  %v3874_v2 = vpop.f32.mrf.mxu3  ;;  %v6074_v45 = vld [vmem:[#allocation8 + $0x48] sm:$0xf]  ;;  %v8755_v15 = vld [vmem:[#allocation8 + $0x14] sm:$0xf0] }
 0x171   :  { %v6203_v54 = vor.u32 %v8795_v49, %v6202_v48  ;;  %v6794_v24 = vld [vmem:[#allocation8 + $0x5e8] sm:$0xf]  ;;  %v8943_v25 = vld [vmem:[#allocation8 + $0x5f4] sm:$0xf0] }
 0x172   :  { %4115 = vmatpush.bf16.msrb.mxu2 %v7863_v4  ;;  %v6251_v4 = vor.u32 %v8807_v52, %v6250_v41  ;;  %v6346_v52 = vld [vmem:[#allocation8 + $0x268] sm:$0xf]  ;;  %v8907_v48 = vld [vmem:[#allocation8 + $0x4d4] sm:$0xf0] }
 0x173   :  { %4128 = vmatpush.bf16.msrb.mxu3 %v7991_v3  ;;  %4091 = vmatpush.bf16.msrb.mxu0 %v7575_v9  ;;  %v8803_v3 = vld [vmem:[#allocation8 + $0x194] sm:$0xf0]  ;;  %v6395_v9 = vor.u32 %v8843_v62, %v6394_v61  ;;  %v6186_v62 = vld [vmem:[#allocation8 + $0x128] sm:$0xf] }
 0x174   :  { %4104 = vmatpush.bf16.msrb.mxu1 %v7703_v17  ;;  %v6506_v17 = vld [vmem:[#allocation8 + $0x3a8] sm:$0xf]  ;;  %v8759_v61 = vld [vmem:[#allocation8 + $0x34] sm:$0xf0] }
 0x176   :  { %4116 = vmatpush.bf16.msrb.mxu2 %v7847_v31  ;;  %4092 = vmatmul.bf16.vlgmr.msrb.gmra.mxu0 %v9876_v37  ;;  %v3885_v31 = vpop.f32.mrf.mxu0  ;;  %v3898_v34 = vpop.f32.mrf.mxu1 }
 0x177   :  { %4136 = vmatpush.bf16.msra.mxu0 %v6155_v18  ;;  %4129 = vmatpush.bf16.msrb.mxu3 %v7975_v23  ;;  %v6235_v18 = vor.u32 %v8803_v3, %v6234_v8  ;;  %v3886_v33 = vadd.f32 %v3885_v31, %v9903_v30  ;;  %v6507_v23 = vor.u32 %v8871_v19, %v6506_v17  ;;  %v8827_v8 = vld [vmem:[#allocation8 + $0x254] sm:$0xf0]  ;;  %v6458_v3 = vld [vmem:[#allocation8 + $0x348] sm:$0xf] }
 0x178   :  { %4149 = vmatpush.bf16.msra.mxu1 %v6283_v22  ;;  %v8767_v22 = vld [vmem:[#allocation8 + $0x74] sm:$0xf0]  ;;  %v6170_v17 = vld [vmem:[#allocation8 + $0x108] sm:$0xf] }
 0x179   :  { %4105 = vmatmul.bf16.vlgmr.msrb.gmra.mxu1 %v9878_v43  ;;  %v6091_v27 = vor.u32 %v8767_v22, %v6090_v21  ;;  %v3899_v47 = vadd.f32 %v3898_v34, %v3886_v33  ;;  %v6666_v19 = vld [vmem:[#allocation8 + $0x4e8] sm:$0xf]  ;;  %v8911_v21 = vld [vmem:[#allocation8 + $0x4f4] sm:$0xf0]  ;;  %v6043_v33 = vor.u32 %v8755_v15, %v6042_v13 }
 0x17a   :  { %4117 = vmatpush.bf16.msrb.mxu2 %v7831_v50  ;;  %v6363_v50 = vor.u32 %v8835_v39, %v6362_v38  ;;  %v6314_v34 = vld [vmem:[#allocation8 + $0x228] sm:$0xf] }
 0x17b   :  { %4137 = vmatpush.bf16.msra.mxu0 %v6139_v40  ;;  %4130 = vmatpush.bf16.msrb.mxu3 %v7959_v53  ;;  %v6490_v40 = vld [vmem:[#allocation8 + $0x388] sm:$0xf]  ;;  %v8831_v53 = vld [vmem:[#allocation8 + $0x274] sm:$0xf0] }
 0x17c   :  { %4150 = vmatpush.bf16.msra.mxu1 %v6267_v46  ;;  %v8763_v46 = vld [vmem:[#allocation8 + $0x54] sm:$0xf0]  ;;  %v6491_v30 = vor.u32 %v8867_v44, %v6490_v40  ;;  %v6347_v2 = vor.u32 %v8831_v53, %v6346_v52  ;;  %v6667_v40 = vor.u32 %v8911_v21, %v6666_v19  ;;  %v6298_v52 = vld [vmem:[#allocation8 + $0x208] sm:$0xf] }
 0x17d   :  { %4118 = vmatmul.bf16.vlgmr.msrb.gmra.mxu2 %v9882_v7  ;;  %v6075_v41 = vor.u32 %v8763_v46, %v6074_v45  ;;  %v8855_v44 = vld [vmem:[#allocation8 + $0x334] sm:$0xf0]  ;;  %v6795_v45 = vor.u32 %v8943_v25, %v6794_v24  ;;  %v6650_v46 = vld [vmem:[#allocation8 + $0x4c8] sm:$0xf] }
 0x17e   :  { %4162 = vmatpush.bf16.msra.mxu2 %v6411_v26  ;;  %4131 = vmatmul.bf16.vlgmr.msrb.gmra.mxu3 %v9884_v12  ;;  %v6474_v26 = vld [vmem:[#allocation8 + $0x368] sm:$0xf]  ;;  %v3887_v36 = vpop.f32.mrf.mxu0  ;;  %v8899_v25 = vld [vmem:[#allocation8 + $0x494] sm:$0xf0] }
 0x17f   :  { %4175 = vmatpush.bf16.msra.mxu3 %v6539_v56  ;;  %4138 = vmatpush.bf16.msra.mxu0 %v6123_v58  ;;  %v8863_v56 = vld [vmem:[#allocation8 + $0x374] sm:$0xf0]  ;;  %v6058_v58 = vld [vmem:[#allocation8 + $0x28] sm:$0xf] }
 0x180   :  { %4151 = vmatpush.bf16.msra.mxu1 %v6251_v4  ;;  %v6330_v4 = vld [vmem:[#allocation8 + $0x248] sm:$0xf]  ;;  %v6475_v5 = vor.u32 %v8863_v56, %v6474_v26  ;;  %v6059_v6 = vor.u32 %v8759_v61, %v6058_v58  ;;  %v3911_v31 = vpop.f32.mrf.mxu2  ;;  %v6651_v56 = vor.u32 %v8907_v48, %v6650_v46  ;;  %v8975_v61 = vld [vmem:[#allocation8 + $0x6f4] sm:$0xf0] }
 0x181   :  { %v6331_v22 = vor.u32 %v8827_v8, %v6330_v4  ;;  %v3924_v38 = vpop.f32.mrf.mxu3  ;;  %v6426_v26 = vld [vmem:[#allocation8 + $0x308] sm:$0xf]  ;;  %v8903_v36 = vld [vmem:[#allocation8 + $0x4b4] sm:$0xf0] }
 0x182   :  { %4163 = vmatpush.bf16.msra.mxu2 %v6395_v9  ;;  %v8859_v9 = vld [vmem:[#allocation8 + $0x354] sm:$0xf0]  ;;  %v6922_v58 = vld [vmem:[#allocation8 + $0x6e8] sm:$0xf] }
 0x183   :  { %4176 = vmatpush.bf16.msra.mxu3 %v6523_v10  ;;  %4139 = vmatpush.bf16.msra.mxu0 %v6107_v11  ;;  %v3900_v10 = vpop.f32.mrf.mxu1  ;;  %v6187_v11 = vor.u32 %v8791_v63, %v6186_v62  ;;  %v7050_v62 = vld [vmem:[#allocation8 + $0x7e8] sm:$0xf]  ;;  %v8935_v8 = vld [vmem:[#allocation8 + $0x5b4] sm:$0xf0] }
 0x184   :  { %4152 = vmatpush.bf16.msra.mxu1 %v6235_v18  ;;  %v8787_v18 = vld [vmem:[#allocation8 + $0x114] sm:$0xf0]  ;;  %v6634_v4 = vld [vmem:[#allocation8 + $0x4a8] sm:$0xf] }
 0x185   :  { %v6171_v39 = vor.u32 %v8787_v18, %v6170_v17  ;;  %v6635_v13 = vor.u32 %v8903_v36, %v6634_v4  ;;  %v6906_v15 = vld [vmem:[#allocation8 + $0x6c8] sm:$0xf]  ;;  %v8971_v17 = vld [vmem:[#allocation8 + $0x6d4] sm:$0xf0] }
 0x186   :  { %4164 = vmatpush.bf16.msra.mxu2 %v6379_v32  ;;  %v6459_v32 = vor.u32 %v8859_v9, %v6458_v3  ;;  %v6923_v9 = vor.u32 %v8975_v61, %v6922_v58  ;;  %v7034_v18 = vld [vmem:[#allocation8 + $0x7c8] sm:$0xf]  ;;  %v8895_v46 = vld [vmem:[#allocation8 + $0x474] sm:$0xf0] }
 0x187   :  { %4177 = vmatpush.bf16.msra.mxu3 %v6507_v23  ;;  %4140 = vmatpush.bf16.msra.mxu0 %v6091_v27  ;;  %v8823_v23 = vld [vmem:[#allocation8 + $0x234] sm:$0xf0]  ;;  %v3912_v27 = vadd.f32 %v3911_v31, %v3899_v47  ;;  %v6618_v24 = vld [vmem:[#allocation8 + $0x488] sm:$0xf] }
 0x188   :  { %4153 = vmatpush.bf16.msra.mxu1 %v6219_v42  ;;  %v6442_v42 = vld [vmem:[#allocation8 + $0x328] sm:$0xf]  ;;  %v8819_v47 = vld [vmem:[#allocation8 + $0x214] sm:$0xf0]  ;;  %v3913_v10 = vpop.f32.mrf.mxu2 }
 0x189   :  { %v9910_v49 = vadd.f32 %v3924_v38, %v3912_v27  ;;  %v6443_v53 = vor.u32 %v8855_v44, %v6442_v42  ;;  %v3926_v19 = vpop.f32.mrf.mxu3  ;;  %v6746_v31 = vld [vmem:[#allocation8 + $0x588] sm:$0xf]  ;;  %v6619_v27 = vor.u32 %v8899_v25, %v6618_v24  ;;  %v8999_v44 = vld [vmem:[#allocation8 + $0x7b4] sm:$0xf0] }
 0x18a   :  { %4165 = vmatpush.bf16.msra.mxu2 %v6363_v50  ;;  %v6315_v50 = vor.u32 %v8823_v23, %v6314_v34  ;;  %v1153_v34 = vperm.slane %v9893_v1, 1  ;;  %v6890_v38 = vld [vmem:[#allocation8 + $0x6a8] sm:$0xf]  ;;  %v8995_v61 = vld [vmem:[#allocation8 + $0x794] sm:$0xf0] }
 0x18b   :  { %4178 = vmatpush.bf16.msra.mxu3 %v6491_v30  ;;  %4141 = vmatpush.bf16.msra.mxu0 %v6075_v41  ;;  %v6778_v30 = vld [vmem:[#allocation8 + $0x5c8] sm:$0xf]  ;;  %v8939_v41 = vld [vmem:[#allocation8 + $0x5d4] sm:$0xf0] }
 0x18c   :  { %4154 = vmatpush.bf16.msra.mxu1 %v6203_v54  ;;  %v8851_v54 = vld [vmem:[#allocation8 + $0x314] sm:$0xf0]  ;;  %v6779_v63 = vor.u32 %v8939_v41, %v6778_v30  ;;  %v6730_v48 = vld [vmem:[#allocation8 + $0x568] sm:$0xf] }
 0x18d   :  { %v6427_v3 = vor.u32 %v8851_v54, %v6426_v26  ;;  %v6874_v26 = vld [vmem:[#allocation8 + $0x688] sm:$0xf]  ;;  %v8963_v54 = vld [vmem:[#allocation8 + $0x694] sm:$0xf0] }
 0x18e   :  { %4166 = vmatpush.bf16.msra.mxu2 %v6347_v2  ;;  %v9007_v2 = vld [vmem:[#allocation8 + $0x7f4] sm:$0xf0]  ;;  %v6714_v4 = vld [vmem:[#allocation8 + $0x548] sm:$0xf] }
 0x18f   :  { %4179 = vmatpush.bf16.msra.mxu3 %v6475_v5  ;;  %4142 = vmatpush.bf16.msra.mxu0 %v6059_v6  ;;  %v6299_v5 = vor.u32 %v8819_v47, %v6298_v52  ;;  %v6762_v6 = vld [vmem:[#allocation8 + $0x5a8] sm:$0xf]  ;;  %v8923_v36 = vld [vmem:[#allocation8 + $0x554] sm:$0xf0] }
 0x190   :  { %4155 = vmatpush.bf16.msra.mxu1 %v6187_v11  ;;  %v7051_v11 = vor.u32 %v9007_v2, %v7050_v62  ;;  %v6763_v21 = vor.u32 %v8935_v8, %v6762_v6  ;;  %v6586_v62 = vld [vmem:[#allocation8 + $0x448] sm:$0xf]  ;;  %v8919_v19 = vld [vmem:[#allocation8 + $0x534] sm:$0xf0] }
 0x191   :  { %v6986_v10 = vld [vmem:[#allocation8 + $0x768] sm:$0xf] }
 0x192   :  { %4167 = vmatpush.bf16.msra.mxu2 %v6331_v22  ;;  %v9003_v22 = vld [vmem:[#allocation8 + $0x7d4] sm:$0xf0]  ;;  %v6842_v24 = vld [vmem:[#allocation8 + $0x648] sm:$0xf] }
 0x193   :  { %4180 = vmatpush.bf16.msra.mxu3 %v6459_v32  ;;  %4143 = vmatpush.bf16.msra.mxu0 %v6043_v33  ;;  %v8931_v32 = vld [vmem:[#allocation8 + $0x594] sm:$0xf0]  ;;  %v6907_v33 = vor.u32 %v8971_v17, %v6906_v15  ;;  %v7035_v23 = vor.u32 %v9003_v22, %v7034_v18  ;;  %v3937_v1 = vpop.f32.mrf.mxu0  ;;  %v6570_v15 = vld [vmem:[#allocation8 + $0x428] sm:$0xf] }
 0x194   :  { %4156 = vmatpush.bf16.msra.mxu1 %v6171_v39  ;;  %v8967_v39 = vld [vmem:[#allocation8 + $0x6b4] sm:$0xf0]  ;;  %v6747_v42 = vor.u32 %v8931_v32, %v6746_v31  ;;  %v3938_v41 = vadd.f32 %v3937_v1, %v1153_v34  ;;  %v6698_v18 = vld [vmem:[#allocation8 + $0x528] sm:$0xf] }
 0x195   :  { %v6891_v30 = vor.u32 %v8967_v39, %v6890_v38  ;;  %v8887_v17 = vld [vmem:[#allocation8 + $0x434] sm:$0xf0]  ;;  %v6970_v34 = vld [vmem:[#allocation8 + $0x748] sm:$0xf] }
 0x196   :  { %4168 = vmatpush.bf16.msra.mxu2 %v6315_v50  ;;  %4144 = vmatmul.bf16.vlgmr.msra.gmra.mxu0 %v9825_v51  ;;  %v8927_v50 = vld [vmem:[#allocation8 + $0x574] sm:$0xf0]  ;;  %v3950_v52 = vpop.f32.mrf.mxu1  ;;  %v6571_v32 = vor.u32 %v8887_v17, %v6570_v15  ;;  %v6554_v38 = vld [vmem:[#allocation8 + $0x408] sm:$0xf] }
 0x197   :  { %4188 = vmatpush.bf16.msrb.mxu0 %v6667_v40  ;;  %4181 = vmatpush.bf16.msra.mxu3 %v6443_v53  ;;  %v7018_v40 = vld [vmem:[#allocation8 + $0x7a8] sm:$0xf]  ;;  %v6731_v58 = vor.u32 %v8927_v50, %v6730_v48  ;;  %v3951_v2 = vadd.f32 %v3950_v52, %v3938_v41  ;;  %v8883_v39 = vld [vmem:[#allocation8 + $0x414] sm:$0xf0] }
 0x198   :  { %4201 = vmatpush.bf16.msrb.mxu1 %v6795_v45  ;;  %v6602_v45 = vld [vmem:[#allocation8 + $0x468] sm:$0xf]  ;;  %v7019_v53 = vor.u32 %v8999_v44, %v7018_v40  ;;  %v9071_v50 = vld [vmem:[#allocation8 + $0x9f4] sm:$0xf0]  ;;  %v6555_v41 = vor.u32 %v8883_v39, %v6554_v38 }
 0x199   :  { %4157 = vmatmul.bf16.vlgmr.msra.gmra.mxu1 %v9828_v55  ;;  %v6603_v47 = vor.u32 %v8895_v46, %v6602_v45  ;;  %v6682_v40 = vld [vmem:[#allocation8 + $0x508] sm:$0xf]  ;;  %v9039_v45 = vld [vmem:[#allocation8 + $0x8f4] sm:$0xf0] }
 0x19a   :  { %4169 = vmatpush.bf16.msra.mxu2 %v6299_v5  ;;  %v6875_v5 = vor.u32 %v8963_v54, %v6874_v26  ;;  %v7178_v44 = vld [vmem:[#allocation8 + $0x8e8] sm:$0xf]  ;;  %v9103_v17 = vld [vmem:[#allocation8 + $0xaf4] sm:$0xf0] }
 0x19b   :  { %4189 = vmatpush.bf16.msrb.mxu0 %v6651_v56  ;;  %4182 = vmatpush.bf16.msra.mxu3 %v6427_v3  ;;  %v7002_v56 = vld [vmem:[#allocation8 + $0x788] sm:$0xf] }
 0x19c   :  { %4202 = vmatpush.bf16.msrb.mxu1 %v6779_v63  ;;  %v8891_v63 = vld [vmem:[#allocation8 + $0x454] sm:$0xf0]  ;;  %v7003_v6 = vor.u32 %v8995_v61, %v7002_v56  ;;  %v6858_v3 = vld [vmem:[#allocation8 + $0x668] sm:$0xf]  ;;  %v7179_v56 = vor.u32 %v9039_v45, %v7178_v44 }
 0x19d   :  { %4170 = vmatmul.bf16.vlgmr.msra.gmra.mxu2 %v9833_v14  ;;  %v6587_v8 = vor.u32 %v8891_v63, %v6586_v62  ;;  %v7306_v48 = vld [vmem:[#allocation8 + $0x9e8] sm:$0xf]  ;;  %v8983_v61 = vld [vmem:[#allocation8 + $0x734] sm:$0xf0] }
 0x19e   :  { %4214 = vmatpush.bf16.msrb.mxu2 %v6923_v9  ;;  %4183 = vmatmul.bf16.vlgmr.msra.gmra.mxu3 %v9835_v20  ;;  %v8959_v9 = vld [vmem:[#allocation8 + $0x674] sm:$0xf0]  ;;  %v3952_v25 = vpop.f32.mrf.mxu1  ;;  %v6826_v52 = vld [vmem:[#allocation8 + $0x628] sm:$0xf]  ;;  %v7307_v62 = vor.u32 %v9071_v50, %v7306_v48 }
 0x19f   :  { %4227 = vmatpush.bf16.msrb.mxu3 %v7051_v11  ;;  %4190 = vmatpush.bf16.msrb.mxu0 %v6635_v13  ;;  %v6715_v11 = vor.u32 %v8923_v36, %v6714_v4  ;;  %v8991_v13 = vld [vmem:[#allocation8 + $0x774] sm:$0xf0]  ;;  %v6859_v22 = vor.u32 %v8959_v9, %v6858_v3  ;;  %v7162_v63 = vld [vmem:[#allocation8 + $0x8c8] sm:$0xf] }
 0x1a0   :  { %4203 = vmatpush.bf16.msrb.mxu1 %v6763_v21  ;;  %v3939_v21 = vpop.f32.mrf.mxu0  ;;  %v6987_v31 = vor.u32 %v8991_v13, %v6986_v10  ;;  %v3963_v1 = vpop.f32.mrf.mxu2  ;;  %v9035_v4 = vld [vmem:[#allocation8 + $0x8d4] sm:$0xf0]  ;;  %v6810_v3 = vld [vmem:[#allocation8 + $0x608] sm:$0xf] }
 0x1a1   :  { %v3976_v26 = vpop.f32.mrf.mxu3  ;;  %v6938_v10 = vld [vmem:[#allocation8 + $0x708] sm:$0xf]  ;;  %v7163_v13 = vor.u32 %v9035_v4, %v7162_v63  ;;  %v9135_v21 = vld [vmem:[#allocation8 + $0xbf4] sm:$0xf0] }
 0x1a2   :  { %4215 = vmatpush.bf16.msrb.mxu2 %v6907_v33  ;;  %v8955_v33 = vld [vmem:[#allocation8 + $0x654] sm:$0xf0]  ;;  %v7434_v15 = vld [vmem:[#allocation8 + $0xae8] sm:$0xf] }
 0x1a3   :  { %4228 = vmatpush.bf16.msrb.mxu3 %v7035_v23  ;;  %4191 = vmatpush.bf16.msrb.mxu0 %v6619_v27  ;;  %v8987_v23 = vld [vmem:[#allocation8 + $0x754] sm:$0xf0]  ;;  %v6699_v27 = vor.u32 %v8919_v19, %v6698_v18  ;;  %v6843_v46 = vor.u32 %v8955_v33, %v6842_v24  ;;  %v7562_v18 = vld [vmem:[#allocation8 + $0xbe8] sm:$0xf] }
 0x1a4   :  { %4204 = vmatpush.bf16.msrb.mxu1 %v6747_v42  ;;  %v8915_v42 = vld [vmem:[#allocation8 + $0x514] sm:$0xf0]  ;;  %v7563_v38 = vor.u32 %v9135_v21, %v7562_v18  ;;  %v7546_v44 = vld [vmem:[#allocation8 + $0xbc8] sm:$0xf] }
 0x1a5   :  { %v6683_v54 = vor.u32 %v8915_v42, %v6682_v40  ;;  %v9031_v24 = vld [vmem:[#allocation8 + $0x8b4] sm:$0xf0]  ;;  %v7418_v40 = vld [vmem:[#allocation8 + $0xac8] sm:$0xf] }
 0x1a6   :  { %4216 = vmatpush.bf16.msrb.mxu2 %v6891_v30  ;;  %v6971_v30 = vor.u32 %v8987_v23, %v6970_v34  ;;  %v7435_v23 = vor.u32 %v9103_v17, %v7434_v15  ;;  %v9099_v42 = vld [vmem:[#allocation8 + $0xad4] sm:$0xf0]  ;;  %v7130_v48 = vld [vmem:[#allocation8 + $0x888] sm:$0xf] }
 0x1a7   :  { %4229 = vmatpush.bf16.msrb.mxu3 %v7019_v53  ;;  %4192 = vmatpush.bf16.msrb.mxu0 %v6603_v47  ;;  %v8951_v53 = vld [vmem:[#allocation8 + $0x634] sm:$0xf0]  ;;  %v3964_v47 = vadd.f32 %v3963_v1, %v3951_v2  ;;  %v7258_v1 = vld [vmem:[#allocation8 + $0x988] sm:$0xf] }
 0x1a8   :  { %4205 = vmatpush.bf16.msrb.mxu1 %v6731_v58  ;;  %v6954_v58 = vld [vmem:[#allocation8 + $0x728] sm:$0xf]  ;;  %v8947_v2 = vld [vmem:[#allocation8 + $0x614] sm:$0xf0]  ;;  %v3965_v33 = vpop.f32.mrf.mxu2 }
 0x1a9   :  { %v9917_v36 = vadd.f32 %v3976_v26, %v3964_v47  ;;  %v6955_v9 = vor.u32 %v8983_v61, %v6954_v58  ;;  %v6811_v25 = vor.u32 %v8947_v2, %v6810_v3  ;;  %v9027_v50 = vld [vmem:[#allocation8 + $0x894] sm:$0xf0]  ;;  %v7402_v47 = vld [vmem:[#allocation8 + $0xaa8] sm:$0xf] }
 0x1aa   :  { %4217 = vmatpush.bf16.msrb.mxu2 %v6875_v5  ;;  %v6827_v5 = vor.u32 %v8951_v53, %v6826_v52  ;;  %v7131_v53 = vor.u32 %v9027_v50, %v7130_v48  ;;  %v9095_v26 = vld [vmem:[#allocation8 + $0xab4] sm:$0xf0]  ;;  %v7114_v61 = vld [vmem:[#allocation8 + $0x868] sm:$0xf] }
 0x1ab   :  { %4230 = vmatpush.bf16.msrb.mxu3 %v7003_v6  ;;  %4193 = vmatpush.bf16.msrb.mxu0 %v6587_v8  ;;  %v7290_v6 = vld [vmem:[#allocation8 + $0x9c8] sm:$0xf]  ;;  %v9067_v8 = vld [vmem:[#allocation8 + $0x9d4] sm:$0xf0] }
 0x1ac   :  { %4206 = vmatpush.bf16.msrb.mxu1 %v6715_v11  ;;  %v8979_v11 = vld [vmem:[#allocation8 + $0x714] sm:$0xf0]  ;;  %v7291_v19 = vor.u32 %v9067_v8, %v7290_v6  ;;  %v7242_v63 = vld [vmem:[#allocation8 + $0x968] sm:$0xf]  ;;  %v7403_v6 = vor.u32 %v9095_v26, %v7402_v47 }
 0x1ad   :  { %v6939_v34 = vor.u32 %v8979_v11, %v6938_v10  ;;  %v9127_v58 = vld [vmem:[#allocation8 + $0xbb4] sm:$0xf0]  ;;  %v7386_v10 = vld [vmem:[#allocation8 + $0xa88] sm:$0xf] }
 0x1ae   :  { %4218 = vmatpush.bf16.msrb.mxu2 %v6859_v22  ;;  %v7146_v22 = vld [vmem:[#allocation8 + $0x8a8] sm:$0xf]  ;;  %v9055_v4 = vld [vmem:[#allocation8 + $0x974] sm:$0xf0] }
 0x1af   :  { %4231 = vmatpush.bf16.msrb.mxu3 %v6987_v31  ;;  %4194 = vmatpush.bf16.msrb.mxu0 %v6571_v32  ;;  %v7274_v31 = vld [vmem:[#allocation8 + $0x9a8] sm:$0xf]  ;;  %v9063_v32 = vld [vmem:[#allocation8 + $0x9b4] sm:$0xf0]  ;;  %v7147_v39 = vor.u32 %v9031_v24, %v7146_v22  ;;  %v7243_v15 = vor.u32 %v9055_v4, %v7242_v63 }
 0x1b0   :  { %4207 = vmatpush.bf16.msrb.mxu1 %v6699_v27  ;;  %v3978_v27 = vpop.f32.mrf.mxu3  ;;  %v7275_v45 = vor.u32 %v9063_v32, %v7274_v31  ;;  %v9091_v11 = vld [vmem:[#allocation8 + $0xa94] sm:$0xf0]  ;;  %v7098_v18 = vld [vmem:[#allocation8 + $0x848] sm:$0xf] }
 0x1b1   :  { %v9123_v17 = vld [vmem:[#allocation8 + $0xb94] sm:$0xf0]  ;;  %v7226_v22 = vld [vmem:[#allocation8 + $0x948] sm:$0xf] }
 0x1b2   :  { %4219 = vmatpush.bf16.msrb.mxu2 %v6843_v46  ;;  %v9131_v46 = vld [vmem:[#allocation8 + $0xbd4] sm:$0xf0]  ;;  %v7370_v32 = vld [vmem:[#allocation8 + $0xa68] sm:$0xf] }
 0x1b3   :  { %4232 = vmatpush.bf16.msrb.mxu3 %v6971_v30  ;;  %4195 = vmatpush.bf16.msrb.mxu0 %v6555_v41  ;;  %v9059_v30 = vld [vmem:[#allocation8 + $0x994] sm:$0xf0]  ;;  %v7419_v41 = vor.u32 %v9099_v42, %v7418_v40  ;;  %v7547_v52 = vor.u32 %v9131_v46, %v7546_v44  ;;  %v7210_v40 = vld [vmem:[#allocation8 + $0x928] sm:$0xf] }
 0x1b4   :  { %4208 = vmatpush.bf16.msrb.mxu1 %v6683_v54  ;;  %v7530_v54 = vld [vmem:[#allocation8 + $0xba8] sm:$0xf]  ;;  %v9051_v24 = vld [vmem:[#allocation8 + $0x954] sm:$0xf0] }
 0x1b5   :  { %v9087_v33 = vld [vmem:[#allocation8 + $0xa74] sm:$0xf0]  ;;  %v7354_v46 = vld [vmem:[#allocation8 + $0xa48] sm:$0xf] }
 0x1b6   :  { %4220 = vmatpush.bf16.msrb.mxu2 %v6827_v5  ;;  %4196 = vmatmul.bf16.vlgmr.msrb.gmra.mxu0 %v9842_v59  ;;  %v3989_v5 = vpop.f32.mrf.mxu0  ;;  %v4002_v3 = vpop.f32.mrf.mxu1  ;;  %v9119_v27 = vld [vmem:[#allocation8 + $0xb74] sm:$0xf0]  ;;  %v7066_v47 = vld [vmem:[#allocation8 + $0x808] sm:$0xf] }
 0x1b7   :  { %4240 = vmatpush.bf16.msra.mxu0 %v7179_v56  ;;  %4233 = vmatpush.bf16.msrb.mxu3 %v6955_v9  ;;  %v7259_v56 = vor.u32 %v9059_v30, %v7258_v1  ;;  %v3990_v8 = vadd.f32 %v3989_v5, %v9917_v36  ;;  %v7531_v9 = vor.u32 %v9127_v58, %v7530_v54  ;;  %v9047_v42 = vld [vmem:[#allocation8 + $0x934] sm:$0xf0]  ;;  %v7194_v54 = vld [vmem:[#allocation8 + $0x908] sm:$0xf] }
 0x1b8   :  { %4253 = vmatpush.bf16.msra.mxu1 %v7307_v62  ;;  %v9023_v62 = vld [vmem:[#allocation8 + $0x874] sm:$0xf0]  ;;  %v7690_v58 = vld [vmem:[#allocation8 + $0xce8] sm:$0xf] }
 0x1b9   :  { %4209 = vmatmul.bf16.vlgmr.msrb.gmra.mxu1 %v9844_v0  ;;  %v7115_v2 = vor.u32 %v9023_v62, %v7114_v61  ;;  %v4003_v21 = vadd.f32 %v4002_v3, %v3990_v8  ;;  %v9083_v30 = vld [vmem:[#allocation8 + $0xa54] sm:$0xf0]  ;;  %v7818_v63 = vld [vmem:[#allocation8 + $0xde8] sm:$0xf] }
 0x1ba   :  { %4221 = vmatpush.bf16.msrb.mxu2 %v6811_v25  ;;  %v7387_v25 = vor.u32 %v9091_v11, %v7386_v10  ;;  %v9011_v26 = vld [vmem:[#allocation8 + $0x814] sm:$0xf0]  ;;  %v7355_v62 = vor.u32 %v9083_v30, %v7354_v46  ;;  %v7338_v3 = vld [vmem:[#allocation8 + $0xa28] sm:$0xf] }
 0x1bb   :  { %4241 = vmatpush.bf16.msra.mxu0 %v7163_v13  ;;  %4234 = vmatpush.bf16.msrb.mxu3 %v6939_v34  ;;  %v7514_v13 = vld [vmem:[#allocation8 + $0xb88] sm:$0xf]  ;;  %v9167_v61 = vld [vmem:[#allocation8 + $0xcf4] sm:$0xf0]  ;;  %v7067_v8 = vor.u32 %v9011_v26, %v7066_v47 }
 0x1bc   :  { %4254 = vmatpush.bf16.msra.mxu1 %v7291_v19  ;;  %v9019_v19 = vld [vmem:[#allocation8 + $0x854] sm:$0xf0]  ;;  %v7515_v36 = vor.u32 %v9123_v17, %v7514_v13  ;;  %v7498_v34 = vld [vmem:[#allocation8 + $0xb68] sm:$0xf]  ;;  %v7691_v13 = vor.u32 %v9167_v61, %v7690_v58 }
 0x1bd   :  { %4222 = vmatmul.bf16.vlgmr.msrb.gmra.mxu2 %v9850_v29  ;;  %v7099_v31 = vor.u32 %v9019_v19, %v7098_v18  ;;  %v7499_v50 = vor.u32 %v9119_v27, %v7498_v34  ;;  %v9199_v4 = vld [vmem:[#allocation8 + $0xdf4] sm:$0xf0]  ;;  %v7674_v19 = vld [vmem:[#allocation8 + $0xcc8] sm:$0xf] }
 0x1be   :  { %4266 = vmatpush.bf16.msra.mxu2 %v7435_v23  ;;  %4235 = vmatmul.bf16.vlgmr.msrb.gmra.mxu3 %v9852_v35  ;;  %v7227_v23 = vor.u32 %v9051_v24, %v7226_v22  ;;  %v3991_v44 = vpop.f32.mrf.mxu0  ;;  %v4004_v48 = vpop.f32.mrf.mxu1  ;;  %v9111_v17 = vld [vmem:[#allocation8 + $0xb34] sm:$0xf0]  ;;  %v7819_v18 = vor.u32 %v9199_v4, %v7818_v63  ;;  %v7450_v34 = vld [vmem:[#allocation8 + $0xb08] sm:$0xf] }
 0x1bf   :  { %4279 = vmatpush.bf16.msra.mxu3 %v7563_v38  ;;  %4242 = vmatpush.bf16.msra.mxu0 %v7147_v39  ;;  %v7082_v38 = vld [vmem:[#allocation8 + $0x828] sm:$0xf]  ;;  %v9015_v39 = vld [vmem:[#allocation8 + $0x834] sm:$0xf0] }
 0x1c0   :  { %4255 = vmatpush.bf16.msra.mxu1 %v7275_v45  ;;  %v7371_v45 = vor.u32 %v9087_v33, %v7370_v32  ;;  %v7083_v1 = vor.u32 %v9015_v39, %v7082_v38  ;;  %v4015_v5 = vpop.f32.mrf.mxu2  ;;  %v9163_v22 = vld [vmem:[#allocation8 + $0xcd4] sm:$0xf0]  ;;  %v7322_v32 = vld [vmem:[#allocation8 + $0xa08] sm:$0xf] }
 0x1c1   :  { %v4028_v10 = vpop.f32.mrf.mxu3  ;;  %v7675_v27 = vor.u32 %v9163_v22, %v7674_v19  ;;  %v7946_v38 = vld [vmem:[#allocation8 + $0xee8] sm:$0xf]  ;;  %v9231_v39 = vld [vmem:[#allocation8 + $0xef4] sm:$0xf0] }
 0x1c2   :  { %4267 = vmatpush.bf16.msra.mxu2 %v7419_v41  ;;  %v7482_v41 = vld [vmem:[#allocation8 + $0xb48] sm:$0xf]  ;;  %v9263_v44 = vld [vmem:[#allocation8 + $0xff4] sm:$0xf0] }
 0x1c3   :  { %4280 = vmatpush.bf16.msra.mxu3 %v7547_v52  ;;  %4243 = vmatpush.bf16.msra.mxu0 %v7131_v53  ;;  %v9115_v52 = vld [vmem:[#allocation8 + $0xb54] sm:$0xf0]  ;;  %v7211_v53 = vor.u32 %v9047_v42, %v7210_v40  ;;  %v8074_v40 = vld [vmem:[#allocation8 + $0xfe8] sm:$0xf] }
 0x1c4   :  { %4256 = vmatpush.bf16.msra.mxu1 %v7259_v56  ;;  %v9043_v56 = vld [vmem:[#allocation8 + $0x914] sm:$0xf0]  ;;  %v8075_v47 = vor.u32 %v9263_v44, %v8074_v40  ;;  %v8058_v58 = vld [vmem:[#allocation8 + $0xfc8] sm:$0xf] }
 0x1c5   :  { %v7195_v11 = vor.u32 %v9043_v56, %v7194_v54  ;;  %v9159_v46 = vld [vmem:[#allocation8 + $0xcb4] sm:$0xf0]  ;;  %v7930_v54 = vld [vmem:[#allocation8 + $0xec8] sm:$0xf] }
 0x1c6   :  { %4268 = vmatpush.bf16.msra.mxu2 %v7403_v6  ;;  %v7483_v6 = vor.u32 %v9115_v52, %v7482_v41  ;;  %v7947_v52 = vor.u32 %v9231_v39, %v7946_v38  ;;  %v9227_v56 = vld [vmem:[#allocation8 + $0xed4] sm:$0xf0]  ;;  %v7642_v63 = vld [vmem:[#allocation8 + $0xc88] sm:$0xf] }
 0x1c7   :  { %4281 = vmatpush.bf16.msra.mxu3 %v7531_v9  ;;  %4244 = vmatpush.bf16.msra.mxu0 %v7115_v2  ;;  %v9079_v9 = vld [vmem:[#allocation8 + $0xa34] sm:$0xf0]  ;;  %v4016_v2 = vadd.f32 %v4015_v5, %v4003_v21  ;;  %v7770_v5 = vld [vmem:[#allocation8 + $0xd88] sm:$0xf] }
 0x1c8   :  { %4257 = vmatpush.bf16.msra.mxu1 %v7243_v15  ;;  %v7466_v15 = vld [vmem:[#allocation8 + $0xb28] sm:$0xf]  ;;  %v9075_v21 = vld [vmem:[#allocation8 + $0xa14] sm:$0xf0]  ;;  %v4017_v30 = vpop.f32.mrf.mxu2 }
 0x1c9   :  { %v9924_v24 = vadd.f32 %v4028_v10, %v4016_v2  ;;  %v7467_v33 = vor.u32 %v9111_v17, %v7466_v15  ;;  %v7323_v48 = vor.u32 %v9075_v21, %v7322_v32  ;;  %v9155_v4 = vld [vmem:[#allocation8 + $0xc94] sm:$0xf0]  ;;  %v7914_v2 = vld [vmem:[#allocation8 + $0xea8] sm:$0xf] }
 0x1ca   :  { %4269 = vmatpush.bf16.msra.mxu2 %v7387_v25  ;;  %v7339_v25 = vor.u32 %v9079_v9, %v7338_v3  ;;  %v7643_v9 = vor.u32 %v9155_v4, %v7642_v63  ;;  %v9223_v10 = vld [vmem:[#allocation8 + $0xeb4] sm:$0xf0]  ;;  %v7626_v17 = vld [vmem:[#allocation8 + $0xc68] sm:$0xf] }
 0x1cb   :  { %4282 = vmatpush.bf16.msra.mxu3 %v7515_v36  ;;  %4245 = vmatpush.bf16.msra.mxu0 %v7099_v31  ;;  %v7802_v36 = vld [vmem:[#allocation8 + $0xdc8] sm:$0xf]  ;;  %v9195_v31 = vld [vmem:[#allocation8 + $0xdd4] sm:$0xf0] }
 0x1cc   :  { %4258 = vmatpush.bf16.msra.mxu1 %v7227_v23  ;;  %v9107_v23 = vld [vmem:[#allocation8 + $0xb14] sm:$0xf0]  ;;  %v7803_v42 = vor.u32 %v9195_v31, %v7802_v36  ;;  %v7754_v19 = vld [vmem:[#allocation8 + $0xd68] sm:$0xf]  ;;  %v7915_v36 = vor.u32 %v9223_v10, %v7914_v2 }
 0x1cd   :  { %v7451_v41 = vor.u32 %v9107_v23, %v7450_v34  ;;  %v9255_v15 = vld [vmem:[#allocation8 + $0xfb4] sm:$0xf0]  ;;  %v7898_v34 = vld [vmem:[#allocation8 + $0xe88] sm:$0xf] }
 0x1ce   :  { %4270 = vmatpush.bf16.msra.mxu2 %v7371_v45  ;;  %v7658_v45 = vld [vmem:[#allocation8 + $0xca8] sm:$0xf]  ;;  %v9183_v22 = vld [vmem:[#allocation8 + $0xd74] sm:$0xf0] }
 0x1cf   :  { %4283 = vmatpush.bf16.msra.mxu3 %v7499_v50  ;;  %4246 = vmatpush.bf16.msra.mxu0 %v7083_v1  ;;  %v7786_v50 = vld [vmem:[#allocation8 + $0xda8] sm:$0xf]  ;;  %v9191_v1 = vld [vmem:[#allocation8 + $0xdb4] sm:$0xf0]  ;;  %v7659_v26 = vor.u32 %v9159_v46, %v7658_v45  ;;  %v7755_v38 = vor.u32 %v9183_v22, %v7754_v19  ;;  %v8813_v19 = vld [vmem:[#allocation8 + $0x1ec] sm:$0xf] }
 0x1d0   :  { %4259 = vmatpush.bf16.msra.mxu1 %v7211_v53  ;;  %v4030_v53 = vpop.f32.mrf.mxu3  ;;  %v7787_v61 = vor.u32 %v9191_v1, %v7786_v50  ;;  %v9219_v23 = vld [vmem:[#allocation8 + $0xe94] sm:$0xf0]  ;;  %v7610_v40 = vld [vmem:[#allocation8 + $0xc48] sm:$0xf]  ;;  %v6284_v22 = vld [vmem:[#allocation8 + $0x1f8] sm:$0xf0] }
 0x1d1   :  { %v9251_v39 = vld [vmem:[#allocation8 + $0xf94] sm:$0xf0]  ;;  %v7738_v45 = vld [vmem:[#allocation8 + $0xd48] sm:$0xf] }
 0x1d2   :  { %4271 = vmatpush.bf16.msra.mxu2 %v7355_v62  ;;  %v9259_v62 = vld [vmem:[#allocation8 + $0xfd4] sm:$0xf0]  ;;  %v7882_v1 = vld [vmem:[#allocation8 + $0xe68] sm:$0xf] }
 0x1d3   :  { %4284 = vmatpush.bf16.msra.mxu3 %v7483_v6  ;;  %4247 = vmatpush.bf16.msra.mxu0 %v7067_v8  ;;  %v9187_v6 = vld [vmem:[#allocation8 + $0xd94] sm:$0xf0]  ;;  %v7931_v8 = vor.u32 %v9227_v56, %v7930_v54  ;;  %v8059_v3 = vor.u32 %v9259_v62, %v8058_v58  ;;  %v7722_v54 = vld [vmem:[#allocation8 + $0xd28] sm:$0xf] }
 0x1d4   :  { %4260 = vmatpush.bf16.msra.mxu1 %v7195_v11  ;;  %v8042_v11 = vld [vmem:[#allocation8 + $0xfa8] sm:$0xf]  ;;  %v9179_v46 = vld [vmem:[#allocation8 + $0xd54] sm:$0xf0] }
 0x1d5   :  { %v9215_v30 = vld [vmem:[#allocation8 + $0xe74] sm:$0xf0]  ;;  %v7866_v62 = vld [vmem:[#allocation8 + $0xe48] sm:$0xf] }
 0x1d6   :  { %4272 = vmatpush.bf16.msra.mxu2 %v7339_v25  ;;  %4248 = vmatmul.bf16.vlgmr.msra.gmra.mxu0 %v9860_v16  ;;  %v4041_v25 = vpop.f32.mrf.mxu0  ;;  %v4054_v32 = vpop.f32.mrf.mxu1  ;;  %v9247_v53 = vld [vmem:[#allocation8 + $0xf74] sm:$0xf0]  ;;  %v7578_v2 = vld [vmem:[#allocation8 + $0xc08] sm:$0xf] }
 0x1d7   :  { %4292 = vmatpush.bf16.msrb.mxu0 %v7691_v13  ;;  %4285 = vmatpush.bf16.msra.mxu3 %v7467_v33  ;;  %v7771_v13 = vor.u32 %v9187_v6, %v7770_v5  ;;  %v4042_v31 = vadd.f32 %v4041_v25, %v9924_v24  ;;  %v8043_v33 = vor.u32 %v9255_v15, %v8042_v11  ;;  %v9175_v56 = vld [vmem:[#allocation8 + $0xd34] sm:$0xf0]  ;;  %v7706_v11 = vld [vmem:[#allocation8 + $0xd08] sm:$0xf]  ;;  %v8781_v15 = vld [vmem:[#allocation8 + $0xec] sm:$0xf] }
 0x1d8   :  { %4305 = vmatpush.bf16.msrb.mxu1 %v7819_v18  ;;  %v9151_v18 = vld [vmem:[#allocation8 + $0xc74] sm:$0xf0] }
 0x1d9   :  { %4261 = vmatmul.bf16.vlgmr.msra.gmra.mxu1 %v9862_v28  ;;  %v7627_v21 = vor.u32 %v9151_v18, %v7626_v17  ;;  %v4055_v44 = vadd.f32 %v4054_v32, %v4042_v31  ;;  %v9211_v6 = vld [vmem:[#allocation8 + $0xe54] sm:$0xf0]  ;;  %v6156_v17 = vld [vmem:[#allocation8 + $0xf8] sm:$0xf0]  ;;  %v7850_v32 = vld [vmem:[#allocation8 + $0xe28] sm:$0xf] }
 0x1da   :  { %4273 = vmatpush.bf16.msra.mxu2 %v7323_v48  ;;  %v7899_v48 = vor.u32 %v9219_v23, %v7898_v34  ;;  %v9139_v10 = vld [vmem:[#allocation8 + $0xc14] sm:$0xf0]  ;;  %v7867_v18 = vor.u32 %v9211_v6, %v7866_v62  ;;  %v6124_v62 = vld [vmem:[#allocation8 + $0xb8] sm:$0xf0] }
 0x1db   :  { %4293 = vmatpush.bf16.msrb.mxu0 %v7675_v27  ;;  %4286 = vmatpush.bf16.msra.mxu3 %v7451_v41  ;;  %v8026_v27 = vld [vmem:[#allocation8 + $0xf88] sm:$0xf]  ;;  %v7579_v31 = vor.u32 %v9139_v10, %v7578_v2 }
 0x1dc   :  { %4306 = vmatpush.bf16.msrb.mxu1 %v7803_v42  ;;  %v9147_v42 = vld [vmem:[#allocation8 + $0xc54] sm:$0xf0]  ;;  %v8027_v24 = vor.u32 %v9251_v39, %v8026_v27  ;;  %v8010_v41 = vld [vmem:[#allocation8 + $0xf68] sm:$0xf]  ;;  %v6159_v27 = vor.u32 %v8781_v15, %v6156_v17  ;;  %v8873_v15 = vld [vmem:[#allocation8 + $0x3cc] sm:$0xf] }
 0x1dd   :  { %4274 = vmatmul.bf16.vlgmr.msra.gmra.mxu2 %v9866_v57  ;;  %v7611_v50 = vor.u32 %v9147_v42, %v7610_v40  ;;  %v8011_v4 = vor.u32 %v9247_v53, %v8010_v41  ;;  %v9239_v39 = vld [vmem:[#allocation8 + $0xf34] sm:$0xf0]  ;;  %v6287_v40 = vor.u32 %v8813_v19, %v6284_v22  ;;  %v8777_v42 = vld [vmem:[#allocation8 + $0xcc] sm:$0xf]  ;;  %v7962_v41 = vld [vmem:[#allocation8 + $0xf08] sm:$0xf] }
 0x1de   :  { %4318 = vmatpush.bf16.msrb.mxu2 %v7947_v52  ;;  %4287 = vmatmul.bf16.vlgmr.msra.gmra.mxu3 %v9868_v60  ;;  %v7739_v52 = vor.u32 %v9179_v46, %v7738_v45  ;;  %v4043_v58 = vpop.f32.mrf.mxu0  ;;  %v4056_v63 = vpop.f32.mrf.mxu1  ;;  %v6140_v45 = vld [vmem:[#allocation8 + $0xd8] sm:$0xf0]  ;;  %v8769_v19 = vld [vmem:[#allocation8 + $0x8c] sm:$0xf] }
 0x1df   :  { %4331 = vmatpush.bf16.msrb.mxu3 %v8075_v47  ;;  %4294 = vmatpush.bf16.msrb.mxu0 %v7659_v26  ;;  %v7594_v47 = vld [vmem:[#allocation8 + $0xc28] sm:$0xf]  ;;  %v9143_v26 = vld [vmem:[#allocation8 + $0xc34] sm:$0xf0]  ;;  %v6143_v53 = vor.u32 %v8777_v42, %v6140_v45  ;;  %v6540_v58 = vld [vmem:[#allocation8 + $0x3f8] sm:$0xf0] }
 0x1e0   :  { %4307 = vmatpush.bf16.msrb.mxu1 %v7787_v61  ;;  %v7883_v61 = vor.u32 %v9215_v30, %v7882_v1  ;;  %v7595_v5 = vor.u32 %v9143_v26, %v7594_v47  ;;  %v4067_v25 = vpop.f32.mrf.mxu2  ;;  %v7834_v1 = vld [vmem:[#allocation8 + $0xe08] sm:$0xf]  ;;  %v8845_v47 = vld [vmem:[#allocation8 + $0x2ec] sm:$0xf]  ;;  %v6412_v26 = vld [vmem:[#allocation8 + $0x2f8] sm:$0xf0] }
 0x1e1   :  { %v4080_v34 = vpop.f32.mrf.mxu3  ;;  %v6108_v22 = vld [vmem:[#allocation8 + $0x98] sm:$0xf0]  ;;  %v8797_v42 = vld [vmem:[#allocation8 + $0x16c] sm:$0xf] }
 0x1e2   :  { %4319 = vmatpush.bf16.msrb.mxu2 %v7931_v8  ;;  %v7994_v8 = vld [vmem:[#allocation8 + $0xf48] sm:$0xf]  ;;  %v6220_v45 = vld [vmem:[#allocation8 + $0x178] sm:$0xf0] }
 0x1e3   :  { %4332 = vmatpush.bf16.msrb.mxu3 %v8059_v3  ;;  %4295 = vmatpush.bf16.msrb.mxu0 %v7643_v9  ;;  %v9243_v3 = vld [vmem:[#allocation8 + $0xf54] sm:$0xf0]  ;;  %v7723_v9 = vor.u32 %v9175_v56, %v7722_v54  ;;  %v8877_v54 = vld [vmem:[#allocation8 + $0x3ec] sm:$0xf] }
 0x1e4   :  { %4308 = vmatpush.bf16.msrb.mxu1 %v7771_v13  ;;  %v9171_v13 = vld [vmem:[#allocation8 + $0xd14] sm:$0xf0]  ;;  %v6543_v2 = vor.u32 %v8877_v54, %v6540_v58  ;;  %v8761_v54 = vld [vmem:[#allocation8 + $0x4c] sm:$0xf] }
 0x1e5   :  { %v7707_v23 = vor.u32 %v9171_v13, %v7706_v11  ;;  %v8841_v11 = vld [vmem:[#allocation8 + $0x2cc] sm:$0xf]  ;;  %v6396_v13 = vld [vmem:[#allocation8 + $0x2d8] sm:$0xf0] }
 0x1e6   :  { %4320 = vmatpush.bf16.msrb.mxu2 %v7915_v36  ;;  %v7995_v36 = vor.u32 %v9243_v3, %v7994_v8  ;;  %v6415_v3 = vor.u32 %v8845_v47, %v6412_v26  ;;  %v6223_v47 = vor.u32 %v8797_v42, %v6220_v45  ;;  %v6492_v26 = vld [vmem:[#allocation8 + $0x398] sm:$0xf0]  ;;  %v8941_v42 = vld [vmem:[#allocation8 + $0x5ec] sm:$0xf] }
 0x1e7   :  { %4333 = vmatpush.bf16.msrb.mxu3 %v8043_v33  ;;  %4296 = vmatpush.bf16.msrb.mxu0 %v7627_v21  ;;  %v9207_v33 = vld [vmem:[#allocation8 + $0xe34] sm:$0xf0]  ;;  %v4068_v21 = vadd.f32 %v4067_v25, %v4055_v44  ;;  %v8801_v25 = vld [vmem:[#allocation8 + $0x18c] sm:$0xf]  ;;  %v6796_v45 = vld [vmem:[#allocation8 + $0x5f8] sm:$0xf0] }
 0x1e8   :  { %4309 = vmatpush.bf16.msrb.mxu1 %v7755_v38  ;;  %v7978_v38 = vld [vmem:[#allocation8 + $0xf28] sm:$0xf]  ;;  %v9203_v44 = vld [vmem:[#allocation8 + $0xe14] sm:$0xf0]  ;;  %v4069_v6 = vpop.f32.mrf.mxu2 }
 0x1e9   :  { %v9931_v46 = vadd.f32 %v4080_v34, %v4068_v21  ;;  %v7979_v30 = vor.u32 %v9239_v39, %v7978_v38  ;;  %v7835_v63 = vor.u32 %v9203_v44, %v7834_v1  ;;  %v8837_v21 = vld [vmem:[#allocation8 + $0x2ac] sm:$0xf]  ;;  %v6380_v34 = vld [vmem:[#allocation8 + $0x2b8] sm:$0xf0] }
 0x1ea   :  { %4321 = vmatpush.bf16.msrb.mxu2 %v7899_v48  ;;  %v7851_v48 = vor.u32 %v9207_v33, %v7850_v32  ;;  %v6111_v33 = vor.u32 %v8769_v19, %v6108_v22  ;;  %v6508_v38 = vld [vmem:[#allocation8 + $0x3b8] sm:$0xf0]  ;;  %v8765_v39 = vld [vmem:[#allocation8 + $0x6c] sm:$0xf] }
 0x1eb   :  { %4334 = vmatpush.bf16.msrb.mxu3 %v8027_v24  ;;  %4297 = vmatpush.bf16.msrb.mxu0 %v7611_v50  ;;  %v8809_v24 = vld [vmem:[#allocation8 + $0x1cc] sm:$0xf]  ;;  %v6268_v50 = vld [vmem:[#allocation8 + $0x1d8] sm:$0xf0] }
 0x1ec   :  { %4310 = vmatpush.bf16.msrb.mxu1 %v7739_v52  ;;  %v9235_v52 = vld [vmem:[#allocation8 + $0xf14] sm:$0xf0]  ;;  %v6271_v56 = vor.u32 %v8809_v24, %v6268_v50  ;;  %v6383_v24 = vor.u32 %v8837_v21, %v6380_v34  ;;  %v6348_v6 = vld [vmem:[#allocation8 + $0x278] sm:$0xf0]  ;;  %v8753_v21 = vld [vmem:[#allocation8 + $0xc] sm:$0xf] }
 0x1ed   :  { %v7963_v8 = vor.u32 %v9235_v52, %v7962_v41  ;;  %v8833_v41 = vld [vmem:[#allocation8 + $0x28c] sm:$0xf]  ;;  %v6364_v52 = vld [vmem:[#allocation8 + $0x298] sm:$0xf0] }
 0x1ee   :  { %4322 = vmatpush.bf16.msrb.mxu2 %v7883_v61  ;;  %v8773_v61 = vld [vmem:[#allocation8 + $0xac] sm:$0xf]  ;;  %v6044_v34 = vld [vmem:[#allocation8 + $0x18] sm:$0xf0] }
 0x1ef   :  { %4335 = vmatpush.bf16.msrb.mxu3 %v8011_v4  ;;  %4298 = vmatpush.bf16.msrb.mxu0 %v7595_v5  ;;  %v8805_v4 = vld [vmem:[#allocation8 + $0x1ac] sm:$0xf]  ;;  %v6252_v5 = vld [vmem:[#allocation8 + $0x1b8] sm:$0xf0]  ;;  %v6127_v10 = vor.u32 %v8773_v61, %v6124_v62 }
 0x1f0   :  { %4311 = vmatpush.bf16.msrb.mxu1 %v7723_v9  ;;  %v4082_v9 = vpop.f32.mrf.mxu3  ;;  %v6255_v17 = vor.u32 %v8805_v4, %v6252_v5  ;;  %v8793_v61 = vld [vmem:[#allocation8 + $0x14c] sm:$0xf]  ;;  %v6204_v62 = vld [vmem:[#allocation8 + $0x158] sm:$0xf0] }
 0x1f1   :  { %v8829_v5 = vld [vmem:[#allocation8 + $0x26c] sm:$0xf]  ;;  %v6476_v9 = vld [vmem:[#allocation8 + $0x378] sm:$0xf0] }
 0x1f2   :  { %4323 = vmatpush.bf16.msrb.mxu2 %v7867_v18  ;;  %v6524_v18 = vld [vmem:[#allocation8 + $0x3d8] sm:$0xf0] }
 0x1f3   :  { %4336 = vmatpush.bf16.msrb.mxu3 %v7995_v36  ;;  %4299 = vmatpush.bf16.msrb.mxu0 %v7579_v31  ;;  %v6236_v36 = vld [vmem:[#allocation8 + $0x198] sm:$0xf0]  ;;  %v6399_v31 = vor.u32 %v8841_v11, %v6396_v13  ;;  %v6527_v32 = vor.u32 %v8873_v15, %v6524_v18  ;;  %v8789_v11 = vld [vmem:[#allocation8 + $0x12c] sm:$0xf] }
 0x1f4   :  { %4312 = vmatpush.bf16.msrb.mxu1 %v7707_v23  ;;  %v8869_v23 = vld [vmem:[#allocation8 + $0x3ac] sm:$0xf]  ;;  %v6188_v13 = vld [vmem:[#allocation8 + $0x138] sm:$0xf0] }
 0x1f5   :  { %v8825_v18 = vld [vmem:[#allocation8 + $0x24c] sm:$0xf] }
 0x1f6   :  { %4324 = vmatpush.bf16.msrb.mxu2 %v7851_v48  ;;  %4300 = vmatmul.bf16.vlgmr.msrb.gmra.mxu0 %v9876_v37  ;;  %v4093_v48 = vpop.f32.mrf.mxu0  ;;  %v4106_v1 = vpop.f32.mrf.mxu1 }
 0x1f7   :  { %4344 = vmatpush.bf16.msra.mxu0 %v6159_v27  ;;  %4337 = vmatpush.bf16.msrb.mxu3 %v7979_v30  ;;  %v6239_v27 = vor.u32 %v8801_v25, %v6236_v36  ;;  %v4094_v50 = vadd.f32 %v4093_v48, %v9931_v46  ;;  %v6511_v30 = vor.u32 %v8869_v23, %v6508_v38  ;;  %v6332_v36 = vld [vmem:[#allocation8 + $0x258] sm:$0xf0]  ;;  %v8785_v23 = vld [vmem:[#allocation8 + $0x10c] sm:$0xf] }
 0x1f8   :  { %4357 = vmatpush.bf16.msra.mxu1 %v6287_v40  ;;  %v6092_v40 = vld [vmem:[#allocation8 + $0x78] sm:$0xf0]  ;;  %v8909_v38 = vld [vmem:[#allocation8 + $0x4ec] sm:$0xf] }
 0x1f9   :  { %4313 = vmatmul.bf16.vlgmr.msrb.gmra.mxu1 %v9878_v43  ;;  %v6095_v44 = vor.u32 %v8765_v39, %v6092_v40  ;;  %v4107_v58 = vadd.f32 %v4106_v1, %v4094_v50  ;;  %v6668_v39 = vld [vmem:[#allocation8 + $0x4f8] sm:$0xf0]  ;;  %v6335_v40 = vor.u32 %v8825_v18, %v6332_v36  ;;  %v6047_v50 = vor.u32 %v8753_v21, %v6044_v34  ;;  %v8821_v1 = vld [vmem:[#allocation8 + $0x22c] sm:$0xf] }
 0x1fa   :  { %4325 = vmatpush.bf16.msrb.mxu2 %v7835_v63  ;;  %v6367_v63 = vor.u32 %v8833_v41, %v6364_v52  ;;  %v6636_v18 = vld [vmem:[#allocation8 + $0x4b8] sm:$0xf0] }
 0x1fb   :  { %4345 = vmatpush.bf16.msra.mxu0 %v6143_v53  ;;  %4338 = vmatpush.bf16.msrb.mxu3 %v7963_v8  ;;  %v8865_v53 = vld [vmem:[#allocation8 + $0x38c] sm:$0xf] }
 0x1fc   :  { %4358 = vmatpush.bf16.msra.mxu1 %v6271_v56  ;;  %v6076_v56 = vld [vmem:[#allocation8 + $0x58] sm:$0xf0]  ;;  %v6495_v46 = vor.u32 %v8865_v53, %v6492_v26  ;;  %v8861_v8 = vld [vmem:[#allocation8 + $0x36c] sm:$0xf]  ;;  %v6671_v53 = vor.u32 %v8909_v38, %v6668_v39 }
 0x1fd   :  { %4326 = vmatmul.bf16.vlgmr.msrb.gmra.mxu2 %v9882_v7  ;;  %v6079_v4 = vor.u32 %v8761_v54, %v6076_v56  ;;  %v6479_v22 = vor.u32 %v8861_v8, %v6476_v9  ;;  %v6444_v26 = vld [vmem:[#allocation8 + $0x338] sm:$0xf0]  ;;  %v6799_v54 = vor.u32 %v8941_v42, %v6796_v45  ;;  %v8905_v56 = vld [vmem:[#allocation8 + $0x4cc] sm:$0xf] }
 0x1fe   :  { %4370 = vmatpush.bf16.msra.mxu2 %v6415_v3  ;;  %4339 = vmatmul.bf16.vlgmr.msrb.gmra.mxu3 %v9884_v12  ;;  %v6207_v3 = vor.u32 %v8793_v61, %v6204_v62  ;;  %v4095_v15 = vpop.f32.mrf.mxu0  ;;  %v4108_v19 = vpop.f32.mrf.mxu1  ;;  %v6652_v61 = vld [vmem:[#allocation8 + $0x4d8] sm:$0xf0]  ;;  %v8849_v8 = vld [vmem:[#allocation8 + $0x30c] sm:$0xf] }
 0x1ff   :  { %4383 = vmatpush.bf16.msra.mxu3 %v6543_v2  ;;  %4346 = vmatpush.bf16.msra.mxu0 %v6127_v10  ;;  %v8757_v2 = vld [vmem:[#allocation8 + $0x2c] sm:$0xf]  ;;  %v6060_v10 = vld [vmem:[#allocation8 + $0x38] sm:$0xf0]  ;;  %v6655_v9 = vor.u32 %v8905_v56, %v6652_v61 }
 0x200   :  { %4359 = vmatpush.bf16.msra.mxu1 %v6255_v17  ;;  %v6351_v17 = vor.u32 %v8829_v5, %v6348_v6  ;;  %v6063_v25 = vor.u32 %v8757_v2, %v6060_v10  ;;  %v4119_v48 = vpop.f32.mrf.mxu2  ;;  %v8817_v5 = vld [vmem:[#allocation8 + $0x20c] sm:$0xf]  ;;  %v6924_v10 = vld [vmem:[#allocation8 + $0x6f8] sm:$0xf0] }
 0x201   :  { %v4132_v41 = vpop.f32.mrf.mxu3  ;;  %v8973_v2 = vld [vmem:[#allocation8 + $0x6ec] sm:$0xf]  ;;  %v7052_v15 = vld [vmem:[#allocation8 + $0x7f8] sm:$0xf0] }
 0x202   :  { %4371 = vmatpush.bf16.msra.mxu2 %v6399_v31  ;;  %v8857_v31 = vld [vmem:[#allocation8 + $0x34c] sm:$0xf]  ;;  %v6620_v42 = vld [vmem:[#allocation8 + $0x498] sm:$0xf0] }
 0x203   :  { %4384 = vmatpush.bf16.msra.mxu3 %v6527_v32  ;;  %4347 = vmatpush.bf16.msra.mxu0 %v6111_v33  ;;  %v6460_v32 = vld [vmem:[#allocation8 + $0x358] sm:$0xf0]  ;;  %v6191_v33 = vor.u32 %v8789_v11, %v6188_v13  ;;  %v9005_v11 = vld [vmem:[#allocation8 + $0x7ec] sm:$0xf] }
 0x204   :  { %4360 = vmatpush.bf16.msra.mxu1 %v6239_v27  ;;  %v6172_v27 = vld [vmem:[#allocation8 + $0x118] sm:$0xf0]  ;;  %v7055_v21 = vor.u32 %v9005_v11, %v7052_v15  ;;  %v9001_v38 = vld [vmem:[#allocation8 + $0x7cc] sm:$0xf] }
 0x205   :  { %v6175_v52 = vor.u32 %v8785_v23, %v6172_v27  ;;  %v8969_v23 = vld [vmem:[#allocation8 + $0x6cc] sm:$0xf]  ;;  %v6908_v27 = vld [vmem:[#allocation8 + $0x6d8] sm:$0xf0] }
 0x206   :  { %4372 = vmatpush.bf16.msra.mxu2 %v6383_v24  ;;  %v6463_v24 = vor.u32 %v8857_v31, %v6460_v32  ;;  %v6927_v32 = vor.u32 %v8973_v2, %v6924_v10  ;;  %v8929_v45 = vld [vmem:[#allocation8 + $0x58c] sm:$0xf]  ;;  %v6732_v61 = vld [vmem:[#allocation8 + $0x578] sm:$0xf0] }
 0x207   :  { %4385 = vmatpush.bf16.msra.mxu3 %v6511_v30  ;;  %4348 = vmatpush.bf16.msra.mxu0 %v6095_v44  ;;  %v6316_v30 = vld [vmem:[#allocation8 + $0x238] sm:$0xf0]  ;;  %v4120_v44 = vadd.f32 %v4119_v48, %v4107_v58  ;;  %v8925_v56 = vld [vmem:[#allocation8 + $0x56c] sm:$0xf] }
 0x208   :  { %4361 = vmatpush.bf16.msra.mxu1 %v6223_v47  ;;  %v8853_v47 = vld [vmem:[#allocation8 + $0x32c] sm:$0xf]  ;;  %v6300_v58 = vld [vmem:[#allocation8 + $0x218] sm:$0xf0]  ;;  %v4121_v36 = vpop.f32.mrf.mxu2 }
 0x209   :  { %v9938_v62 = vadd.f32 %v4132_v41, %v4120_v44  ;;  %v6447_v6 = vor.u32 %v8853_v47, %v6444_v26  ;;  %v6303_v19 = vor.u32 %v8817_v5, %v6300_v58  ;;  %v6748_v48 = vld [vmem:[#allocation8 + $0x598] sm:$0xf0]  ;;  %v8965_v44 = vld [vmem:[#allocation8 + $0x6ac] sm:$0xf] }
 0x20a   :  { %4373 = vmatpush.bf16.msra.mxu2 %v6367_v63  ;;  %v6319_v63 = vor.u32 %v8821_v1, %v6316_v30  ;;  %v6892_v41 = vld [vmem:[#allocation8 + $0x6b8] sm:$0xf0]  ;;  %v8893_v26 = vld [vmem:[#allocation8 + $0x46c] sm:$0xf] }
 0x20b   :  { %4386 = vmatpush.bf16.msra.mxu3 %v6495_v46  ;;  %4349 = vmatpush.bf16.msra.mxu0 %v6079_v4  ;;  %v8937_v46 = vld [vmem:[#allocation8 + $0x5cc] sm:$0xf]  ;;  %v6780_v4 = vld [vmem:[#allocation8 + $0x5d8] sm:$0xf0] }
 0x20c   :  { %4362 = vmatpush.bf16.msra.mxu1 %v6207_v3  ;;  %v6428_v3 = vld [vmem:[#allocation8 + $0x318] sm:$0xf0]  ;;  %v6783_v13 = vor.u32 %v8937_v46, %v6780_v4  ;;  %v6895_v46 = vor.u32 %v8965_v44, %v6892_v41  ;;  %v8889_v10 = vld [vmem:[#allocation8 + $0x44c] sm:$0xf] }
 0x20d   :  { %v6431_v31 = vor.u32 %v8849_v8, %v6428_v3  ;;  %v7020_v47 = vld [vmem:[#allocation8 + $0x7b8] sm:$0xf0]  ;;  %v8961_v8 = vld [vmem:[#allocation8 + $0x68c] sm:$0xf] }
 0x20e   :  { %4374 = vmatpush.bf16.msra.mxu2 %v6351_v17  ;;  %v8901_v17 = vld [vmem:[#allocation8 + $0x4ac] sm:$0xf]  ;;  %v7004_v2 = vld [vmem:[#allocation8 + $0x798] sm:$0xf0] }
 0x20f   :  { %4387 = vmatpush.bf16.msra.mxu3 %v6479_v22  ;;  %4350 = vmatpush.bf16.msra.mxu0 %v6063_v25  ;;  %v8933_v22 = vld [vmem:[#allocation8 + $0x5ac] sm:$0xf]  ;;  %v6764_v25 = vld [vmem:[#allocation8 + $0x5b8] sm:$0xf0]  ;;  %v6639_v34 = vor.u32 %v8901_v17, %v6636_v18 }
 0x210   :  { %4363 = vmatpush.bf16.msra.mxu1 %v6191_v33  ;;  %v4134_v33 = vpop.f32.mrf.mxu3  ;;  %v6767_v39 = vor.u32 %v8933_v22, %v6764_v25  ;;  %v8993_v3 = vld [vmem:[#allocation8 + $0x78c] sm:$0xf]  ;;  %v6588_v11 = vld [vmem:[#allocation8 + $0x458] sm:$0xf0] }
 0x211   :  { %v6716_v15 = vld [vmem:[#allocation8 + $0x558] sm:$0xf0]  ;;  %v7007_v18 = vor.u32 %v8993_v3, %v7004_v2  ;;  %v8957_v22 = vld [vmem:[#allocation8 + $0x66c] sm:$0xf] }
 0x212   :  { %4375 = vmatpush.bf16.msra.mxu2 %v6335_v40  ;;  %v7036_v40 = vld [vmem:[#allocation8 + $0x7d8] sm:$0xf0]  ;;  %v8989_v36 = vld [vmem:[#allocation8 + $0x76c] sm:$0xf] }
 0x213   :  { %4388 = vmatpush.bf16.msra.mxu3 %v6463_v24  ;;  %4351 = vmatpush.bf16.msra.mxu0 %v6047_v50  ;;  %v9440_v24 = vld [vmem:[#allocation10] sm:$0xf]  ;;  %v7039_v1 = vor.u32 %v9001_v38, %v7036_v40  ;;  %v6860_v25 = vld [vmem:[#allocation8 + $0x678] sm:$0xf0]  ;;  %v8885_v33 = vld [vmem:[#allocation8 + $0x42c] sm:$0xf] }
 0x214   :  { %4364 = vmatpush.bf16.msra.mxu1 %v6175_v52  ;;  %v1154_v50 = vperm.slane %v9440_v24, 2  ;;  %v8997_v52 = vld [vmem:[#allocation8 + $0x7ac] sm:$0xf]  ;;  %v6863_v38 = vor.u32 %v8957_v22, %v6860_v25  ;;  %v6684_v44 = vld [vmem:[#allocation8 + $0x518] sm:$0xf0] }
 0x215   :  { %v9037_v41 = vld [vmem:[#allocation8 + $0x8ec] sm:$0xf]  ;;  %v7164_v2 = vld [vmem:[#allocation8 + $0x8d8] sm:$0xf0] }
 0x216   :  { %4376 = vmatpush.bf16.msra.mxu2 %v6319_v63  ;;  %4352 = vmatmul.bf16.vlgmr.msra.gmra.mxu0 %v9825_v51  ;;  %v8897_v51 = vld [vmem:[#allocation8 + $0x48c] sm:$0xf]  ;;  %v4145_v63 = vpop.f32.mrf.mxu0  ;;  %v4158_v5 = vpop.f32.mrf.mxu1  ;;  %v6940_v22 = vld [vmem:[#allocation8 + $0x718] sm:$0xf0] }
 0x217   :  { %4396 = vmatpush.bf16.msrb.mxu0 %v6671_v53  ;;  %4389 = vmatpush.bf16.msra.mxu3 %v6447_v6  ;;  %v6623_v30 = vor.u32 %v8897_v51, %v6620_v42  ;;  %v6751_v53 = vor.u32 %v8929_v45, %v6748_v48  ;;  %v4146_v4 = vadd.f32 %v4145_v63, %v1154_v50  ;;  %v6844_v45 = vld [vmem:[#allocation8 + $0x658] sm:$0xf0]  ;;  %v8985_v48 = vld [vmem:[#allocation8 + $0x74c] sm:$0xf] }
 0x218   :  { %4409 = vmatpush.bf16.msrb.mxu1 %v6799_v54  ;;  %v6604_v54 = vld [vmem:[#allocation8 + $0x478] sm:$0xf0]  ;;  %v7023_v6 = vor.u32 %v8997_v52, %v7020_v47  ;;  %v8881_v50 = vld [vmem:[#allocation8 + $0x40c] sm:$0xf] }
 0x219   :  { %4365 = vmatmul.bf16.vlgmr.msra.gmra.mxu1 %v9828_v55  ;;  %v6911_v55 = vor.u32 %v8969_v23, %v6908_v27  ;;  %v6607_v58 = vor.u32 %v8893_v26, %v6604_v54  ;;  %v6700_v23 = vld [vmem:[#allocation8 + $0x538] sm:$0xf0]  ;;  %v9069_v47 = vld [vmem:[#allocation8 + $0x9ec] sm:$0xf] }
 0x21a   :  { %4377 = vmatpush.bf16.msra.mxu2 %v6303_v19  ;;  %v6591_v19 = vor.u32 %v8889_v10, %v6588_v11  ;;  %v7180_v52 = vld [vmem:[#allocation8 + $0x8f8] sm:$0xf0]  ;;  %v8949_v63 = vld [vmem:[#allocation8 + $0x62c] sm:$0xf] }
 0x21b   :  { %4397 = vmatpush.bf16.msrb.mxu0 %v6655_v9  ;;  %4390 = vmatpush.bf16.msra.mxu3 %v6431_v31  ;;  %v6735_v9 = vor.u32 %v8925_v56, %v6732_v61  ;;  %v7308_v26 = vld [vmem:[#allocation8 + $0x9f8] sm:$0xf0] }
 0x21c   :  { %4410 = vmatpush.bf16.msrb.mxu1 %v6783_v13  ;;  %v8921_v13 = vld [vmem:[#allocation8 + $0x54c] sm:$0xf]  ;;  %v7311_v3 = vor.u32 %v9069_v47, %v7308_v26 }
 0x21d   :  { %4378 = vmatmul.bf16.vlgmr.msra.gmra.mxu2 %v9833_v14  ;;  %v6876_v14 = vld [vmem:[#allocation8 + $0x698] sm:$0xf0]  ;;  %v6719_v31 = vor.u32 %v8921_v13, %v6716_v15  ;;  %v9065_v13 = vld [vmem:[#allocation8 + $0x9cc] sm:$0xf] }
 0x21e   :  { %4422 = vmatpush.bf16.msrb.mxu2 %v6927_v32  ;;  %4391 = vmatmul.bf16.vlgmr.msra.gmra.mxu3 %v9835_v20  ;;  %v4159_v20 = vadd.f32 %v4158_v5, %v4146_v4  ;;  %v6879_v17 = vor.u32 %v8961_v8, %v6876_v14  ;;  %v6988_v32 = vld [vmem:[#allocation8 + $0x778] sm:$0xf0]  ;;  %v4147_v27 = vpop.f32.mrf.mxu0  ;;  %v4160_v40 = vpop.f32.mrf.mxu1  ;;  %v8981_v8 = vld [vmem:[#allocation8 + $0x72c] sm:$0xf] }
 0x21f   :  { %4435 = vmatpush.bf16.msrb.mxu3 %v7055_v21  ;;  %4398 = vmatpush.bf16.msrb.mxu0 %v6639_v34  ;;  %v6572_v21 = vld [vmem:[#allocation8 + $0x438] sm:$0xf0]  ;;  %v8917_v34 = vld [vmem:[#allocation8 + $0x52c] sm:$0xf]  ;;  %v6991_v51 = vor.u32 %v8989_v36, %v6988_v32 }
 0x220   :  { %4411 = vmatpush.bf16.msrb.mxu1 %v6767_v39  ;;  %v8953_v39 = vld [vmem:[#allocation8 + $0x64c] sm:$0xf]  ;;  %v6575_v42 = vor.u32 %v8885_v33, %v6572_v21  ;;  %v6703_v24 = vor.u32 %v8917_v34, %v6700_v23  ;;  %v4171_v54 = vpop.f32.mrf.mxu2  ;;  %v6956_v14 = vld [vmem:[#allocation8 + $0x738] sm:$0xf0] }
 0x221   :  { %v4172_v4 = vadd.f32 %v4171_v54, %v4159_v20  ;;  %v4184_v5 = vpop.f32.mrf.mxu3  ;;  %v7292_v15 = vld [vmem:[#allocation8 + $0x9d8] sm:$0xf0]  ;;  %v9101_v36 = vld [vmem:[#allocation8 + $0xaec] sm:$0xf] }
 0x222   :  { %4423 = vmatpush.bf16.msrb.mxu2 %v6911_v55  ;;  %v6972_v55 = vld [vmem:[#allocation8 + $0x758] sm:$0xf0]  ;;  %v9133_v32 = vld [vmem:[#allocation8 + $0xbec] sm:$0xf]  ;;  %v7295_v33 = vor.u32 %v9065_v13, %v7292_v15 }
 0x223   :  { %4436 = vmatpush.bf16.msrb.mxu3 %v7039_v1  ;;  %4399 = vmatpush.bf16.msrb.mxu0 %v6623_v30  ;;  %v6556_v1 = vld [vmem:[#allocation8 + $0x418] sm:$0xf0]  ;;  %v8913_v30 = vld [vmem:[#allocation8 + $0x50c] sm:$0xf]  ;;  %v6975_v56 = vor.u32 %v8985_v48, %v6972_v55  ;;  %v9944_v10 = vadd.f32 %v4184_v5, %v4172_v4 }
 0x224   :  { %4412 = vmatpush.bf16.msrb.mxu1 %v6751_v53  ;;  %v6847_v53 = vor.u32 %v8953_v39, %v6844_v45  ;;  %v6559_v61 = vor.u32 %v8881_v50, %v6556_v1  ;;  %v6812_v20 = vld [vmem:[#allocation8 + $0x618] sm:$0xf0]  ;;  %v9029_v34 = vld [vmem:[#allocation8 + $0x8ac] sm:$0xf] }
 0x225   :  { %v7564_v21 = vld [vmem:[#allocation8 + $0xbf8] sm:$0xf0]  ;;  %v9129_v1 = vld [vmem:[#allocation8 + $0xbcc] sm:$0xf] }
 0x226   :  { %4424 = vmatpush.bf16.msrb.mxu2 %v6895_v46  ;;  %v6828_v46 = vld [vmem:[#allocation8 + $0x638] sm:$0xf0]  ;;  %v7567_v48 = vor.u32 %v9133_v32, %v7564_v21  ;;  %v9093_v54 = vld [vmem:[#allocation8 + $0xaac] sm:$0xf] }
 0x227   :  { %4437 = vmatpush.bf16.msrb.mxu3 %v7023_v6  ;;  %4400 = vmatpush.bf16.msrb.mxu0 %v6607_v58  ;;  %v6687_v6 = vor.u32 %v8913_v30, %v6684_v44  ;;  %v7183_v58 = vor.u32 %v9037_v41, %v7180_v52  ;;  %v6831_v11 = vor.u32 %v8949_v63, %v6828_v46  ;;  %v7148_v23 = vld [vmem:[#allocation8 + $0x8b8] sm:$0xf0]  ;;  %v9057_v52 = vld [vmem:[#allocation8 + $0x98c] sm:$0xf] }
 0x228   :  { %4413 = vmatpush.bf16.msrb.mxu1 %v6735_v9  ;;  %v9033_v9 = vld [vmem:[#allocation8 + $0x8cc] sm:$0xf]  ;;  %v7276_v39 = vld [vmem:[#allocation8 + $0x9b8] sm:$0xf0]  ;;  %v4173_v40 = vpop.f32.mrf.mxu2  ;;  %v7151_v55 = vor.u32 %v9029_v34, %v7148_v23 }
 0x229   :  { %v7167_v25 = vor.u32 %v9033_v9, %v7164_v2  ;;  %v4186_v45 = vpop.f32.mrf.mxu3  ;;  %v7420_v50 = vld [vmem:[#allocation8 + $0xad8] sm:$0xf0]  ;;  %v9021_v4 = vld [vmem:[#allocation8 + $0x86c] sm:$0xf] }
 0x22a   :  { %4425 = vmatpush.bf16.msrb.mxu2 %v6879_v17  ;;  %v8945_v17 = vld [vmem:[#allocation8 + $0x60c] sm:$0xf]  ;;  %v7548_v44 = vld [vmem:[#allocation8 + $0xbd8] sm:$0xf0] }
 0x22b   :  { %4438 = vmatpush.bf16.msrb.mxu3 %v7007_v18  ;;  %4401 = vmatpush.bf16.msrb.mxu0 %v6591_v19  ;;  %v6959_v18 = vor.u32 %v8981_v8, %v6956_v14  ;;  %v8977_v19 = vld [vmem:[#allocation8 + $0x70c] sm:$0xf]  ;;  %v6815_v27 = vor.u32 %v8945_v17, %v6812_v20  ;;  %v7132_v41 = vld [vmem:[#allocation8 + $0x898] sm:$0xf0]  ;;  %v7551_v47 = vor.u32 %v9129_v1, %v7548_v44 }
 0x22c   :  { %4414 = vmatpush.bf16.msrb.mxu1 %v6719_v31  ;;  %v7436_v31 = vld [vmem:[#allocation8 + $0xaf8] sm:$0xf0]  ;;  %v9121_v13 = vld [vmem:[#allocation8 + $0xb8c] sm:$0xf] }
 0x22d   :  { %v7532_v46 = vld [vmem:[#allocation8 + $0xbb8] sm:$0xf0]  ;;  %v9049_v20 = vld [vmem:[#allocation8 + $0x94c] sm:$0xf] }
 0x22e   :  { %4426 = vmatpush.bf16.msrb.mxu2 %v6863_v38  ;;  %v9061_v38 = vld [vmem:[#allocation8 + $0x9ac] sm:$0xf]  ;;  %v7116_v5 = vld [vmem:[#allocation8 + $0x878] sm:$0xf0] }
 0x22f   :  { %4439 = vmatpush.bf16.msrb.mxu3 %v6991_v51  ;;  %4402 = vmatpush.bf16.msrb.mxu0 %v6575_v42  ;;  %v6943_v51 = vor.u32 %v8977_v19, %v6940_v22  ;;  %v7439_v42 = vor.u32 %v9101_v36, %v7436_v31  ;;  %v7279_v30 = vor.u32 %v9061_v38, %v7276_v39  ;;  %v7516_v17 = vld [vmem:[#allocation8 + $0xb98] sm:$0xf0]  ;;  %v9085_v31 = vld [vmem:[#allocation8 + $0xa6c] sm:$0xf] }
 0x230   :  { %4415 = vmatpush.bf16.msrb.mxu1 %v6703_v24  ;;  %v9097_v24 = vld [vmem:[#allocation8 + $0xacc] sm:$0xf]  ;;  %v7119_v2 = vor.u32 %v9021_v4, %v7116_v5  ;;  %v7228_v19 = vld [vmem:[#allocation8 + $0x958] sm:$0xf0] }
 0x231   :  { %v7372_v32 = vld [vmem:[#allocation8 + $0xa78] sm:$0xf0]  ;;  %v7231_v21 = vor.u32 %v9049_v20, %v7228_v19  ;;  %v9013_v23 = vld [vmem:[#allocation8 + $0x82c] sm:$0xf] }
 0x232   :  { %4427 = vmatpush.bf16.msrb.mxu2 %v6847_v53  ;;  %v7260_v53 = vld [vmem:[#allocation8 + $0x998] sm:$0xf0]  ;;  %v9045_v38 = vld [vmem:[#allocation8 + $0x92c] sm:$0xf] }
 0x233   :  { %4440 = vmatpush.bf16.msrb.mxu3 %v6975_v56  ;;  %4403 = vmatpush.bf16.msrb.mxu0 %v6559_v61  ;;  %v7404_v56 = vld [vmem:[#allocation8 + $0xab8] sm:$0xf0]  ;;  %v9125_v61 = vld [vmem:[#allocation8 + $0xbac] sm:$0xf]  ;;  %v7263_v63 = vor.u32 %v9057_v52, %v7260_v53  ;;  %v9950_v8 = vpop.f32.mrf.mxu0 }
 0x234   :  { %4416 = vmatpush.bf16.msrb.mxu1 %v6687_v6  ;;  %v9053_v6 = vld [vmem:[#allocation8 + $0x96c] sm:$0xf]  ;;  %v7407_v14 = vor.u32 %v9093_v54, %v7404_v56  ;;  %v7535_v9 = vor.u32 %v9125_v61, %v7532_v46  ;;  %v7500_v34 = vld [vmem:[#allocation8 + $0xb78] sm:$0xf0] }
 0x235   :  { %v7212_v39 = vld [vmem:[#allocation8 + $0x938] sm:$0xf0]  ;;  %v9009_v44 = vld [vmem:[#allocation8 + $0x80c] sm:$0xf] }
 0x236   :  { %4428 = vmatpush.bf16.msrb.mxu2 %v6831_v11  ;;  %4404 = vmatmul.bf16.vlgmr.msrb.gmra.mxu0 %v9842_v59  ;;  %v9025_v59 = vld [vmem:[#allocation8 + $0x88c] sm:$0xf]  ;;  %v7388_v11 = vld [vmem:[#allocation8 + $0xa98] sm:$0xf0] }
 0x237   :  { %4448 = vmatpush.bf16.msra.mxu0 %v7183_v58  ;;  %4441 = vmatpush.bf16.msrb.mxu3 %v6959_v18  ;;  %v7135_v26 = vor.u32 %v9025_v59, %v7132_v41  ;;  %v7244_v58 = vld [vmem:[#allocation8 + $0x978] sm:$0xf0]  ;;  %v9017_v18 = vld [vmem:[#allocation8 + $0x84c] sm:$0xf] }
 0x238   :  { %4461 = vmatpush.bf16.msra.mxu1 %v7311_v3  ;;  %v9952_v3 = vpop.f32.mrf.mxu1  ;;  %v7247_v15 = vor.u32 %v9053_v6, %v7244_v58  ;;  %v7484_v1 = vld [vmem:[#allocation8 + $0xb58] sm:$0xf0]  ;;  %v9041_v41 = vld [vmem:[#allocation8 + $0x90c] sm:$0xf] }
 0x239   :  { %4417 = vmatmul.bf16.vlgmr.msrb.gmra.mxu1 %v9844_v0  ;;  %v7423_v0 = vor.u32 %v9097_v24, %v7420_v50  ;;  %v7356_v24 = vld [vmem:[#allocation8 + $0xa58] sm:$0xf0]  ;;  %v9113_v50 = vld [vmem:[#allocation8 + $0xb4c] sm:$0xf] }
 0x23a   :  { %4429 = vmatpush.bf16.msrb.mxu2 %v6815_v27  ;;  %v7084_v27 = vld [vmem:[#allocation8 + $0x838] sm:$0xf0]  ;;  %v9165_v53 = vld [vmem:[#allocation8 + $0xcec] sm:$0xf]  ;;  %v7487_v61 = vor.u32 %v9113_v50, %v7484_v1 }
 0x23b   :  { %4449 = vmatpush.bf16.msra.mxu0 %v7167_v25  ;;  %4442 = vmatpush.bf16.msrb.mxu3 %v6943_v51  ;;  %v7519_v25 = vor.u32 %v9121_v13, %v7516_v17  ;;  %v4199_v40 = vpop.f32.mrf.mxu0  ;;  %v7375_v51 = vor.u32 %v9085_v31, %v7372_v32  ;;  %v7068_v59 = vld [vmem:[#allocation8 + $0x818] sm:$0xf0]  ;;  %v9077_v46 = vld [vmem:[#allocation8 + $0xa2c] sm:$0xf] }
 0x23c   :  { %4462 = vmatpush.bf16.msra.mxu1 %v7295_v33  ;;  %v9117_v33 = vld [vmem:[#allocation8 + $0xb6c] sm:$0xf]  ;;  %v7196_v52 = vld [vmem:[#allocation8 + $0x918] sm:$0xf0] }
 0x23d   :  { %4430 = vmatmul.bf16.vlgmr.msrb.gmra.mxu2 %v9850_v29  ;;  %v9089_v29 = vld [vmem:[#allocation8 + $0xa8c] sm:$0xf]  ;;  %v7820_v54 = vld [vmem:[#allocation8 + $0xdf8] sm:$0xf0]  ;;  %v7199_v6 = vor.u32 %v9041_v41, %v7196_v52 }
 0x23e   :  { %4474 = vmatpush.bf16.msra.mxu2 %v7439_v42  ;;  %4443 = vmatmul.bf16.vlgmr.msrb.gmra.mxu3 %v9852_v35  ;;  %v7100_v35 = vld [vmem:[#allocation8 + $0x858] sm:$0xf0]  ;;  %v7391_v22 = vor.u32 %v9089_v29, %v7388_v11  ;;  %v9081_v42 = vld [vmem:[#allocation8 + $0xa4c] sm:$0xf] }
 0x23f   :  { %4487 = vmatpush.bf16.msra.mxu3 %v7567_v48  ;;  %4450 = vmatpush.bf16.msra.mxu0 %v7151_v55  ;;  %v7103_v36 = vor.u32 %v9017_v18, %v7100_v35  ;;  %v7503_v48 = vor.u32 %v9117_v33, %v7500_v34  ;;  %v7087_v55 = vor.u32 %v9013_v23, %v7084_v27  ;;  %v7340_v4 = vld [vmem:[#allocation8 + $0xa38] sm:$0xf0]  ;;  %v9161_v29 = vld [vmem:[#allocation8 + $0xccc] sm:$0xf] }
 0x240   :  { %4463 = vmatpush.bf16.msra.mxu1 %v7279_v30  ;;  %v4212_v45 = vpop.f32.mrf.mxu1  ;;  %v7215_v30 = vor.u32 %v9045_v38, %v7212_v39  ;;  %v9954_v56 = vpop.f32.mrf.mxu2  ;;  %v7676_v11 = vld [vmem:[#allocation8 + $0xcd8] sm:$0xf0]  ;;  %v7343_v13 = vor.u32 %v9077_v46, %v7340_v4  ;;  %v9073_v18 = vld [vmem:[#allocation8 + $0xa0c] sm:$0xf] }
 0x241   :  { %v9956_v5 = vpop.f32.mrf.mxu3  ;;  %v7804_v17 = vld [vmem:[#allocation8 + $0xdd8] sm:$0xf0]  ;;  %v9105_v19 = vld [vmem:[#allocation8 + $0xb0c] sm:$0xf] }
 0x242   :  { %4475 = vmatpush.bf16.msra.mxu2 %v7423_v0  ;;  %v7692_v0 = vld [vmem:[#allocation8 + $0xcf8] sm:$0xf0]  ;;  %v9261_v32 = vld [vmem:[#allocation8 + $0xfec] sm:$0xf] }
 0x243   :  { %4488 = vmatpush.bf16.msra.mxu3 %v7551_v47  ;;  %4451 = vmatpush.bf16.msra.mxu0 %v7135_v26  ;;  %v7359_v47 = vor.u32 %v9081_v42, %v7356_v24  ;;  %v9197_v26 = vld [vmem:[#allocation8 + $0xdec] sm:$0xf]  ;;  %v7695_v58 = vor.u32 %v9165_v53, %v7692_v0  ;;  %v7324_v20 = vld [vmem:[#allocation8 + $0xa18] sm:$0xf0] }
 0x244   :  { %4464 = vmatpush.bf16.msra.mxu1 %v7263_v63  ;;  %v7071_v63 = vor.u32 %v9009_v44, %v7068_v59  ;;  %v7948_v31 = vld [vmem:[#allocation8 + $0xef8] sm:$0xf0]  ;;  %v9157_v34 = vld [vmem:[#allocation8 + $0xcac] sm:$0xf]  ;;  %v7327_v27 = vor.u32 %v9073_v18, %v7324_v20 }
 0x245   :  { %v7660_v23 = vld [vmem:[#allocation8 + $0xcb8] sm:$0xf0]  ;;  %v9189_v38 = vld [vmem:[#allocation8 + $0xdac] sm:$0xf] }
 0x246   :  { %4476 = vmatpush.bf16.msra.mxu2 %v7407_v14  ;;  %v9109_v14 = vld [vmem:[#allocation8 + $0xb2c] sm:$0xf]  ;;  %v7788_v39 = vld [vmem:[#allocation8 + $0xdb8] sm:$0xf0] }
 0x247   :  { %4489 = vmatpush.bf16.msra.mxu3 %v7535_v9  ;;  %4452 = vmatpush.bf16.msra.mxu0 %v7119_v2  ;;  %v7468_v9 = vld [vmem:[#allocation8 + $0xb38] sm:$0xf0]  ;;  %v7823_v2 = vor.u32 %v9197_v26, %v7820_v54  ;;  %v9225_v24 = vld [vmem:[#allocation8 + $0xecc] sm:$0xf] }
 0x248   :  { %4465 = vmatpush.bf16.msra.mxu1 %v7247_v15  ;;  %v9193_v15 = vld [vmem:[#allocation8 + $0xdcc] sm:$0xf]  ;;  %v7471_v35 = vor.u32 %v9109_v14, %v7468_v9  ;;  %v4225_v40 = vpop.f32.mrf.mxu2  ;;  %v7932_v50 = vld [vmem:[#allocation8 + $0xed8] sm:$0xf0] }
 0x249   :  { %v7807_v33 = vor.u32 %v9193_v15, %v7804_v17  ;;  %v4238_v45 = vpop.f32.mrf.mxu3  ;;  %v9257_v1 = vld [vmem:[#allocation8 + $0xfcc] sm:$0xf]  ;;  %v8060_v44 = vld [vmem:[#allocation8 + $0xfd8] sm:$0xf0] }
 0x24a   :  { %4477 = vmatpush.bf16.msra.mxu2 %v7391_v22  ;;  %v7452_v22 = vld [vmem:[#allocation8 + $0xb18] sm:$0xf0]  ;;  %v9185_v41 = vld [vmem:[#allocation8 + $0xd8c] sm:$0xf]  ;;  %v8063_v53 = vor.u32 %v9257_v1, %v8060_v44 }
 0x24b   :  { %4490 = vmatpush.bf16.msra.mxu3 %v7519_v25  ;;  %4453 = vmatpush.bf16.msra.mxu0 %v7103_v36  ;;  %v7679_v25 = vor.u32 %v9161_v29, %v7676_v11  ;;  %v9229_v36 = vld [vmem:[#allocation8 + $0xeec] sm:$0xf]  ;;  %v7644_v59 = vld [vmem:[#allocation8 + $0xc98] sm:$0xf0] }
 0x24c   :  { %4466 = vmatpush.bf16.msra.mxu1 %v7231_v21  ;;  %v8076_v21 = vld [vmem:[#allocation8 + $0xff8] sm:$0xf0]  ;;  %v7951_v42 = vor.u32 %v9229_v36, %v7948_v31  ;;  %v9253_v54 = vld [vmem:[#allocation8 + $0xfac] sm:$0xf] }
 0x24d   :  { %v7772_v52 = vld [vmem:[#allocation8 + $0xd98] sm:$0xf0]  ;;  %v9149_v46 = vld [vmem:[#allocation8 + $0xc6c] sm:$0xf] }
 0x24e   :  { %4478 = vmatpush.bf16.msra.mxu2 %v7375_v51  ;;  %v7455_v51 = vor.u32 %v9105_v19, %v7452_v22  ;;  %v7916_v26 = vld [vmem:[#allocation8 + $0xeb8] sm:$0xf0]  ;;  %v9249_v15 = vld [vmem:[#allocation8 + $0xf8c] sm:$0xf] }
 0x24f   :  { %4491 = vmatpush.bf16.msra.mxu3 %v7503_v48  ;;  %4454 = vmatpush.bf16.msra.mxu0 %v7087_v55  ;;  %v8079_v48 = vor.u32 %v9261_v32, %v8076_v21  ;;  %v7663_v55 = vor.u32 %v9157_v34, %v7660_v23  ;;  %v7628_v4 = vld [vmem:[#allocation8 + $0xc78] sm:$0xf0]  ;;  %v9177_v20 = vld [vmem:[#allocation8 + $0xd4c] sm:$0xf] }
 0x250   :  { %4467 = vmatpush.bf16.msra.mxu1 %v7215_v30  ;;  %v7791_v30 = vor.u32 %v9189_v38, %v7788_v39  ;;  %v7631_v11 = vor.u32 %v9149_v46, %v7628_v4  ;;  %v8028_v18 = vld [vmem:[#allocation8 + $0xf98] sm:$0xf0]  ;;  %v9213_v31 = vld [vmem:[#allocation8 + $0xe6c] sm:$0xf] }
 0x251   :  { %v7740_v19 = vld [vmem:[#allocation8 + $0xd58] sm:$0xf0]  ;;  %v9141_v23 = vld [vmem:[#allocation8 + $0xc2c] sm:$0xf] }
 0x252   :  { %4479 = vmatpush.bf16.msra.mxu2 %v7359_v47  ;;  %v9221_v47 = vld [vmem:[#allocation8 + $0xeac] sm:$0xf]  ;;  %v7884_v32 = vld [vmem:[#allocation8 + $0xe78] sm:$0xf0]  ;;  %v7743_v21 = vor.u32 %v9177_v20, %v7740_v19 }
 0x253   :  { %4492 = vmatpush.bf16.msra.mxu3 %v7487_v61  ;;  %4455 = vmatpush.bf16.msra.mxu0 %v7071_v63  ;;  %v7775_v61 = vor.u32 %v9185_v41, %v7772_v52  ;;  %v8044_v63 = vld [vmem:[#allocation8 + $0xfb8] sm:$0xf0]  ;;  %v9962_v14 = vpop.f32.mrf.mxu0  ;;  %v7919_v9 = vor.u32 %v9221_v47, %v7916_v26  ;;  %v9173_v38 = vld [vmem:[#allocation8 + $0xd2c] sm:$0xf]  ;;  %v8194_v52 = vld [vmem:[#allocation11 + $0xe0] sm:$0xf]  ;;  %v4198_v26 = vadd.f32 %v9950_v8, %v9944_v10 }
 0x254   :  { %4468 = vmatpush.bf16.msra.mxu1 %v7199_v6  ;;  %v9181_v6 = vld [vmem:[#allocation8 + $0xd6c] sm:$0xf]  ;;  %v8047_v29 = vor.u32 %v9253_v54, %v8044_v63  ;;  %v8012_v34 = vld [vmem:[#allocation8 + $0xf78] sm:$0xf0]  ;;  %v9326_v47 = vld [vmem:[#allocation11 + $0x1ec] sm:$0xf0] }
 0x255   :  { %v7724_v39 = vld [vmem:[#allocation8 + $0xd38] sm:$0xf0]  ;;  %v9137_v44 = vld [vmem:[#allocation8 + $0xc0c] sm:$0xf]  ;;  %v8306_v8 = vld [vmem:[#allocation11 + $0x1c0] sm:$0xf] }
 0x256   :  { %4480 = vmatpush.bf16.msra.mxu2 %v7343_v13  ;;  %4456 = vmatmul.bf16.vlgmr.msra.gmra.mxu0 %v9860_v16  ;;  %v9153_v16 = vld [vmem:[#allocation8 + $0xc8c] sm:$0xf]  ;;  %v7900_v13 = vld [vmem:[#allocation8 + $0xe98] sm:$0xf0] }
 0x257   :  { %4500 = vmatpush.bf16.msrb.mxu0 %v7695_v58  ;;  %4493 = vmatpush.bf16.msra.mxu3 %v7471_v35  ;;  %v7647_v0 = vor.u32 %v9153_v16, %v7644_v59  ;;  %v7756_v58 = vld [vmem:[#allocation8 + $0xd78] sm:$0xf0]  ;;  %v9145_v35 = vld [vmem:[#allocation8 + $0xc4c] sm:$0xf] }
 0x258   :  { %4513 = vmatpush.bf16.msrb.mxu1 %v7823_v2  ;;  %v9964_v2 = vpop.f32.mrf.mxu1  ;;  %v7759_v17 = vor.u32 %v9181_v6, %v7756_v58  ;;  %v7996_v1 = vld [vmem:[#allocation8 + $0xf58] sm:$0xf0]  ;;  %v9169_v59 = vld [vmem:[#allocation8 + $0xd0c] sm:$0xf] }
 0x259   :  { %4469 = vmatmul.bf16.vlgmr.msra.gmra.mxu1 %v9862_v28  ;;  %v7935_v28 = vor.u32 %v9225_v24, %v7932_v50  ;;  %v7868_v24 = vld [vmem:[#allocation8 + $0xe58] sm:$0xf0]  ;;  %v9241_v50 = vld [vmem:[#allocation8 + $0xf4c] sm:$0xf] }
 0x25a   :  { %4481 = vmatpush.bf16.msra.mxu2 %v7327_v27  ;;  %v7596_v27 = vld [vmem:[#allocation8 + $0xc38] sm:$0xf0]  ;;  %v9205_v46 = vld [vmem:[#allocation8 + $0xe2c] sm:$0xf] }
 0x25b   :  { %4501 = vmatpush.bf16.msrb.mxu0 %v7679_v25  ;;  %4494 = vmatpush.bf16.msra.mxu3 %v7455_v51  ;;  %v8031_v25 = vor.u32 %v9249_v15, %v8028_v18  ;;  %v4251_v40 = vpop.f32.mrf.mxu0  ;;  %v7887_v51 = vor.u32 %v9213_v31, %v7884_v32  ;;  %v7580_v16 = vld [vmem:[#allocation8 + $0xc18] sm:$0xf0]  ;;  %v9290_v15 = vld [vmem:[#allocation11 + $0xcc] sm:$0xf0]  ;;  %v4211_v18 = vadd.f32 %v9952_v3, %v4198_v26  ;;  %v9233_v19 = vld [vmem:[#allocation8 + $0xf0c] sm:$0xf] }
 0x25c   :  { %4514 = vmatpush.bf16.msrb.mxu1 %v7807_v33  ;;  %v9245_v33 = vld [vmem:[#allocation8 + $0xf6c] sm:$0xf]  ;;  %v7708_v41 = vld [vmem:[#allocation8 + $0xd18] sm:$0xf0]  ;;  %v7583_v63 = vor.u32 %v9137_v44, %v7580_v16  ;;  %v9358_v31 = vld [vmem:[#allocation11 + $0x2ec] sm:$0xf0] }
 0x25d   :  { %4482 = vmatmul.bf16.vlgmr.msra.gmra.mxu2 %v9866_v57  ;;  %v9217_v57 = vld [vmem:[#allocation8 + $0xe8c] sm:$0xf]  ;;  %v7852_v4 = vld [vmem:[#allocation8 + $0xe38] sm:$0xf0]  ;;  %v7711_v58 = vor.u32 %v9169_v59, %v7708_v41  ;;  %v4224_v32 = vadd.f32 %v9954_v56, %v4211_v18  ;;  %v8434_v56 = vld [vmem:[#allocation11 + $0x2c0] sm:$0xf] }
 0x25e   :  { %4526 = vmatpush.bf16.msrb.mxu2 %v7951_v42  ;;  %4495 = vmatmul.bf16.vlgmr.msra.gmra.mxu3 %v9868_v60  ;;  %v7612_v60 = vld [vmem:[#allocation8 + $0xc58] sm:$0xf0]  ;;  %v7903_v22 = vor.u32 %v9217_v57, %v7900_v13  ;;  %v9209_v42 = vld [vmem:[#allocation8 + $0xe4c] sm:$0xf]  ;;  %v8178_v13 = vld [vmem:[#allocation11 + $0xc0] sm:$0xf]  ;;  %v7855_v10 = vor.u32 %v9205_v46, %v7852_v4 }
 0x25f   :  { %4539 = vmatpush.bf16.msrb.mxu3 %v8079_v48  ;;  %4502 = vmatpush.bf16.msrb.mxu0 %v7663_v55  ;;  %v7615_v36 = vor.u32 %v9145_v35, %v7612_v60  ;;  %v8015_v48 = vor.u32 %v9245_v33, %v8012_v34  ;;  %v7599_v55 = vor.u32 %v9141_v23, %v7596_v27  ;;  %v9201_v60 = vld [vmem:[#allocation8 + $0xe0c] sm:$0xf]  ;;  %v7836_v20 = vld [vmem:[#allocation8 + $0xe18] sm:$0xf0]  ;;  %v9286_v34 = vld [vmem:[#allocation11 + $0xac] sm:$0xf0] }
 0x260   :  { %4515 = vmatpush.bf16.msrb.mxu1 %v7791_v30  ;;  %v4264_v45 = vpop.f32.mrf.mxu1  ;;  %v7727_v30 = vor.u32 %v9173_v38, %v7724_v39  ;;  %v9968_v54 = vpop.f32.mrf.mxu2  ;;  %v7839_v3 = vor.u32 %v9201_v60, %v7836_v20  ;;  %v8290_v23 = vld [vmem:[#allocation11 + $0x1a0] sm:$0xf]  ;;  %v9318_v27 = vld [vmem:[#allocation11 + $0x1ac] sm:$0xf0] }
 0x261   :  { %v9970_v6 = vpop.f32.mrf.mxu3  ;;  %v9354_v45 = vld [vmem:[#allocation11 + $0x2cc] sm:$0xf0]  ;;  %v8418_v16 = vld [vmem:[#allocation11 + $0x2a0] sm:$0xf] }
 0x262   :  { %4527 = vmatpush.bf16.msrb.mxu2 %v7935_v28  ;;  %v9294_v28 = vld [vmem:[#allocation11 + $0xec] sm:$0xf0]  ;;  %v8130_v41 = vld [vmem:[#allocation11 + $0x60] sm:$0xf] }
 0x263   :  { %4540 = vmatpush.bf16.msrb.mxu3 %v8063_v53  ;;  %4503 = vmatpush.bf16.msrb.mxu0 %v7647_v0  ;;  %v7871_v53 = vor.u32 %v9209_v42, %v7868_v24  ;;  %v8322_v0 = vld [vmem:[#allocation11 + $0x1e0] sm:$0xf]  ;;  %v9350_v59 = vld [vmem:[#allocation11 + $0x2ac] sm:$0xf0] }
 0x264   :  { %4516 = vmatpush.bf16.msrb.mxu1 %v7775_v61  ;;  %v7999_v61 = vor.u32 %v9241_v50, %v7996_v1  ;;  %v8323_v57 = vor.u32 %v9326_v47, %v8322_v0  ;;  %v8146_v24 = vld [vmem:[#allocation11 + $0x80] sm:$0xf]  ;;  %v9314_v1 = vld [vmem:[#allocation11 + $0x18c] sm:$0xf0]  ;;  %v8419_v47 = vor.u32 %v9350_v59, %v8418_v16  ;;  %v9320_v16 = vld [vmem:[#allocation11 + $0x1c4] sm:$0xf] }
 0x265   :  { %v8274_v50 = vld [vmem:[#allocation11 + $0x180] sm:$0xf]  ;;  %v9346_v46 = vld [vmem:[#allocation11 + $0x28c] sm:$0xf0]  ;;  %v8308_v59 = vld [vmem:[#allocation11 + $0x1d0] sm:$0xf0] }
 0x266   :  { %4528 = vmatpush.bf16.msrb.mxu2 %v7919_v9  ;;  %v8195_v9 = vor.u32 %v9294_v28, %v8194_v52  ;;  %v9278_v52 = vld [vmem:[#allocation11 + $0x6c] sm:$0xf0]  ;;  %v8258_v28 = vld [vmem:[#allocation11 + $0x160] sm:$0xf] }
 0x267   :  { %4541 = vmatpush.bf16.msrb.mxu3 %v8047_v29  ;;  %4504 = vmatpush.bf16.msrb.mxu0 %v7631_v11  ;;  %v9237_v29 = vld [vmem:[#allocation8 + $0xf2c] sm:$0xf]  ;;  %v7980_v11 = vld [vmem:[#allocation8 + $0xf38] sm:$0xf0]  ;;  %v8226_v18 = vld [vmem:[#allocation11 + $0x120] sm:$0xf] }
 0x268   :  { %4517 = vmatpush.bf16.msrb.mxu1 %v7759_v17  ;;  %v9322_v17 = vld [vmem:[#allocation11 + $0x1cc] sm:$0xf0]  ;;  %v7983_v35 = vor.u32 %v9237_v29, %v7980_v11  ;;  %v4277_v38 = vpop.f32.mrf.mxu2  ;;  %v8242_v29 = vld [vmem:[#allocation11 + $0x140] sm:$0xf] }
 0x269   :  { %v8307_v33 = vor.u32 %v9322_v17, %v8306_v8  ;;  %v8098_v8 = vld [vmem:[#allocation11 + $0x20] sm:$0xf]  ;;  %v9270_v17 = vld [vmem:[#allocation11 + $0x2c] sm:$0xf0]  ;;  %v9324_v38 = vld [vmem:[#allocation11 + $0x1e4] sm:$0xf] }
 0x26a   :  { %4529 = vmatpush.bf16.msrb.mxu2 %v7903_v22  ;;  %v8179_v22 = vor.u32 %v9290_v15, %v8178_v13  ;;  %v9342_v13 = vld [vmem:[#allocation11 + $0x26c] sm:$0xf0] }
 0x26b   :  { %4542 = vmatpush.bf16.msrb.mxu3 %v8031_v25  ;;  %4505 = vmatpush.bf16.msrb.mxu0 %v7615_v36  ;;  %v7964_v25 = vld [vmem:[#allocation8 + $0xf18] sm:$0xf0]  ;;  %v8450_v36 = vld [vmem:[#allocation11 + $0x2e0] sm:$0xf] }
 0x26c   :  { %4518 = vmatpush.bf16.msrb.mxu1 %v7743_v21  ;;  %v8162_v21 = vld [vmem:[#allocation11 + $0xa0] sm:$0xf]  ;;  %v7967_v39 = vor.u32 %v9233_v19, %v7964_v25  ;;  %v8451_v40 = vor.u32 %v9358_v31, %v8450_v36  ;;  %v9338_v36 = vld [vmem:[#allocation11 + $0x24c] sm:$0xf0] }
 0x26d   :  { %v8163_v42 = vor.u32 %v9286_v34, %v8162_v21  ;;  %v8370_v25 = vld [vmem:[#allocation11 + $0x240] sm:$0xf]  ;;  %v9298_v21 = vld [vmem:[#allocation11 + $0x10c] sm:$0xf0]  ;;  %v9292_v34 = vld [vmem:[#allocation11 + $0xe4] sm:$0xf] }
 0x26e   :  { %4530 = vmatpush.bf16.msrb.mxu2 %v7887_v51  ;;  %v4290_v51 = vpop.f32.mrf.mxu3 }
 0x26f   :  { %4543 = vmatpush.bf16.msrb.mxu3 %v8015_v48  ;;  %4506 = vmatpush.bf16.msrb.mxu0 %v7599_v55  ;;  %v4237_v48 = vadd.f32 %v9956_v5, %v4224_v32  ;;  %v8291_v55 = vor.u32 %v9318_v27, %v8290_v23  ;;  %v8275_v5 = vor.u32 %v9314_v1, %v8274_v50  ;;  %v8082_v32 = vld [vmem:[#allocation11] sm:$0xf]  ;;  %v4553_v50 = vmax.f32 %v9938_v62, 0.0 }
 0x270   :  { %4519 = vmatpush.bf16.msrb.mxu1 %v7727_v30  ;;  %v8371_v27 = vor.u32 %v9338_v36, %v8370_v25  ;;  %v8311_v62 = vor.u32 %v9320_v16, %v8308_v59  ;;  %v8132_v25 = vld [vmem:[#allocation11 + $0x70] sm:$0xf0]  ;;  %v9308_v36 = vld [vmem:[#allocation11 + $0x164] sm:$0xf] }
 0x271   :  { %v4250_v30 = vadd.f32 %v9962_v14, %v4237_v48 }
 0x272   :  { %4531 = vmatpush.bf16.msrb.mxu2 %v7871_v53  ;;  %v9310_v53 = vld [vmem:[#allocation11 + $0x16c] sm:$0xf0] }
 0x273   :  { %4544 = vmatpush.bf16.msrb.mxu3 %v7999_v61  ;;  %4507 = vmatpush.bf16.msrb.mxu0 %v7583_v63  ;;  %v4263_v0 = vadd.f32 %v9964_v2, %v4250_v30  ;;  %v4301_v14 = vpop.f32.mrf.mxu0  ;;  %v8131_v61 = vor.u32 %v9278_v52, %v8130_v41  ;;  %v8402_v63 = vld [vmem:[#allocation11 + $0x280] sm:$0xf]  ;;  %v8259_v4 = vor.u32 %v9310_v53, %v8258_v28  ;;  %v9288_v30 = vld [vmem:[#allocation11 + $0xc4] sm:$0xf]  ;;  %v9330_v52 = vld [vmem:[#allocation11 + $0x20c] sm:$0xf0] }
 0x274   :  { %4520 = vmatpush.bf16.msrb.mxu1 %v7711_v58  ;;  %v8114_v58 = vld [vmem:[#allocation11 + $0x40] sm:$0xf]  ;;  %v8403_v11 = vor.u32 %v9346_v46, %v8402_v63  ;;  %v9356_v53 = vld [vmem:[#allocation11 + $0x2e4] sm:$0xf]  ;;  %v8292_v46 = vld [vmem:[#allocation11 + $0x1b0] sm:$0xf0] }
 0x275   :  { %v8338_v41 = vld [vmem:[#allocation11 + $0x200] sm:$0xf]  ;;  %v9316_v63 = vld [vmem:[#allocation11 + $0x1a4] sm:$0xf] }
 0x276   :  { %4532 = vmatpush.bf16.msrb.mxu2 %v7855_v10  ;;  %4508 = vmatmul.bf16.vlgmr.msrb.gmra.mxu0 %v9876_v37  ;;  %v9282_v37 = vld [vmem:[#allocation11 + $0x8c] sm:$0xf0]  ;;  %v4314_v26 = vpop.f32.mrf.mxu1 }
 0x277   :  { %5338 = vmatpush.bf16.msra.mxu0 %v8195_v9  ;;  %4545 = vmatpush.bf16.msrb.mxu3 %v7983_v35  ;;  %v8147_v44 = vor.u32 %v9282_v37, %v8146_v24  ;;  %v9274_v9 = vld [vmem:[#allocation11 + $0x4c] sm:$0xf0] }
 0x278   :  { %5351 = vmatpush.bf16.msra.mxu1 %v8323_v57  ;;  %v8115_v2 = vor.u32 %v9274_v9, %v8114_v58  ;;  %v8386_v57 = vld [vmem:[#allocation11 + $0x260] sm:$0xf] }
 0x279   :  { %4521 = vmatmul.bf16.vlgmr.msrb.gmra.mxu1 %v9878_v43  ;;  %v8435_v43 = vor.u32 %v9354_v45, %v8434_v56  ;;  %v8387_v20 = vor.u32 %v9342_v13, %v8386_v57  ;;  %v9334_v56 = vld [vmem:[#allocation11 + $0x22c] sm:$0xf0]  ;;  %v4552_v45 = vmax.f32 %v9910_v49, 0.0  ;;  %v9280_v57 = vld [vmem:[#allocation11 + $0x84] sm:$0xf] }
 0x27a   :  { %4533 = vmatpush.bf16.msrb.mxu2 %v7839_v3  ;;  %v8196_v3 = vld [vmem:[#allocation11 + $0xf0] sm:$0xf0] }
 0x27b   :  { %5339 = vmatpush.bf16.msra.mxu0 %v8179_v22  ;;  %4546 = vmatpush.bf16.msrb.mxu3 %v7967_v39  ;;  %v4303_v60 = vpop.f32.mrf.mxu0  ;;  %v8099_v22 = vor.u32 %v9270_v17, %v8098_v8  ;;  %v8324_v39 = vld [vmem:[#allocation11 + $0x1f0] sm:$0xf0]  ;;  %v8199_v37 = vor.u32 %v9292_v34, %v8196_v3  ;;  %v9985_v28 = vpack.c.bf16 %v4552_v45, %v4552_v45  ;;  %v9344_v3 = vld [vmem:[#allocation11 + $0x284] sm:$0xf] }
 0x27c   :  { %5352 = vmatpush.bf16.msra.mxu1 %v8307_v33  ;;  %v9266_v33 = vld [vmem:[#allocation11 + $0xc] sm:$0xf0]  ;;  %v8327_v1 = vor.u32 %v9324_v38, %v8324_v39  ;;  %v8148_v13 = vld [vmem:[#allocation11 + $0x90] sm:$0xf0]  ;;  %v9348_v60 = vld [vmem:[#allocation11 + $0x2a4] sm:$0xf] }
 0x27d   :  { %4534 = vmatmul.bf16.vlgmr.msrb.gmra.mxu2 %v9882_v7  ;;  %v4276_v7 = vadd.f32 %v9968_v54, %v4263_v0  ;;  %v9302_v54 = vld [vmem:[#allocation11 + $0x12c] sm:$0xf0]  ;;  %v8083_v51 = vor.u32 %v9266_v33, %v8082_v32  ;;  %v8452_v0 = vld [vmem:[#allocation11 + $0x2f0] sm:$0xf0]  ;;  %v9272_v38 = vld [vmem:[#allocation11 + $0x44] sm:$0xf] }
 0x27e   :  { %5364 = vmatpush.bf16.msra.mxu2 %v8451_v40  ;;  %4547 = vmatmul.bf16.vlgmr.msrb.gmra.mxu3 %v9884_v12  ;;  %v9306_v12 = vld [vmem:[#allocation11 + $0x14c] sm:$0xf0]  ;;  %v4316_v19 = vpop.f32.mrf.mxu1  ;;  %v8227_v31 = vor.u32 %v9302_v54, %v8226_v18  ;;  %v8455_v58 = vor.u32 %v9356_v53, %v8452_v0  ;;  %v9441_v18 = vld [vmem:[#allocation10] sm:$0xf]  ;;  %v8116_v39 = vld [vmem:[#allocation11 + $0x50] sm:$0xf0] }
 0x27f   :  { %5340 = vmatpush.bf16.msra.mxu0 %v8163_v42  ;;  %v4289_v15 = vadd.f32 %v9970_v6, %v4276_v7  ;;  %v8243_v10 = vor.u32 %v9306_v12, %v8242_v29  ;;  %v8210_v6 = vld [vmem:[#allocation11 + $0x100] sm:$0xf]  ;;  %v9352_v12 = vld [vmem:[#allocation11 + $0x2c4] sm:$0xf]  ;;  %v1155_v54 = vperm.slane %v9441_v18, 3  ;;  %v8119_v45 = vor.u32 %v9272_v38, %v8116_v39 }
 0x280   :  { %5353 = vmatpush.bf16.msra.mxu1 %v8291_v55  ;;  %v4327_v40 = vpop.f32.mrf.mxu2  ;;  %v8354_v42 = vld [vmem:[#allocation11 + $0x220] sm:$0xf]  ;;  %v8211_v24 = vor.u32 %v9298_v21, %v8210_v6  ;;  %v8084_v53 = vld [vmem:[#allocation11 + $0x10] sm:$0xf0]  ;;  %v9296_v0 = vld [vmem:[#allocation11 + $0x104] sm:$0xf] }
 0x281   :  { %v4302_v35 = vadd.f32 %v4301_v14, %v4289_v15  ;;  %v4340_v55 = vpop.f32.mrf.mxu3  ;;  %v9987_v14 = vpack.c.bf16 %v4553_v50, %v4553_v50  ;;  %v9312_v15 = vld [vmem:[#allocation11 + $0x184] sm:$0xf]  ;;  %v8100_v50 = vld [vmem:[#allocation11 + $0x30] sm:$0xf0]  ;;  %v8314_v18 = vld [vmem:[#allocation11 + $0x1c8] sm:$0xf] }
 0x282   :  { %5365 = vmatpush.bf16.msra.mxu2 %v8435_v43  ;;  %v8180_v43 = vld [vmem:[#allocation11 + $0xd0] sm:$0xf0]  ;;  %v8562_v38 = vld [vmem:[#allocation11 + $0x3c0] sm:$0xf]  ;;  %v9386_v39 = vld [vmem:[#allocation11 + $0x3cc] sm:$0xf0] }
 0x283   :  { %5341 = vmatpush.bf16.msra.mxu0 %v8147_v44  ;;  %v4315_v23 = vadd.f32 %v4314_v26, %v4302_v35  ;;  %v8355_v44 = vor.u32 %v9334_v56, %v8354_v42  ;;  %v8183_v49 = vor.u32 %v9288_v30, %v8180_v43  ;;  %v8164_v26 = vld [vmem:[#allocation11 + $0xb0] sm:$0xf0]  ;;  %v8151_v35 = vor.u32 %v9280_v57, %v8148_v13  ;;  %v8186_v13 = vld [vmem:[#allocation11 + $0xc8] sm:$0xf] }
 0x284   :  { %5354 = vmatpush.bf16.msra.mxu1 %v8275_v5  ;;  %v8244_v42 = vld [vmem:[#allocation11 + $0x150] sm:$0xf0] }
 0x285   :  { %v4328_v48 = vadd.f32 %v4327_v40, %v4315_v23  ;;  %v8404_v23 = vld [vmem:[#allocation11 + $0x290] sm:$0xf0] }
 0x286   :  { %5366 = vmatpush.bf16.msra.mxu2 %v8419_v47  ;;  %v9284_v47 = vld [vmem:[#allocation11 + $0xa4] sm:$0xf]  ;;  %v8407_v56 = vor.u32 %v9344_v3, %v8404_v23  ;;  %v8228_v30 = vld [vmem:[#allocation11 + $0x130] sm:$0xf0]  ;;  %v9319_v3 = vld [vmem:[#allocation11 + $0x1b4] sm:$0xf0] }
 0x287   :  { %5342 = vmatpush.bf16.msra.mxu0 %v8131_v61  ;;  %v4341_v5 = vadd.f32 %v4340_v55, %v4328_v48  ;;  %v8339_v61 = vor.u32 %v9330_v52, %v8338_v41  ;;  %v8167_v29 = vor.u32 %v9284_v47, %v8164_v26  ;;  %v9340_v48 = vld [vmem:[#allocation11 + $0x264] sm:$0xf]  ;;  %v8388_v55 = vld [vmem:[#allocation11 + $0x270] sm:$0xf0]  ;;  %v8202_v47 = vld [vmem:[#allocation11 + $0xe8] sm:$0xf] }
 0x288   :  { %5355 = vmatpush.bf16.msra.mxu1 %v8259_v4  ;;  %v4329_v4 = vpop.f32.mrf.mxu2  ;;  %v8372_v41 = vld [vmem:[#allocation11 + $0x250] sm:$0xf0]  ;;  %v9295_v26 = vld [vmem:[#allocation11 + $0xf4] sm:$0xf0] }
 0x289   :  { %v4554_v7 = vmax.f32 %v4341_v5, 0.0  ;;  %v4342_v9 = vpop.f32.mrf.mxu3  ;;  %v9336_v5 = vld [vmem:[#allocation11 + $0x244] sm:$0xf] }
 0x28a   :  { %5367 = vmatpush.bf16.msra.mxu2 %v8403_v11  ;;  %v8436_v11 = vld [vmem:[#allocation11 + $0x2d0] sm:$0xf0] }
 0x28b   :  { %5343 = vmatpush.bf16.msra.mxu0 %v8115_v2  ;;  %v8295_v2 = vor.u32 %v9316_v63, %v8292_v46  ;;  %v9991_v8 = vpack.c.bf16 %v4554_v7, %v4554_v7  ;;  %v8439_v17 = vor.u32 %v9352_v12, %v8436_v11  ;;  %v8330_v63 = vld [vmem:[#allocation11 + $0x1e8] sm:$0xf]  ;;  %v9327_v46 = vld [vmem:[#allocation11 + $0x1f4] sm:$0xf0]  ;;  %v8356_v9 = vld [vmem:[#allocation11 + $0x230] sm:$0xf0] }
 0x28c   :  { %5356 = vmatpush.bf16.msra.mxu1 %v8243_v10  ;;  %v8276_v10 = vld [vmem:[#allocation11 + $0x190] sm:$0xf0]  ;;  %v8331_v57 = vor.u32 %v9327_v46, %v8330_v63 }
 0x28d   :  { %v8279_v19 = vor.u32 %v9312_v15, %v8276_v10  ;;  %v9291_v15 = vld [vmem:[#allocation11 + $0xd4] sm:$0xf0] }
 0x28e   :  { %5368 = vmatpush.bf16.msra.mxu2 %v8387_v20  ;;  %v8420_v20 = vld [vmem:[#allocation11 + $0x2b0] sm:$0xf0] }
 0x28f   :  { %5344 = vmatpush.bf16.msra.mxu0 %v8099_v22  ;;  %v9276_v22 = vld [vmem:[#allocation11 + $0x64] sm:$0xf]  ;;  %v8423_v33 = vor.u32 %v9348_v60, %v8420_v20  ;;  %v8340_v60 = vld [vmem:[#allocation11 + $0x210] sm:$0xf0]  ;;  %v8578_v20 = vld [vmem:[#allocation11 + $0x3e0] sm:$0xf] }
 0x290   :  { %5357 = vmatpush.bf16.msra.mxu1 %v8227_v31  ;;  %v8260_v31 = vld [vmem:[#allocation11 + $0x170] sm:$0xf0]  ;;  %v8135_v34 = vor.u32 %v9276_v22, %v8132_v25  ;;  %v8187_v22 = vor.u32 %v9291_v15, %v8186_v13  ;;  %v8458_v25 = vld [vmem:[#allocation11 + $0x2e8] sm:$0xf]  ;;  %v8514_v13 = vld [vmem:[#allocation11 + $0x360] sm:$0xf] }
 0x291   :  { %v9374_v15 = vld [vmem:[#allocation11 + $0x36c] sm:$0xf0] }
 0x292   :  { %5369 = vmatpush.bf16.msra.mxu2 %v8371_v27  ;;  %v8263_v27 = vor.u32 %v9308_v36, %v8260_v31  ;;  %v9359_v36 = vld [vmem:[#allocation11 + $0x2f4] sm:$0xf0] }
 0x293   :  { %5345 = vmatpush.bf16.msra.mxu0 %v8083_v51  ;;  %v4353_v32 = vpop.f32.mrf.mxu0  ;;  %v9304_v51 = vld [vmem:[#allocation11 + $0x144] sm:$0xf] }
 0x294   :  { %5358 = vmatpush.bf16.msra.mxu1 %v8211_v24  ;;  %v4354_v6 = vadd.f32 %v4353_v32, %v1155_v54  ;;  %v8247_v24 = vor.u32 %v9304_v51, %v8244_v42  ;;  %v9323_v54 = vld [vmem:[#allocation11 + $0x1d4] sm:$0xf0]  ;;  %v8442_v42 = vld [vmem:[#allocation11 + $0x2c8] sm:$0xf] }
 0x295   :  { %v8315_v32 = vor.u32 %v9323_v54, %v8314_v18  ;;  %v8394_v18 = vld [vmem:[#allocation11 + $0x268] sm:$0xf]  ;;  %v9343_v54 = vld [vmem:[#allocation11 + $0x274] sm:$0xf0] }
 0x296   :  { %5370 = vmatpush.bf16.msra.mxu2 %v8355_v44  ;;  %5346 = vmatmul.bf16.vlgmr.msra.gmra.mxu0 %v9985_v28  ;;  %v4366_v21 = vpop.f32.mrf.mxu1  ;;  %v8391_v44 = vor.u32 %v9340_v48, %v8388_v55  ;;  %v8154_v55 = vld [vmem:[#allocation11 + $0x88] sm:$0xf] }
 0x297   :  { %5390 = vmatpush.bf16.msrb.mxu0 %v8199_v37  ;;  %5359 = vmatmul.bf16.vlgmr.msra.gmra.mxu1 %v9987_v14  ;;  %v4367_v40 = vadd.f32 %v4366_v21, %v4354_v6  ;;  %v9268_v37 = vld [vmem:[#allocation11 + $0x24] sm:$0xf]  ;;  %v9287_v6 = vld [vmem:[#allocation11 + $0xb4] sm:$0xf0] }
 0x298   :  { %5403 = vmatpush.bf16.msrb.mxu1 %v8327_v1  ;;  %v9300_v1 = vld [vmem:[#allocation11 + $0x124] sm:$0xf]  ;;  %v8103_v59 = vor.u32 %v9268_v37, %v8100_v50  ;;  %v8282_v37 = vld [vmem:[#allocation11 + $0x188] sm:$0xf]  ;;  %v9315_v50 = vld [vmem:[#allocation11 + $0x194] sm:$0xf0] }
 0x299   :  { %v8231_v52 = vor.u32 %v9300_v1, %v8228_v30  ;;  %v8546_v30 = vld [vmem:[#allocation11 + $0x3a0] sm:$0xf] }
 0x29a   :  { %5371 = vmatpush.bf16.msra.mxu2 %v8339_v61  ;;  %v8375_v61 = vor.u32 %v9336_v5, %v8372_v41  ;;  %v8283_v41 = vor.u32 %v9315_v50, %v8282_v37  ;;  %v9366_v37 = vld [vmem:[#allocation11 + $0x32c] sm:$0xf0] }
 0x29b   :  { %5391 = vmatpush.bf16.msrb.mxu0 %v8183_v49  ;;  %v4355_v43 = vpop.f32.mrf.mxu0  ;;  %v9264_v49 = vld [vmem:[#allocation11 + $0x4] sm:$0xf] }
 0x29c   :  { %5404 = vmatpush.bf16.msrb.mxu1 %v8311_v62  ;;  %v8212_v62 = vld [vmem:[#allocation11 + $0x110] sm:$0xf0]  ;;  %v8087_v4 = vor.u32 %v9264_v49, %v8084_v53  ;;  %v9382_v43 = vld [vmem:[#allocation11 + $0x3ac] sm:$0xf0]  ;;  %v9279_v49 = vld [vmem:[#allocation11 + $0x74] sm:$0xf0] }
 0x29d   :  { %5372 = vmatmul.bf16.vlgmr.msra.gmra.mxu2 %v9991_v8  ;;  %v8215_v11 = vor.u32 %v9296_v0, %v8212_v62  ;;  %v8547_v5 = vor.u32 %v9382_v43, %v8546_v30  ;;  %v8266_v53 = vld [vmem:[#allocation11 + $0x168] sm:$0xf]  ;;  %v9311_v0 = vld [vmem:[#allocation11 + $0x174] sm:$0xf0] }
 0x29e   :  { %5416 = vmatpush.bf16.msrb.mxu2 %v8455_v58  ;;  %v4368_v16 = vpop.f32.mrf.mxu1  ;;  %v9332_v58 = vld [vmem:[#allocation11 + $0x224] sm:$0xf]  ;;  %v8362_v30 = vld [vmem:[#allocation11 + $0x228] sm:$0xf]  ;;  %v9335_v43 = vld [vmem:[#allocation11 + $0x234] sm:$0xf0] }
 0x29f   :  { %5392 = vmatpush.bf16.msrb.mxu0 %v8167_v29  ;;  %v8426_v16 = vld [vmem:[#allocation11 + $0x2a8] sm:$0xf] }
 0x2a0   :  { %5405 = vmatpush.bf16.msrb.mxu1 %v8295_v2  ;;  %v4379_v7 = vpop.f32.mrf.mxu2  ;;  %v8203_v2 = vor.u32 %v9295_v26, %v8202_v47  ;;  %v8530_v26 = vld [vmem:[#allocation11 + $0x380] sm:$0xf] }
 0x2a1   :  { %v4380_v29 = vadd.f32 %v4379_v7, %v4367_v40  ;;  %v4392_v12 = vpop.f32.mrf.mxu3  ;;  %v8410_v7 = vld [vmem:[#allocation11 + $0x288] sm:$0xf] }
 0x2a2   :  { %5417 = vmatpush.bf16.msrb.mxu2 %v8439_v17  ;;  %v8359_v17 = vor.u32 %v9332_v58, %v8356_v9  ;;  %v8267_v9 = vor.u32 %v9311_v0, %v8266_v53  ;;  %v9321_v53 = vld [vmem:[#allocation11 + $0x1cc] sm:$0xf]  ;;  %v8316_v0 = vld [vmem:[#allocation11 + $0x1d8] sm:$0xf0] }
 0x2a3   :  { %5393 = vmatpush.bf16.msrb.mxu0 %v8151_v35  ;;  %v9994_v10 = vadd.f32 %v4392_v12, %v4380_v29  ;;  %v9328_v35 = vld [vmem:[#allocation11 + $0x204] sm:$0xf]  ;;  %v8122_v29 = vld [vmem:[#allocation11 + $0x48] sm:$0xf]  ;;  %v9275_v12 = vld [vmem:[#allocation11 + $0x54] sm:$0xf0] }
 0x2a4   :  { %5406 = vmatpush.bf16.msrb.mxu1 %v8279_v19  ;;  %v9390_v19 = vld [vmem:[#allocation11 + $0x3ec] sm:$0xf0]  ;;  %v8343_v21 = vor.u32 %v9328_v35, %v8340_v60  ;;  %v8515_v35 = vor.u32 %v9374_v15, %v8514_v13  ;;  %v9285_v13 = vld [vmem:[#allocation11 + $0xac] sm:$0xf]  ;;  %v8172_v15 = vld [vmem:[#allocation11 + $0xb8] sm:$0xf0] }
 0x2a5   :  { %v8579_v31 = vor.u32 %v9390_v19, %v8578_v20  ;;  %v8106_v20 = vld [vmem:[#allocation11 + $0x28] sm:$0xf]  ;;  %v9271_v19 = vld [vmem:[#allocation11 + $0x34] sm:$0xf0] }
 0x2a6   :  { %5418 = vmatpush.bf16.msrb.mxu2 %v8423_v33  ;;  %v8170_v33 = vld [vmem:[#allocation11 + $0xa8] sm:$0xf] }
 0x2a7   :  { %5394 = vmatpush.bf16.msrb.mxu0 %v8135_v34  ;;  %v8298_v34 = vld [vmem:[#allocation11 + $0x1a8] sm:$0xf]  ;;  %5377 = vmatpush.bf16.msra.mxu3 %v8579_v31  ;;  %v8171_v51 = vor.u32 %v9287_v6, %v8170_v33  ;;  %v8395_v31 = vor.u32 %v9343_v54, %v8394_v18  ;;  %v9370_v33 = vld [vmem:[#allocation11 + $0x34c] sm:$0xf0]  ;;  %v9317_v18 = vld [vmem:[#allocation11 + $0x1ac] sm:$0xf] }
 0x2a8   :  { %5407 = vmatpush.bf16.msrb.mxu1 %v8263_v27  ;;  %v4381_v23 = vpop.f32.mrf.mxu2  ;;  %v8459_v27 = vor.u32 %v9359_v36, %v8458_v25  ;;  %v8299_v48 = vor.u32 %v9319_v3, %v8298_v34  ;;  %v9303_v25 = vld [vmem:[#allocation11 + $0x134] sm:$0xf0]  ;;  %v8378_v34 = vld [vmem:[#allocation11 + $0x248] sm:$0xf]  ;;  %v8300_v54 = vld [vmem:[#allocation11 + $0x1b8] sm:$0xf0] }
 0x2a9   :  { %v4394_v40 = vpop.f32.mrf.mxu3  ;;  %v9339_v3 = vld [vmem:[#allocation11 + $0x254] sm:$0xf0]  ;;  %v8090_v23 = vld [vmem:[#allocation11 + $0x8] sm:$0xf] }
 0x2aa   :  { %5419 = vmatpush.bf16.msrb.mxu2 %v8407_v56  ;;  %v9355_v56 = vld [vmem:[#allocation11 + $0x2d4] sm:$0xf0]  ;;  %v8218_v40 = vld [vmem:[#allocation11 + $0x108] sm:$0xf] }
 0x2ab   :  { %5395 = vmatpush.bf16.msrb.mxu0 %v8119_v45  ;;  %v8563_v45 = vor.u32 %v9386_v39, %v8562_v38  ;;  %v8443_v1 = vor.u32 %v9355_v56, %v8442_v42  ;;  %v9267_v39 = vld [vmem:[#allocation11 + $0x14] sm:$0xf0]  ;;  %v9293_v42 = vld [vmem:[#allocation11 + $0xec] sm:$0xf]  ;;  %v8204_v56 = vld [vmem:[#allocation11 + $0xf8] sm:$0xf0] }
 0x2ac   :  { %5408 = vmatpush.bf16.msrb.mxu1 %v8247_v24  ;;  %v9283_v24 = vld [vmem:[#allocation11 + $0x94] sm:$0xf0] }
 0x2ad   :  { %5378 = vmatpush.bf16.msra.mxu3 %v8563_v45  ;;  %v9325_v45 = vld [vmem:[#allocation11 + $0x1ec] sm:$0xf] }
 0x2ae   :  { %5420 = vmatpush.bf16.msrb.mxu2 %v8391_v44  ;;  %v8155_v44 = vor.u32 %v9283_v24, %v8154_v55  ;;  %v8332_v55 = vld [vmem:[#allocation11 + $0x1f8] sm:$0xf0]  ;;  %v8482_v24 = vld [vmem:[#allocation11 + $0x320] sm:$0xf] }
 0x2af   :  { %5396 = vmatpush.bf16.msrb.mxu0 %v8103_v59  ;;  %v9351_v59 = vld [vmem:[#allocation11 + $0x2b4] sm:$0xf0] }
 0x2b0   :  { %5409 = vmatpush.bf16.msrb.mxu1 %v8231_v52  ;;  %v8138_v52 = vld [vmem:[#allocation11 + $0x68] sm:$0xf]  ;;  %v8427_v47 = vor.u32 %v9351_v59, %v8426_v16 }
 0x2b1   :  { %5379 = vmatpush.bf16.msra.mxu3 %v8547_v5  ;;  %v8139_v46 = vor.u32 %v9279_v49, %v8138_v52  ;;  %v8207_v5 = vor.u32 %v9293_v42, %v8204_v56  ;;  %v8335_v52 = vor.u32 %v9325_v45, %v8332_v55  ;;  %v8188_v49 = vld [vmem:[#allocation11 + $0xd8] sm:$0xf0]  ;;  %v9277_v45 = vld [vmem:[#allocation11 + $0x6c] sm:$0xf] }
 0x2b2   :  { %5421 = vmatpush.bf16.msrb.mxu2 %v8375_v61  ;;  %v9378_v61 = vld [vmem:[#allocation11 + $0x38c] sm:$0xf0]  ;;  %v9309_v55 = vld [vmem:[#allocation11 + $0x16c] sm:$0xf] }
 0x2b3   :  { %5397 = vmatpush.bf16.msrb.mxu0 %v8087_v4  ;;  %v9999_v62 = vpop.f32.mrf.mxu0  ;;  %v9347_v4 = vld [vmem:[#allocation11 + $0x294] sm:$0xf0]  ;;  %v8531_v58 = vor.u32 %v9378_v61, %v8530_v26  ;;  %v8346_v26 = vld [vmem:[#allocation11 + $0x208] sm:$0xf]  ;;  %v8466_v61 = vld [vmem:[#allocation11 + $0x300] sm:$0xf] }
 0x2b4   :  { %5410 = vmatpush.bf16.msrb.mxu1 %v8215_v11  ;;  %v8250_v11 = vld [vmem:[#allocation11 + $0x148] sm:$0xf] }
 0x2b5   :  { %5380 = vmatpush.bf16.msra.mxu3 %v8531_v58  ;;  %v9388_v58 = vld [vmem:[#allocation11 + $0x3e4] sm:$0xf] }
 0x2b6   :  { %5422 = vmatpush.bf16.msrb.mxu2 %v8359_v17  ;;  %5398 = vmatmul.bf16.vlgmr.msrb.gmra.mxu0 %v9985_v28  ;;  %v10001_v63 = vpop.f32.mrf.mxu1  ;;  %v8123_v17 = vor.u32 %v9275_v12, %v8122_v29  ;;  %v9357_v12 = vld [vmem:[#allocation11 + $0x2ec] sm:$0xf] }
 0x2b7   :  { %5442 = vmatpush.bf16.msra.mxu0 %v8203_v2  ;;  %5411 = vmatmul.bf16.vlgmr.msrb.gmra.mxu1 %v9987_v14  ;;  %v9307_v2 = vld [vmem:[#allocation11 + $0x154] sm:$0xf0] }
 0x2b8   :  { %5455 = vmatpush.bf16.msra.mxu1 %v8331_v57  ;;  %v8411_v57 = vor.u32 %v9347_v4, %v8410_v7  ;;  %v8251_v60 = vor.u32 %v9307_v2, %v8250_v11  ;;  %v9331_v7 = vld [vmem:[#allocation11 + $0x214] sm:$0xf0]  ;;  %v8460_v11 = vld [vmem:[#allocation11 + $0x2f8] sm:$0xf0] }
 0x2b9   :  { %5381 = vmatpush.bf16.msra.mxu3 %v8515_v35 }
 0x2ba   :  { %5423 = vmatpush.bf16.msrb.mxu2 %v8343_v21  ;;  %v8107_v21 = vor.u32 %v9271_v19, %v8106_v20  ;;  %v9384_v20 = vld [vmem:[#allocation11 + $0x3c4] sm:$0xf]  ;;  %v8564_v19 = vld [vmem:[#allocation11 + $0x3d0] sm:$0xf0] }
 0x2bb   :  { %5443 = vmatpush.bf16.msra.mxu0 %v8187_v22  ;;  %v8234_v22 = vld [vmem:[#allocation11 + $0x128] sm:$0xf]  ;;  %v4407_v36 = vpop.f32.mrf.mxu0 }
 0x2bc   :  { %5456 = vmatpush.bf16.msra.mxu1 %v8315_v32  ;;  %v8498_v32 = vld [vmem:[#allocation11 + $0x340] sm:$0xf]  ;;  %v8235_v38 = vor.u32 %v9303_v25, %v8234_v22  ;;  %v8175_v25 = vor.u32 %v9285_v13, %v8172_v15  ;;  %v9353_v36 = vld [vmem:[#allocation11 + $0x2cc] sm:$0xf]  ;;  %v8236_v13 = vld [vmem:[#allocation11 + $0x138] sm:$0xf0] }
 0x2bd   :  { %5424 = vmatmul.bf16.vlgmr.msrb.gmra.mxu2 %v9991_v8 }
 0x2be   :  { %5468 = vmatpush.bf16.msra.mxu2 %v8459_v27  ;;  %v4420_v6 = vpop.f32.mrf.mxu1  ;;  %v8499_v27 = vor.u32 %v9370_v33, %v8498_v32  ;;  %v8567_v32 = vor.u32 %v9384_v20, %v8564_v19  ;;  %v8303_v33 = vor.u32 %v9317_v18, %v8300_v54  ;;  %v9368_v18 = vld [vmem:[#allocation11 + $0x344] sm:$0xf]  ;;  %v8500_v54 = vld [vmem:[#allocation11 + $0x350] sm:$0xf0]  ;;  %v9337_v20 = vld [vmem:[#allocation11 + $0x24c] sm:$0xf] }
 0x2bf   :  { %5444 = vmatpush.bf16.msra.mxu0 %v8171_v51  ;;  %v9299_v51 = vld [vmem:[#allocation11 + $0x114] sm:$0xf0]  ;;  %v9281_v6 = vld [vmem:[#allocation11 + $0x8c] sm:$0xf]  ;;  %v8380_v19 = vld [vmem:[#allocation11 + $0x258] sm:$0xf0] }
 0x2c0   :  { %5457 = vmatpush.bf16.msra.mxu1 %v8299_v48  ;;  %v8379_v48 = vor.u32 %v9339_v3, %v8378_v34  ;;  %5382 = vmatpush.bf16.msra.mxu3 %v8499_v27  ;;  %v10003_v50 = vpop.f32.mrf.mxu2  ;;  %v8219_v59 = vor.u32 %v9299_v51, %v8218_v40  ;;  %v9313_v34 = vld [vmem:[#allocation11 + $0x18c] sm:$0xf]  ;;  %v8284_v3 = vld [vmem:[#allocation11 + $0x198] sm:$0xf0]  ;;  %v9380_v27 = vld [vmem:[#allocation11 + $0x3a4] sm:$0xf] }
 0x2c1   :  { %v10005_v16 = vpop.f32.mrf.mxu3  ;;  %v9349_v40 = vld [vmem:[#allocation11 + $0x2ac] sm:$0xf]  ;;  %v8428_v51 = vld [vmem:[#allocation11 + $0x2b8] sm:$0xf0]  ;;  %v8287_v56 = vor.u32 %v9313_v34, %v8284_v3  ;;  %v8484_v34 = vld [vmem:[#allocation11 + $0x330] sm:$0xf0]  ;;  %v4406_v3 = vadd.f32 %v9999_v62, %v9994_v10 }
 0x2c2   :  { %5469 = vmatpush.bf16.msra.mxu2 %v8443_v1  ;;  %v8091_v1 = vor.u32 %v9267_v39, %v8090_v23 }
 0x2c3   :  { %5445 = vmatpush.bf16.msra.mxu0 %v8155_v44  ;;  %v8483_v44 = vor.u32 %v9366_v37, %v8482_v24  ;;  %v8268_v24 = vld [vmem:[#allocation11 + $0x178] sm:$0xf0] }
 0x2c4   :  { %5458 = vmatpush.bf16.msra.mxu1 %v8283_v41  ;;  %v9289_v41 = vld [vmem:[#allocation11 + $0xcc] sm:$0xf] }
 0x2c5   :  { %5383 = vmatpush.bf16.msra.mxu3 %v8483_v44  ;;  %v8191_v29 = vor.u32 %v9289_v41, %v8188_v49  ;;  %v8412_v41 = vld [vmem:[#allocation11 + $0x298] sm:$0xf0]  ;;  %v8271_v49 = vor.u32 %v9309_v55, %v8268_v24  ;;  %v4419_v55 = vadd.f32 %v10001_v63, %v4406_v3  ;;  %v9329_v24 = vld [vmem:[#allocation11 + $0x20c] sm:$0xf]  ;;  %v8490_v3 = vld [vmem:[#allocation11 + $0x328] sm:$0xf] }
 0x2c6   :  { %5470 = vmatpush.bf16.msra.mxu2 %v8427_v47  ;;  %v8363_v47 = vor.u32 %v9335_v43, %v8362_v30  ;;  %v9376_v30 = vld [vmem:[#allocation11 + $0x384] sm:$0xf]  ;;  %v8532_v43 = vld [vmem:[#allocation11 + $0x390] sm:$0xf0] }
 0x2c7   :  { %5446 = vmatpush.bf16.msra.mxu0 %v8139_v46  ;;  %v9362_v46 = vld [vmem:[#allocation11 + $0x30c] sm:$0xf0]  ;;  %v4432_v62 = vadd.f32 %v10003_v50, %v4419_v55  ;;  %v9385_v55 = vld [vmem:[#allocation11 + $0x3cc] sm:$0xf] }
 0x2c8   :  { %5459 = vmatpush.bf16.msra.mxu1 %v8267_v9  ;;  %v8467_v4 = vor.u32 %v9362_v46, %v8466_v61  ;;  %v8580_v9 = vld [vmem:[#allocation11 + $0x3f0] sm:$0xf0]  ;;  %v4433_v35 = vpop.f32.mrf.mxu2  ;;  %v9372_v46 = vld [vmem:[#allocation11 + $0x364] sm:$0xf] }
 0x2c9   :  { %v8583_v2 = vor.u32 %v9388_v58, %v8580_v9  ;;  %v4446_v22 = vpop.f32.mrf.mxu3  ;;  %v9341_v58 = vld [vmem:[#allocation11 + $0x26c] sm:$0xf]  ;;  %v8396_v9 = vld [vmem:[#allocation11 + $0x278] sm:$0xf0] }
 0x2ca   :  { %5471 = vmatpush.bf16.msra.mxu2 %v8411_v57  ;;  %v8319_v57 = vor.u32 %v9321_v53, %v8316_v0  ;;  %5384 = vmatpush.bf16.msra.mxu3 %v8467_v4  ;;  %v9273_v53 = vld [vmem:[#allocation11 + $0x4c] sm:$0xf]  ;;  %v8124_v0 = vld [vmem:[#allocation11 + $0x58] sm:$0xf0]  ;;  %v8503_v22 = vor.u32 %v9368_v18, %v8500_v54  ;;  %v8538_v18 = vld [vmem:[#allocation11 + $0x388] sm:$0xf] }
 0x2cb   :  { %5447 = vmatpush.bf16.msra.mxu0 %v8123_v17  ;;  %v8347_v17 = vor.u32 %v9331_v7, %v8346_v26  ;;  %v8252_v26 = vld [vmem:[#allocation11 + $0x158] sm:$0xf0]  ;;  %v8516_v7 = vld [vmem:[#allocation11 + $0x370] sm:$0xf0]  ;;  %v8127_v4 = vor.u32 %v9273_v53, %v8124_v0  ;;  %v9379_v54 = vld [vmem:[#allocation11 + $0x394] sm:$0xf0] }
 0x2cc   :  { %5460 = vmatpush.bf16.msra.mxu1 %v8251_v60  ;;  %v8463_v60 = vor.u32 %v9357_v12, %v8460_v11  ;;  %v9269_v11 = vld [vmem:[#allocation11 + $0x2c] sm:$0xf] }
 0x2ce   :  { %5472 = vmatpush.bf16.msra.mxu2 %v8395_v31  ;;  %v8444_v31 = vld [vmem:[#allocation11 + $0x2d8] sm:$0xf0]  ;;  %5429 = vmatpush.bf16.msrb.mxu3 %v8583_v2 }
 0x2cf   :  { %5448 = vmatpush.bf16.msra.mxu0 %v8107_v21  ;;  %v8156_v21 = vld [vmem:[#allocation11 + $0x98] sm:$0xf0]  ;;  %v8447_v23 = vor.u32 %v9353_v36, %v8444_v31  ;;  %v9265_v36 = vld [vmem:[#allocation11 + $0xc] sm:$0xf] }
 0x2d0   :  { %5461 = vmatpush.bf16.msra.mxu1 %v8235_v38  ;;  %v8548_v38 = vld [vmem:[#allocation11 + $0x3b0] sm:$0xf0]  ;;  %v8159_v39 = vor.u32 %v9281_v6, %v8156_v21  ;;  %v8108_v2 = vld [vmem:[#allocation11 + $0x38] sm:$0xf0]  ;;  %v8383_v6 = vor.u32 %v9337_v20, %v8380_v19  ;;  %v9364_v21 = vld [vmem:[#allocation11 + $0x324] sm:$0xf]  ;;  %v8539_v19 = vor.u32 %v9379_v54, %v8538_v18 }
 0x2d1   :  { %v8551_v42 = vor.u32 %v9380_v27, %v8548_v38  ;;  %v8092_v31 = vld [vmem:[#allocation11 + $0x18] sm:$0xf0]  ;;  %v9333_v38 = vld [vmem:[#allocation11 + $0x22c] sm:$0xf] }
 0x2d2   :  { %5473 = vmatpush.bf16.msra.mxu2 %v8379_v48  ;;  %5430 = vmatpush.bf16.msrb.mxu3 %v8567_v32  ;;  %v8140_v48 = vld [vmem:[#allocation11 + $0x78] sm:$0xf0]  ;;  %v9297_v32 = vld [vmem:[#allocation11 + $0x10c] sm:$0xf]  ;;  %v8095_v27 = vor.u32 %v9265_v36, %v8092_v31  ;;  %v9375_v36 = vld [vmem:[#allocation11 + $0x374] sm:$0xf0] }
 0x2d3   :  { %5449 = vmatpush.bf16.msra.mxu0 %v8091_v1  ;;  %v10010_v37 = vpop.f32.mrf.mxu0  ;;  %v8431_v1 = vor.u32 %v9349_v40, %v8428_v51  ;;  %v8487_v40 = vor.u32 %v9364_v21, %v8484_v34 }
 0x2d4   :  { %5462 = vmatpush.bf16.msra.mxu1 %v8219_v59  ;;  %v8143_v59 = vor.u32 %v9277_v45, %v8140_v48  ;;  %v9360_v45 = vld [vmem:[#allocation11 + $0x304] sm:$0xf]  ;;  %v8468_v48 = vld [vmem:[#allocation11 + $0x310] sm:$0xf0] }
 0x2d5   :  { %v8471_v10 = vor.u32 %v9360_v45, %v8468_v48 }
 0x2d6   :  { %5474 = vmatpush.bf16.msra.mxu2 %v8363_v47  ;;  %5450 = vmatmul.bf16.vlgmr.msra.gmra.mxu0 %v9985_v28  ;;  %v10012_v44 = vpop.f32.mrf.mxu1  ;;  %v9305_v47 = vld [vmem:[#allocation11 + $0x14c] sm:$0xf] }
 0x2d7   :  { %5494 = vmatpush.bf16.msrb.mxu0 %v8207_v5  ;;  %5463 = vmatmul.bf16.vlgmr.msra.gmra.mxu1 %v9987_v14  ;;  %v9345_v5 = vld [vmem:[#allocation11 + $0x28c] sm:$0xf]  ;;  %v8255_v12 = vor.u32 %v9305_v47, %v8252_v26 }
 0x2d8   :  { %5507 = vmatpush.bf16.msrb.mxu1 %v8335_v52  ;;  %5431 = vmatpush.bf16.msrb.mxu3 %v8551_v42  ;;  %v8535_v52 = vor.u32 %v9376_v30, %v8532_v43  ;;  %v8415_v61 = vor.u32 %v9345_v5, %v8412_v41  ;;  %v4445_v5 = vadd.f32 %v10005_v16, %v4432_v62  ;;  %v8586_v16 = vld [vmem:[#allocation11 + $0x3e8] sm:$0xf]  ;;  %v9381_v62 = vld [vmem:[#allocation11 + $0x3ac] sm:$0xf] }
 0x2da   :  { %5475 = vmatpush.bf16.msra.mxu2 %v8347_v17  ;;  %v8399_v17 = vor.u32 %v9341_v58, %v8396_v9  ;;  %v4458_v63 = vadd.f32 %v10010_v37, %v4445_v5  ;;  %v9377_v5 = vld [vmem:[#allocation11 + $0x38c] sm:$0xf] }
 0x2db   :  { %5495 = vmatpush.bf16.msrb.mxu0 %v8191_v29  ;;  %v8519_v29 = vor.u32 %v9372_v46, %v8516_v7  ;;  %v4459_v15 = vpop.f32.mrf.mxu0 }
 0x2dc   :  { %5508 = vmatpush.bf16.msrb.mxu1 %v8319_v57  ;;  %5432 = vmatpush.bf16.msrb.mxu3 %v8535_v52  ;;  %v9301_v57 = vld [vmem:[#allocation11 + $0x12c] sm:$0xf]  ;;  %v4471_v41 = vadd.f32 %v10012_v44, %v4458_v63  ;;  %v9387_v44 = vld [vmem:[#allocation11 + $0x3d4] sm:$0xf0]  ;;  %v8540_v63 = vld [vmem:[#allocation11 + $0x398] sm:$0xf0] }
 0x2dd   :  { %5476 = vmatmul.bf16.vlgmr.msra.gmra.mxu2 %v9991_v8 }
 0x2de   :  { %5520 = vmatpush.bf16.msrb.mxu2 %v8463_v60  ;;  %v4472_v35 = vpop.f32.mrf.mxu1  ;;  %v8111_v60 = vor.u32 %v9269_v11, %v8108_v2  ;;  %v10027_v2 = vld [vmem:[#allocation13] sm:$0xf] }
 0x2df   :  { %5496 = vmatpush.bf16.msrb.mxu0 %v8175_v25  ;;  %v8239_v25 = vor.u32 %v9301_v57, %v8236_v13  ;;  %v8554_v57 = vld [vmem:[#allocation11 + $0x3a8] sm:$0xf]  ;;  %v9383_v13 = vld [vmem:[#allocation11 + $0x3b4] sm:$0xf0]  ;;  %v4690_v15 = vperm.slane %v10027_v2, 0 }
 0x2e0   :  { %5509 = vmatpush.bf16.msrb.mxu1 %v8303_v33  ;;  %5433 = vmatpush.bf16.msrb.mxu3 %v8519_v29  ;;  %v8220_v33 = vld [vmem:[#allocation11 + $0x118] sm:$0xf0] }
 0x2e1   :  { %v4496_v51 = vpop.f32.mrf.mxu3  ;;  %v8223_v42 = vor.u32 %v9297_v32, %v8220_v33  ;;  %v8506_v32 = vld [vmem:[#allocation11 + $0x348] sm:$0xf]  ;;  %v9371_v33 = vld [vmem:[#allocation11 + $0x354] sm:$0xf0] }
 0x2e2   :  { %5521 = vmatpush.bf16.msrb.mxu2 %v8447_v23  ;;  %v4483_v23 = vpop.f32.mrf.mxu2  ;;  %v8507_v34 = vor.u32 %v9371_v33, %v8506_v32  ;;  %v9395_v33 = vld [vmem:[#allocation14 + $0x18] sm:$0xff] }
 0x2e3   :  { %5497 = vmatpush.bf16.msrb.mxu0 %v8159_v39  ;;  %v8364_v39 = vld [vmem:[#allocation11 + $0x238] sm:$0xf0] }
 0x2e4   :  { %5510 = vmatpush.bf16.msrb.mxu1 %v8287_v56  ;;  %5434 = vmatpush.bf16.msrb.mxu3 %v8503_v22  ;;  %v8367_v56 = vor.u32 %v9333_v38, %v8364_v39 }
 0x2e6   :  { %5522 = vmatpush.bf16.msrb.mxu2 %v8431_v1  ;;  %v8348_v1 = vld [vmem:[#allocation11 + $0x218] sm:$0xf0] }
 0x2e7   :  { %5498 = vmatpush.bf16.msrb.mxu0 %v8143_v59  ;;  %v8351_v30 = vor.u32 %v9329_v24, %v8348_v1  ;;  %v8572_v24 = vld [vmem:[#allocation11 + $0x3d8] sm:$0xf0] }
 0x2e8   :  { %5511 = vmatpush.bf16.msrb.mxu1 %v8271_v49  ;;  %5435 = vmatpush.bf16.msrb.mxu3 %v8487_v40  ;;  %v4484_v49 = vadd.f32 %v4483_v23, %v4471_v41  ;;  %v9367_v23 = vld [vmem:[#allocation11 + $0x334] sm:$0xf0]  ;;  %v8474_v40 = vld [vmem:[#allocation11 + $0x308] sm:$0xf] }
 0x2e9   :  { %v4498_v59 = vpop.f32.mrf.mxu3  ;;  %v8491_v39 = vor.u32 %v9367_v23, %v8490_v3 }
 0x2ea   :  { %5523 = vmatpush.bf16.msrb.mxu2 %v8415_v61  ;;  %v4485_v43 = vpop.f32.mrf.mxu2  ;;  %v4497_v53 = vadd.f32 %v4496_v51, %v4484_v49  ;;  %v9363_v51 = vld [vmem:[#allocation11 + $0x314] sm:$0xf0]  ;;  %v8543_v49 = vor.u32 %v9377_v5, %v8540_v63  ;;  %v9412_v5 = vld [vmem:[#allocation14 + $0xa0] sm:$0xff]  ;;  %v9411_v63 = vld [vmem:[#allocation14 + $0x98] sm:$0xff] }
 0x2eb   :  { %5499 = vmatpush.bf16.msrb.mxu0 %v8127_v4  ;;  %v9391_v4 = vld [vmem:[#allocation11 + $0x3f4] sm:$0xf0]  ;;  %v8475_v45 = vor.u32 %v9363_v51, %v8474_v40  ;;  %v4691_v43 = vperm.slane %v10027_v2, 1  ;;  %v9405_v40 = vld [vmem:[#allocation14 + $0x68] sm:$0xff] }
 0x2ec   :  { %5512 = vmatpush.bf16.msrb.mxu1 %v8255_v12  ;;  %5436 = vmatpush.bf16.msrb.mxu3 %v8471_v10  ;;  %v8587_v37 = vor.u32 %v9391_v4, %v8586_v16  ;;  %v8575_v10 = vor.u32 %v9385_v55, %v8572_v24  ;;  %v9365_v16 = vld [vmem:[#allocation11 + $0x32c] sm:$0xf]  ;;  %v8492_v4 = vld [vmem:[#allocation11 + $0x338] sm:$0xf0] }
 0x2ed   :  { %v9415_v55 = vld [vmem:[#allocation14 + $0xb8] sm:$0xff] }
 0x2ee   :  { %5524 = vmatpush.bf16.msrb.mxu2 %v8399_v17  ;;  %v8555_v17 = vor.u32 %v9383_v13, %v8554_v57  ;;  %v4692_v57 = vperm.slane %v10027_v2, 2 }
 0x2ef   :  { %5500 = vmatpush.bf16.msrb.mxu0 %v8111_v60 }
 0x2f0   :  { %5513 = vmatpush.bf16.msrb.mxu1 %v8239_v25  ;;  %v8522_v25 = vld [vmem:[#allocation11 + $0x368] sm:$0xf] }
 0x2f1   :  { %v8523_v31 = vor.u32 %v9375_v36, %v8522_v25  ;;  %v9397_v25 = vld [vmem:[#allocation14 + $0x28] sm:$0xff]  ;;  %v9407_v36 = vld [vmem:[#allocation14 + $0x78] sm:$0xff] }
 0x2f2   :  { %5525 = vmatpush.bf16.msrb.mxu2 %v8383_v6 }
 0x2f3   :  { %5501 = vmatpush.bf16.msrb.mxu0 %v8095_v27  ;;  %v4509_v52 = vpop.f32.mrf.mxu0 }
 0x2f4   :  { %5514 = vmatpush.bf16.msrb.mxu1 %v8223_v42  ;;  %v9389_v42 = vld [vmem:[#allocation11 + $0x3ec] sm:$0xf] }
 0x2f6   :  { %5526 = vmatpush.bf16.msrb.mxu2 %v8367_v56  ;;  %5502 = vmatmul.bf16.vlgmr.msrb.gmra.mxu0 %v9985_v28  ;;  %v4522_v50 = vpop.f32.mrf.mxu1  ;;  %v4510_v28 = vadd.f32 %v4509_v52, %v4497_v53  ;;  %v8588_v56 = vld [vmem:[#allocation11 + $0x3f8] sm:$0xf0] }
 0x2f7   :  { %5515 = vmatmul.bf16.vlgmr.msrb.gmra.mxu1 %v9987_v14  ;;  %v8591_v48 = vor.u32 %v9389_v42, %v8588_v56  ;;  %v9392_v42 = vld [vmem:[#allocation14] sm:$0xff] }
 0x2f8   :  { %v4523_v26 = vadd.f32 %v4522_v50, %v4510_v28  ;;  %v9373_v28 = vld [vmem:[#allocation11 + $0x36c] sm:$0xf]  ;;  %5827 = vmatpush.bf16.msra.mxu1 %v9407_v36  ;;  %v9404_v56 = vld [vmem:[#allocation14 + $0x60] sm:$0xff] }
 0x2fa   :  { %5527 = vmatpush.bf16.msrb.mxu2 %v8351_v30  ;;  %v8556_v30 = vld [vmem:[#allocation11 + $0x3b8] sm:$0xf0] }
 0x2fb   :  { %v4511_v0 = vpop.f32.mrf.mxu0  ;;  %v8559_v59 = vor.u32 %v9381_v62, %v8556_v30  ;;  %v9401_v62 = vld [vmem:[#allocation14 + $0x48] sm:$0xff] }
 0x2fc   :  { %v8524_v0 = vld [vmem:[#allocation11 + $0x378] sm:$0xf0]  ;;  %v9413_v30 = vld [vmem:[#allocation14 + $0xa8] sm:$0xff] }
 0x2fd   :  { %5528 = vmatmul.bf16.vlgmr.msrb.gmra.mxu2 %v9991_v8  ;;  %v8570_v8 = vld [vmem:[#allocation11 + $0x3c8] sm:$0xf] }
 0x2fe   :  { %v4524_v47 = vpop.f32.mrf.mxu1  ;;  %v8571_v11 = vor.u32 %v9387_v44, %v8570_v8  ;;  %v8495_v8 = vor.u32 %v9365_v16, %v8492_v4  ;;  %v9361_v44 = vld [vmem:[#allocation11 + $0x30c] sm:$0xf]  ;;  %5840 = vmatpush.bf16.msra.mxu2 %v9415_v55  ;;  %v9419_v4 = vld [vmem:[#allocation14 + $0xd8] sm:$0xff] }
 0x2ff   :  { %v8527_v47 = vor.u32 %v9373_v28, %v8524_v0  ;;  %v9408_v28 = vld [vmem:[#allocation14 + $0x80] sm:$0xff]  ;;  %v9423_v0 = vld [vmem:[#allocation14 + $0xf8] sm:$0xff] }
 0x300   :  { %v4535_v14 = vpop.f32.mrf.mxu2 }
 0x301   :  { %v4536_v61 = vadd.f32 %v4535_v14, %v4523_v26  ;;  %v4548_v46 = vpop.f32.mrf.mxu3  ;;  %v9369_v26 = vld [vmem:[#allocation11 + $0x34c] sm:$0xf]  ;;  %v8508_v14 = vld [vmem:[#allocation11 + $0x358] sm:$0xf0] }
 0x303   :  { %v4549_v7 = vadd.f32 %v4548_v46, %v4536_v61 }
 0x305   :  { %v4555_v58 = vmax.f32 %v4549_v7, 0.0  ;;  %v8511_v7 = vor.u32 %v9369_v26, %v8508_v14  ;;  %v9422_v26 = vld [vmem:[#allocation14 + $0xf0] sm:$0xff] }
 0x307   :  { %v10024_v9 = vpack.c.bf16 %v4555_v58, %v4555_v58 }
 0x308   :  { %v4537_v29 = vpop.f32.mrf.mxu2 }
 0x309   :  { %v4550_v12 = vpop.f32.mrf.mxu3  ;;  %5385 = vmatmul.bf16.vlgmr.msra.gmra.mxu3 %v10024_v9  ;;  %v8476_v29 = vld [vmem:[#allocation11 + $0x318] sm:$0xf0] }
 0x30a   :  { %5481 = vmatpush.bf16.msra.mxu3 %v8587_v37  ;;  %v8479_v12 = vor.u32 %v9361_v44, %v8476_v29  ;;  %v9417_v29 = vld [vmem:[#allocation14 + $0xc8] sm:$0xff] }
 0x30e   :  { %5482 = vmatpush.bf16.msra.mxu3 %v8571_v11 }
 0x312   :  { %5483 = vmatpush.bf16.msra.mxu3 %v8555_v17 }
 0x313   :  { %v5347_v35 = vpop.f32.mrf.mxu0 }
 0x314   :  { %v5348_v60 = vadd.f32 %v5347_v35, %v4690_v15  ;;  %v5360_v20 = vpop.f32.mrf.mxu1 }
 0x316   :  { %v5361_v22 = vadd.f32 %v5360_v20, %v5348_v60  ;;  %5484 = vmatpush.bf16.msra.mxu3 %v8539_v19  ;;  %v9399_v60 = vld [vmem:[#allocation14 + $0x38] sm:$0xff]  ;;  %v9398_v20 = vld [vmem:[#allocation14 + $0x30] sm:$0xff] }
 0x317   :  { %5814 = vmatpush.bf16.msra.mxu0 %v9399_v60 }
 0x319   :  { %5437 = vmatmul.bf16.vlgmr.msrb.gmra.mxu3 %v10024_v9 }
 0x31a   :  { %5485 = vmatpush.bf16.msra.mxu3 %v8523_v31  ;;  %v9396_v31 = vld [vmem:[#allocation14 + $0x20] sm:$0xff] }
 0x31b   :  { %v5349_v6 = vpop.f32.mrf.mxu0  ;;  %5815 = vmatpush.bf16.msra.mxu0 %v9398_v20 }
 0x31c   :  { %v5362_v21 = vpop.f32.mrf.mxu1  ;;  %v4693_v6 = vperm.slane %v10027_v2, 3 }
 0x31d   :  { %v9394_v21 = vld [vmem:[#allocation14 + $0x10] sm:$0xff] }
 0x31e   :  { %5486 = vmatpush.bf16.msra.mxu3 %v8507_v34 }
 0x31f   :  { %5816 = vmatpush.bf16.msra.mxu0 %v9397_v25 }
 0x320   :  { %v5373_v27 = vpop.f32.mrf.mxu2 }
 0x321   :  { %v10031_v38 = vadd.f32 %v5373_v27, %v5361_v22 }
 0x322   :  { %5487 = vmatpush.bf16.msra.mxu3 %v8491_v39  ;;  %v9393_v39 = vld [vmem:[#allocation14 + $0x8] sm:$0xff] }
 0x323   :  { %5817 = vmatpush.bf16.msra.mxu0 %v9396_v31 }
 0x326   :  { %5488 = vmatpush.bf16.msra.mxu3 %v8475_v45 }
 0x327   :  { %5818 = vmatpush.bf16.msra.mxu0 %v9395_v33 }
 0x328   :  { %v5375_v1 = vpop.f32.mrf.mxu2 }
 0x329   :  { %5489 = vmatmul.bf16.vlgmr.msra.gmra.mxu3 %v10024_v9  ;;  %v9402_v1 = vld [vmem:[#allocation14 + $0x50] sm:$0xff] }
 0x32a   :  { %5533 = vmatpush.bf16.msrb.mxu3 %v8591_v48  ;;  %v9403_v48 = vld [vmem:[#allocation14 + $0x58] sm:$0xff] }
 0x32b   :  { %5819 = vmatpush.bf16.msra.mxu0 %v9394_v21 }
 0x32e   :  { %5534 = vmatpush.bf16.msrb.mxu3 %v8575_v10  ;;  %v9414_v10 = vld [vmem:[#allocation14 + $0xb0] sm:$0xff] }
 0x32f   :  { %5820 = vmatpush.bf16.msra.mxu0 %v9393_v39  ;;  %5841 = vmatpush.bf16.msra.mxu2 %v9414_v10 }
 0x332   :  { %5535 = vmatpush.bf16.msrb.mxu3 %v8559_v59  ;;  %v9400_v59 = vld [vmem:[#allocation14 + $0x40] sm:$0xff] }
 0x333   :  { %v5399_v41 = vpop.f32.mrf.mxu0  ;;  %5821 = vmatpush.bf16.msra.mxu0 %v9392_v42  ;;  %5842 = vmatpush.bf16.msra.mxu2 %v9413_v30 }
 0x334   :  { %v5400_v52 = vadd.f32 %v5399_v41, %v4691_v43  ;;  %v5412_v50 = vpop.f32.mrf.mxu1  ;;  %v9410_v41 = vld [vmem:[#allocation14 + $0x90] sm:$0xff] }
 0x336   :  { %v5413_v53 = vadd.f32 %v5412_v50, %v5400_v52  ;;  %5536 = vmatpush.bf16.msrb.mxu3 %v8543_v49  ;;  %v9409_v52 = vld [vmem:[#allocation14 + $0x88] sm:$0xff] }
 0x337   :  { %5843 = vmatpush.bf16.msra.mxu2 %v9412_v5 }
 0x33a   :  { %5537 = vmatpush.bf16.msrb.mxu3 %v8527_v47 }
 0x33b   :  { %v5401_v61 = vpop.f32.mrf.mxu0  ;;  %5844 = vmatpush.bf16.msra.mxu2 %v9411_v63 }
 0x33c   :  { %v5414_v46 = vpop.f32.mrf.mxu1  ;;  %v9421_v61 = vld [vmem:[#allocation14 + $0xe8] sm:$0xff] }
 0x33d   :  { %v9420_v46 = vld [vmem:[#allocation14 + $0xe0] sm:$0xff] }
 0x33e   :  { %5538 = vmatpush.bf16.msrb.mxu3 %v8511_v7 }
 0x33f   :  { %5845 = vmatpush.bf16.msra.mxu2 %v9410_v41 }
 0x340   :  { %v5425_v58 = vpop.f32.mrf.mxu2 }
 0x341   :  { %v10035_v37 = vadd.f32 %v5425_v58, %v5413_v53 }
 0x342   :  { %5539 = vmatpush.bf16.msrb.mxu3 %v8495_v8  ;;  %v9418_v8 = vld [vmem:[#allocation14 + $0xd0] sm:$0xff] }
 0x343   :  { %5846 = vmatpush.bf16.msra.mxu2 %v9409_v52 }
 0x346   :  { %5540 = vmatpush.bf16.msrb.mxu3 %v8479_v12  ;;  %v9416_v12 = vld [vmem:[#allocation14 + $0xc0] sm:$0xff] }
 0x347   :  { %5847 = vmatpush.bf16.msra.mxu2 %v9408_v28 }
 0x348   :  { %v5427_v11 = vpop.f32.mrf.mxu2 }
 0x349   :  { %5541 = vmatmul.bf16.vlgmr.msrb.gmra.mxu3 %v10024_v9  ;;  %v9406_v9 = vld [vmem:[#allocation14 + $0x70] sm:$0xff] }
 0x34a   :  { %5828 = vmatpush.bf16.msra.mxu1 %v9406_v9  ;;  %5853 = vmatpush.bf16.msra.mxu3 %v9423_v0 }
 0x34e   :  { %5829 = vmatpush.bf16.msra.mxu1 %v9405_v40  ;;  %5854 = vmatpush.bf16.msra.mxu3 %v9422_v26 }
 0x352   :  { %5830 = vmatpush.bf16.msra.mxu1 %v9404_v56  ;;  %5855 = vmatpush.bf16.msra.mxu3 %v9421_v61 }
 0x353   :  { %v5451_v13 = vpop.f32.mrf.mxu0 }
 0x354   :  { %v5452_v15 = vadd.f32 %v5451_v13, %v4692_v57  ;;  %v5464_v17 = vpop.f32.mrf.mxu1 }
 0x356   :  { %v5465_v18 = vadd.f32 %v5464_v17, %v5452_v15  ;;  %5831 = vmatpush.bf16.msra.mxu1 %v9403_v48  ;;  %5856 = vmatpush.bf16.msra.mxu3 %v9420_v46 }
 0x35a   :  { %5832 = vmatpush.bf16.msra.mxu1 %v9402_v1  ;;  %5857 = vmatpush.bf16.msra.mxu3 %v9419_v4 }
 0x35b   :  { %v5453_v54 = vpop.f32.mrf.mxu0 }
 0x35c   :  { %v5466_v35 = vpop.f32.mrf.mxu1 }
 0x35e   :  { %5833 = vmatpush.bf16.msra.mxu1 %v9401_v62  ;;  %5858 = vmatpush.bf16.msra.mxu3 %v9418_v8 }
 0x360   :  { %v5477_v19 = vpop.f32.mrf.mxu2 }
 0x361   :  { %v10039_v22 = vadd.f32 %v5477_v19, %v5465_v18 }
 0x362   :  { %5834 = vmatpush.bf16.msra.mxu1 %v9400_v59  ;;  %5859 = vmatpush.bf16.msra.mxu3 %v9417_v29 }
 0x366   :  { %5860 = vmatpush.bf16.msra.mxu3 %v9416_v12 }
 0x368   :  { %v5479_v32 = vpop.f32.mrf.mxu2 }
 0x369   :  { %v9439_v32 = vld [vmem:[#allocation16] ss:$0 sm:$0xff] }
 0x373   :  { %v5503_v34 = vpop.f32.mrf.mxu0 }
 0x374   :  { %v5504_v3 = vadd.f32 %v5503_v34, %v4693_v6  ;;  %v5516_v23 = vpop.f32.mrf.mxu1 }
 0x376   :  { %v5517_v27 = vadd.f32 %v5516_v23, %v5504_v3 }
 0x37b   :  { %v5505_v51 = vpop.f32.mrf.mxu0 }
 0x37c   :  { %v5518_v45 = vpop.f32.mrf.mxu1 }
 0x380   :  { %v5529_v2 = vpop.f32.mrf.mxu2 }
 0x381   :  { %v5530_v24 = vadd.f32 %v5529_v2, %v5517_v27 }
 0x388   :  { %v5531_v43 = vpop.f32.mrf.mxu2 }
 0x38c   :  { %v5386_v50 = vpop.f32.mrf.mxu3 }
 0x38d   :  { %v5387_v49 = vadd.f32 %v5386_v50, %v10031_v38 }
 0x38f   :  { %v5546_v53 = vmax.f32 %v5387_v49, 0.0 }
 0x391   :  { %v5550_v47 = vpack.c.bf16 %v5546_v53, %v5546_v53 }
 0x393   :  { %5822 = vmatmul.bf16.vlgmr.msra.gmra.mxu0 %v5550_v47 }
 0x394   :  { %v5388_v14 = vpop.f32.mrf.mxu3 }
 0x39c   :  { %v5438_v7 = vpop.f32.mrf.mxu3 }
 0x39d   :  { %v5439_v16 = vadd.f32 %v5438_v7, %v10035_v37 }
 0x39f   :  { %v5547_v38 = vmax.f32 %v5439_v16, 0.0 }
 0x3a1   :  { %v5551_v58 = vpack.c.bf16 %v5547_v38, %v5547_v38 }
 0x3a3   :  { %5835 = vmatmul.bf16.vlgmr.msra.gmra.mxu1 %v5551_v58 }
 0x3a4   :  { %v5440_v44 = vpop.f32.mrf.mxu3 }
 0x3ac   :  { %v5490_v11 = vpop.f32.mrf.mxu3 }
 0x3ad   :  { %v5491_v57 = vadd.f32 %v5490_v11, %v10039_v22 }
 0x3af   :  { %v5548_v13 = vmax.f32 %v5491_v57, 0.0 }
 0x3b1   :  { %v5552_v15 = vpack.c.bf16 %v5548_v13, %v5548_v13 }
 0x3b3   :  { %5848 = vmatmul.bf16.vlgmr.msra.gmra.mxu2 %v5552_v15 }
 0x3b4   :  { %v5492_v37 = vpop.f32.mrf.mxu3 }
 0x3cc   :  { %v5542_v17 = vpop.f32.mrf.mxu3 }
 0x3cd   :  { %v5543_v18 = vadd.f32 %v5542_v17, %v5530_v24 }
 0x3cf   :  { %v5549_v54 = vmax.f32 %v5543_v18, 0.0 }
 0x3d1   :  { %v5553_v35 = vpack.c.bf16 %v5549_v54, %v5549_v54 }
 0x3d3   :  { %5861 = vmatmul.bf16.vlgmr.msra.gmra.mxu3 %v5553_v35 }
 0x3d4   :  { %v5544_v60 = vpop.f32.mrf.mxu3 }
 0x410   :  { %v5823_v20 = vpop.f32.mrf.mxu0 }
 0x411   :  { %v5824_v33 = vadd.f32 %v9439_v32, %v5823_v20 }
 0x418   :  { %v5825_v19 = vpop.f32.mrf.mxu0 }
 0x420   :  { %v5836_v25 = vpop.f32.mrf.mxu1 }
 0x421   :  { %v5837_v22 = vadd.f32 %v5836_v25, %v5824_v33 }
 0x428   :  { %v5838_v36 = vpop.f32.mrf.mxu1 }
 0x436   :  { %v5849_v31 = vpop.f32.mrf.mxu2 }
 0x437   :  { %v5850_v6 = vadd.f32 %v5849_v31, %v5837_v22 }
 0x43e   :  { %v5851_v9 = vpop.f32.mrf.mxu2 }
 0x456   :  { %v5862_v21 = vpop.f32.mrf.mxu3 }
 0x457   :  { %v5863_v34 = vadd.f32 %v5862_v21, %v5850_v6 }
 0x459   :  { %5866 = vst [vmem:[#allocation17] sm:$0xff] %v5863_v34 }
 0x45a   :  { %5877 = dma.vmem_to_hbm [thread:$0]  %s5873_s8, 128, %s5875_s10, [#allocation4]  }
 0x45e   :  { %v5864_v3 = vpop.f32.mrf.mxu3 }
 0x45f   :  { %9692 = dma.done.wait [#allocation4], 128  }
 0x460   :  { %9693 = vsyncadd [#allocation4], 4294967168 }
 0x461   :  { %5882 = vsyncpa [#allocation3], 1 }
 0x462   :  { %5883 = vsyncpa [#allocation6], 1 }
 0x463   :  { %5884 = vsyncpa [#allocation9], 1 }
 0x464   :  { %5885 = vsyncpa [#allocation12], 1 }
 0x465   :  { %5886 = vsyncpa [#allocation15], 1 }
 0x466   :  { %5887 = vsyncpa [#allocation4], 1 }

</bundles_post_ra>
